<compile_context>
chip_gen: v7x
topology: tpu7x:2x2x1
jax: 0.10.0
libtpu: 0.0.40
codegen_flags: <defaults>
</compile_context>

<pallas_src>
import functools

import jax
import jax.numpy as jnp
from jax.experimental import pallas as pl
from jax.experimental.pallas import tpu as pltpu

NEG_SLOPE = 0.2     # negative_slope for LeakyReLU
NEG_INF = -1e30     # additive attention-mask value


def _vmem():
    return pl.BlockSpec(memory_space=pltpu.MemorySpace.VMEM)


def _smem():
    return pl.BlockSpec(memory_space=pltpu.MemorySpace.SMEM)


def _bf16_dot(a, b):
    """MXU matmul with bf16 operands and f32 accumulation."""
    return jnp.dot(a.astype(jnp.bfloat16), b.astype(jnp.bfloat16),
                   preferred_element_type=jnp.float32)


def _leaky_relu(x, slope):
    # single VPU max (valid for 0 < slope < 1)
    return jnp.maximum(x, slope * x)


# ---------------------------------------------------------------------------
# Fully fused GMAE forward kernel: encoder(2x GAT) + enc2dec + decoder(GAT)
# + SCE attribute loss + edge-reconstruction BCE  ->  one (1,1) loss scalar.
# ---------------------------------------------------------------------------
def gmae_fused_kernel(x_ref, maskcol_ref, bias_ref, wf0_ref, wf1_ref, wfd_ref,
                      wsrcT_ref, wmix_ref, sel_ref, loss_ref, vblk_ref,
                      *, n_dim, hidden_dim, d_enc, n_heads, n_layers,
                      thresh, num_mask, alpha, neg_slope):
    N = x_ref.shape[0]
    H = n_heads
    hid_tot = hidden_dim * n_layers

    x0 = x_ref[...]                        # (N, n_dim) ORIGINAL node attrs (SCE target)
    mask = maskcol_ref[...]                # (N, 1) 1.0 at masked nodes
    bias_all = bias_ref[...]               # (N, H*N) additive mask, tiled per head, f32
    wsrcT = wsrcT_ref[...]                 # packed 'source' attention vectors (transposed)
    wmix = wmix_ref[...]                   # packed small params + e2d + edge-head weights

    token = wmix[0:1, 0:n_dim]
    b1 = wmix[1:2, 0:hidden_dim]
    w2row = wmix[2:3, 0:hidden_dim]
    b2 = wmix[3:4, 0:1]
    we2d = wmix[8:8 + hid_tot, 0:hidden_dim]
    w1s = wmix[8 + hid_tot:8 + 2 * hid_tot, 0:hidden_dim]
    w1d = wmix[8 + 2 * hid_tot:8 + 3 * hid_tot, 0:hidden_dim]

    # encoding_mask_noise: overwrite masked rows with the mask token (no wrapper scatter)
    x_in = x0 * (1.0 - mask) + mask * token

    def gat_layer(x_l, wf, wsT, bias_seg, Hh, Dd, has_res_proj, res_add, act):
        # One wide MXU pass: h (N,Hh*Dd) | dst-logit columns already expanded to (N,Hh*N)
        # | optional projected residual.
        y = _bf16_dot(x_l, wf)
        hproj = y[:, :Hh * Dd]
        er = y[:, Hh * Dd:Hh * Dd + Hh * N]
        # 'source' logits need node index on lanes -> tiny transposed-contraction matmul.
        elT = jax.lax.dot_general(wsT.astype(jnp.bfloat16), x_l.astype(jnp.bfloat16),
                                  (((1,), (1,)), ((), ())),
                                  preferred_element_type=jnp.float32)        # (Hh, N)
        if Hh == 1:
            e = er + elT
        else:
            e = jnp.concatenate(
                [er[:, hd * N:(hd + 1) * N] + elT[hd:hd + 1, :] for hd in range(Hh)],
                axis=1)                                                       # (N, Hh*N)
        # batched (lane-dense) softmax math for all heads
        e = _leaky_relu(e, neg_slope) + bias_seg
        # shared per-row shift across head segments (softmax is shift-invariant per segment)
        m = jnp.max(e, axis=-1, keepdims=True)
        p = jnp.exp(e - m)                                                    # masked -> 0
        # block-diagonal [V | 1] RHS: one K=Hh*N matmul gives every head's numerator AND
        # softmax denominator (denominator replicated across that head's Dd lanes).
        vblk_ref[...] = jnp.zeros(vblk_ref.shape, jnp.float32)
        for hd in range(Hh):
            vblk_ref[hd * N:(hd + 1) * N, hd * Dd:(hd + 1) * Dd] = \
                hproj[:, hd * Dd:(hd + 1) * Dd]
            vblk_ref[hd * N:(hd + 1) * N,
                     Hh * Dd + hd * Dd:Hh * Dd + (hd + 1) * Dd] = \
                jnp.ones((N, Dd), jnp.float32)
        nd = _bf16_dot(p, vblk_ref[0:Hh * N, 0:2 * Hh * Dd])                  # (N, 2*Hh*Dd)
        denom = jnp.maximum(nd[:, Hh * Dd:], 1e-30)
        out = nd[:, :Hh * Dd] * pl.reciprocal(denom, approx=True)            # EUP recip
        if has_res_proj:
            out = out + y[:, Hh * Dd + Hh * N:]            # projected residual (folded)
        if res_add is not None:
            out = out + res_add                            # identity residual
        if act:
            out = jnp.maximum(out, 0.0)                    # ReLU
        return out

    ws0T = wsrcT[0:H, 0:n_dim]
    ws1T = wsrcT[8:8 + H, 0:hidden_dim]
    wsdT = wsrcT[16:17, 0:hidden_dim]

    # encoder (2 GAT layers) -> enc_rep = cat(all_hidden)
    h0 = gat_layer(x_in, wf0_ref[...], ws0T, bias_all, H, d_enc, True, None, True)
    h1 = gat_layer(h0, wf1_ref[...], ws1T, bias_all, H, d_enc, False, h0, True)
    enc_rep = jnp.concatenate([h0, h1], axis=-1)                              # (N, hid_tot)

    # encoder_to_decoder (Linear, no bias) + decoder GAT (1 head, no act/residual)
    rep = _bf16_dot(enc_rep, we2d)                                            # (N, hidden)
    recon = gat_layer(rep, wfd_ref[...], wsdT, bias_all[:, :N], 1, n_dim,
                      False, None, False)                                     # (N, n_dim)

    # ---- SCE attribute loss on masked nodes (recon vs ORIGINAL attrs), fused ----
    inv_r = jax.lax.rsqrt(jnp.maximum(jnp.sum(recon * recon, axis=-1, keepdims=True), 1e-12))
    inv_i = jax.lax.rsqrt(jnp.maximum(jnp.sum(x0 * x0, axis=-1, keepdims=True), 1e-12))
    cos = jnp.sum((recon * inv_r) * (x0 * inv_i), axis=-1, keepdims=True)     # (N, 1)
    d = 1.0 - cos
    per_node = d
    for _ in range(int(alpha) - 1):                       # (1 - cos)^alpha, alpha integer
        per_node = per_node * d
    loss_attr = jnp.sum(per_node * mask) * (1.0 / num_mask)

    # ---- edge reconstruction head, fused (one-hot matmul gathers, logit-space BCE) ----
    S2 = 2 * thresh
    sel = sel_ref[...]                                                        # (2*S2, N)
    gs = _bf16_dot(sel[0:S2, :], enc_rep)                                     # (S2, hid_tot)
    gd = _bf16_dot(sel[S2:2 * S2, :], enc_rep)
    z = _bf16_dot(gs, w1s) + _bf16_dot(gd, w1d) + b1                          # (S2, hidden)
    z = _leaky_relu(z, neg_slope)
    logit = jnp.sum(z * w2row, axis=-1, keepdims=True) + b2                   # (S2, 1)
    row = jax.lax.broadcasted_iota(jnp.int32, (S2, 1), 0)
    ylab = (row < thresh).astype(jnp.float32)                                 # first half = positives
    # BCE-with-logits == BCELoss(sigmoid(logit)), numerically stable softplus form
    softplus = jnp.maximum(logit, 0.0) + jnp.log(1.0 + jnp.exp(-jnp.abs(logit)))
    loss_edge = jnp.sum(softplus - ylab * logit) * (1.0 / S2)

    loss_ref[0, 0] = loss_attr + loss_edge


# ---------------------------------------------------------------------------
# Host-side parameter fusion / packing (done once, outside jit)
# ---------------------------------------------------------------------------
def _fuse_gat_layer(W, a_src, a_dst, N, R=None):
    """W:(d_in,H*D), a_src/a_dst:(H,D) -> fused projection [W | repeat(W@a_dst,N) | R]
    and transposed source vectors (H, d_in) (since a . (x W_h) == x . (W_h a))."""
    d_in = W.shape[0]
    H, D = a_dst.shape
    Wh = W.reshape(d_in, H, D)
    WD = jnp.einsum('khd,hd->kh', Wh, a_dst)          # (d_in, H)
    WS = jnp.einsum('khd,hd->kh', Wh, a_src)          # (d_in, H)
    er_cols = jnp.repeat(WD, N, axis=1)               # (d_in, H*N) lane-dense dst-logit cols
    parts = [W, er_cols]
    if R is not None:
        parts.append(R)
    return jnp.concatenate(parts, axis=1), WS.T


def pack_params(params, *, N, n_dim, hidden_dim, n_layers, n_heads):
    wf0, ws0T = _fuse_gat_layer(params["enc0_w"], params["enc0_asrc"],
                                params["enc0_adst"], N, R=params["enc0_res"])
    wf1, ws1T = _fuse_gat_layer(params["enc1_w"], params["enc1_asrc"],
                                params["enc1_adst"], N)
    wfd, wsdT = _fuse_gat_layer(params["dec_w"], params["dec_asrc"],
                                params["dec_adst"], N)
    wmax = max(n_dim, hidden_dim)
    # packed (8-row aligned) source-attention slab
    wsrcT = jnp.zeros((24, wmax), jnp.float32)
    wsrcT = wsrcT.at[0:n_heads, 0:n_dim].set(ws0T)
    wsrcT = wsrcT.at[8:8 + n_heads, 0:hidden_dim].set(ws1T)
    wsrcT = wsrcT.at[16:17, 0:hidden_dim].set(wsdT)
    # packed small-params slab: token | b1 | w2row | b2 | e2d | edge-head W1 (src/dst halves)
    hid_tot = hidden_dim * n_layers
    wmix = jnp.zeros((8 + 3 * hid_tot, wmax), jnp.float32)
    wmix = wmix.at[0, 0:n_dim].set(params["enc_mask_token"][0])
    wmix = wmix.at[1, 0:hidden_dim].set(params["er_b1"][0])
    wmix = wmix.at[2, 0:hidden_dim].set(params["er_w2_row"][0])
    wmix = wmix.at[3, 0].set(params["er_b2"][0, 0])
    wmix = wmix.at[8:8 + hid_tot, 0:hidden_dim].set(params["e2d_w"])
    wmix = wmix.at[8 + hid_tot:8 + 2 * hid_tot, 0:hidden_dim].set(params["er_w1"][:hid_tot])
    wmix = wmix.at[8 + 2 * hid_tot:8 + 3 * hid_tot, 0:hidden_dim].set(params["er_w1"][hid_tot:])
    return {"wf0": wf0, "wf1": wf1, "wfd": wfd, "wsrcT": wsrcT, "wmix": wmix}


# ---------------------------------------------------------------------------
# Parameter init (deterministic, xavier-uniform like the PyTorch init)
# ---------------------------------------------------------------------------
def xavier_uniform(key, shape):
    fan_in, fan_out = shape[0], shape[1]
    limit = jnp.sqrt(6.0 / (fan_in + fan_out))
    return jax.random.uniform(key, shape, jnp.float32, -limit, limit)


def init_params(key, *, n_dim, hidden_dim, n_layers, n_heads):
    d_enc = hidden_dim // n_heads
    ks = jax.random.split(key, 16)
    p = {}
    p["enc0_w"] = xavier_uniform(ks[0], (n_dim, hidden_dim))
    p["enc0_asrc"] = xavier_uniform(ks[1], (n_heads, d_enc))
    p["enc0_adst"] = xavier_uniform(ks[2], (n_heads, d_enc))
    p["enc0_res"] = xavier_uniform(ks[3], (n_dim, hidden_dim))
    p["enc1_w"] = xavier_uniform(ks[4], (hidden_dim, hidden_dim))
    p["enc1_asrc"] = xavier_uniform(ks[5], (n_heads, d_enc))
    p["enc1_adst"] = xavier_uniform(ks[6], (n_heads, d_enc))
    p["dec_w"] = xavier_uniform(ks[7], (hidden_dim, n_dim))
    p["dec_asrc"] = xavier_uniform(ks[8], (1, n_dim))
    p["dec_adst"] = xavier_uniform(ks[9], (1, n_dim))
    p["e2d_w"] = xavier_uniform(ks[10], (hidden_dim * n_layers, hidden_dim))
    p["er_w1"] = xavier_uniform(ks[11], (hidden_dim * n_layers * 2, hidden_dim))
    p["er_b1"] = jnp.zeros((1, hidden_dim), jnp.float32)
    p["er_w2_row"] = xavier_uniform(ks[12], (1, hidden_dim))
    p["er_b2"] = jnp.zeros((1, 1), jnp.float32)
    p["enc_mask_token"] = jnp.zeros((1, n_dim), jnp.float32)
    return p


# ---------------------------------------------------------------------------
# GMAE forward (== compute_loss): one pallas_call emitting one loss scalar
# ---------------------------------------------------------------------------
def gmae_forward(packed, x, adj_gat, edges_src, edges_dst, rng_key, *,
                 n_dim, hidden_dim, n_layers, n_heads, mask_rate, alpha_l,
                 neg_slope=NEG_SLOPE):
    N = x.shape[0]
    E = edges_src.shape[0]
    d_enc = hidden_dim // n_heads
    num_mask = int(mask_rate * N)
    assert num_mask > 0
    thresh = min(10000, N)          # NOTE: like the reference, requires thresh <= E
    k_mask, k_pos, k_neg_s, k_neg_d = jax.random.split(rng_key, 4)

    # encoding_mask_noise: mask indicator column (token applied in-kernel)
    perm = jax.random.permutation(k_mask, N)
    mask_nodes = perm[:num_mask]
    mask_col = jnp.zeros((N,), jnp.float32).at[mask_nodes].set(1.0)[:, None]

    # additive attention-mask bias, pre-tiled per head -> lane-dense (N, H*N), f32
    bias = jnp.where(adj_gat > 0, 0.0, NEG_INF).astype(jnp.float32)
    bias_tiled = jnp.tile(bias, (1, n_heads))

    # edge sampling: positives without replacement, uniform negatives
    pos_idx = jax.random.choice(k_pos, E, (thresh,), replace=False)
    src_all = jnp.concatenate([edges_src[pos_idx],
                               jax.random.randint(k_neg_s, (thresh,), 0, N)])
    dst_all = jnp.concatenate([edges_dst[pos_idx],
                               jax.random.randint(k_neg_d, (thresh,), 0, N)])
    # one-hot selection matrices: in-kernel row gather of enc_rep via an MXU matmul
    selcat = jnp.concatenate([jax.nn.one_hot(src_all, N, dtype=jnp.float32),
                              jax.nn.one_hot(dst_all, N, dtype=jnp.float32)], axis=0)

    kern = functools.partial(
        gmae_fused_kernel, n_dim=n_dim, hidden_dim=hidden_dim, d_enc=d_enc,
        n_heads=n_heads, n_layers=n_layers, thresh=thresh, num_mask=num_mask,
        alpha=alpha_l, neg_slope=neg_slope)

    scratch_rows = n_heads * N
    scratch_cols = max(2 * n_heads * d_enc, 2 * n_dim)

    loss = pl.pallas_call(
        kern,
        out_shape=jax.ShapeDtypeStruct((1, 1), jnp.float32),
        in_specs=[_vmem()] * 9,
        out_specs=_smem(),
        scratch_shapes=[pltpu.VMEM((scratch_rows, scratch_cols), jnp.float32)],
    )(x, mask_col, bias_tiled, packed["wf0"], packed["wf1"], packed["wfd"],
      packed["wsrcT"], packed["wmix"], selcat)
    return loss[0, 0]


# ---------------------------------------------------------------------------
if __name__ == "__main__":
    # Small config consistent with the module's __init__
    N = 32          # nodes
    E = 128         # edges
    n_dim = 16      # node feature dim
    e_dim = 16      # edge feature dim (unused in attention, see TODO above)
    hidden_dim = 32
    n_layers = 2
    n_heads = 4
    mask_rate = 0.5
    alpha_l = 2

    key = jax.random.PRNGKey(0)
    k_feat, k_src, k_dst, k_param, k_fwd = jax.random.split(key, 5)

    # graph: node attrs + random directed edge list + dense adjacency (with self-loops)
    x = jax.random.normal(k_feat, (N, n_dim), jnp.float32)
    edges_src = jax.random.randint(k_src, (E,), 0, N)
    edges_dst = jax.random.randint(k_dst, (E,), 0, N)
    adj = jnp.zeros((N, N), jnp.float32).at[edges_dst, edges_src].set(1.0)
    adj_gat = jnp.maximum(adj, jnp.eye(N, dtype=jnp.float32))

    params = init_params(k_param, n_dim=n_dim, hidden_dim=hidden_dim,
                         n_layers=n_layers, n_heads=n_heads)
    packed = pack_params(params, N=N, n_dim=n_dim, hidden_dim=hidden_dim,
                         n_layers=n_layers, n_heads=n_heads)

    fwd = jax.jit(functools.partial(
        gmae_forward, n_dim=n_dim, hidden_dim=hidden_dim, n_layers=n_layers,
        n_heads=n_heads, mask_rate=mask_rate, alpha_l=alpha_l))

    loss = fwd(packed, x, adj_gat, edges_src, edges_dst, k_fwd)
    loss = jax.block_until_ready(loss)
    assert jnp.isfinite(loss), f"non-finite loss: {loss}"
    print("KERNEL_OK")
</pallas_src>

<mosaic_0001>
module attributes {stable_mosaic.version = 11 : i64} {
  func.func @gmae_fused_kernel(%arg0: memref<32x16xf32, #tpu.memory_space<vmem>>, %arg1: memref<32x1xf32, #tpu.memory_space<vmem>>, %arg2: memref<32x128xf32, #tpu.memory_space<vmem>>, %arg3: memref<16x192xf32, #tpu.memory_space<vmem>>, %arg4: memref<32x160xf32, #tpu.memory_space<vmem>>, %arg5: memref<32x48xf32, #tpu.memory_space<vmem>>, %arg6: memref<24x32xf32, #tpu.memory_space<vmem>>, %arg7: memref<200x32xf32, #tpu.memory_space<vmem>>, %arg8: memref<128x32xf32, #tpu.memory_space<vmem>>, %arg9: memref<1x1xf32, #tpu.memory_space<smem>>, %arg10: memref<128x64xf32, #tpu.memory_space<vmem>>) attributes {dimension_semantics = [], scalar_prefetch = 0 : i64, scratch_operands = 1 : i64, tpu.core_type = #tpu.core_type<tc>} {
    %c0 = arith.constant 0 : index
    %c0_0 = arith.constant 0 : index
    %0 = vector.load %arg0[%c0, %c0_0] : memref<32x16xf32, #tpu.memory_space<vmem>>, vector<32x16xf32>
    %c0_1 = arith.constant 0 : index
    %c0_2 = arith.constant 0 : index
    %1 = vector.load %arg1[%c0_1, %c0_2] : memref<32x1xf32, #tpu.memory_space<vmem>>, vector<32x1xf32>
    %c0_3 = arith.constant 0 : index
    %c0_4 = arith.constant 0 : index
    %2 = vector.load %arg2[%c0_3, %c0_4] : memref<32x128xf32, #tpu.memory_space<vmem>>, vector<32x128xf32>
    %c0_5 = arith.constant 0 : index
    %c0_6 = arith.constant 0 : index
    %3 = vector.load %arg6[%c0_5, %c0_6] : memref<24x32xf32, #tpu.memory_space<vmem>>, vector<24x32xf32>
    %c0_7 = arith.constant 0 : index
    %c0_8 = arith.constant 0 : index
    %4 = vector.load %arg7[%c0_7, %c0_8] : memref<200x32xf32, #tpu.memory_space<vmem>>, vector<200x32xf32>
    %5 = vector.extract_strided_slice %4 {offsets = [0, 0], sizes = [1, 16], strides = [1, 1]} : vector<200x32xf32> to vector<1x16xf32>
    %6 = vector.extract_strided_slice %4 {offsets = [1, 0], sizes = [1, 32], strides = [1, 1]} : vector<200x32xf32> to vector<1x32xf32>
    %7 = vector.extract_strided_slice %4 {offsets = [2, 0], sizes = [1, 32], strides = [1, 1]} : vector<200x32xf32> to vector<1x32xf32>
    %8 = vector.extract_strided_slice %4 {offsets = [3, 0], sizes = [1, 1], strides = [1, 1]} : vector<200x32xf32> to vector<1x1xf32>
    %9 = vector.extract_strided_slice %4 {offsets = [8, 0], sizes = [64, 32], strides = [1, 1]} : vector<200x32xf32> to vector<64x32xf32>
    %10 = vector.extract_strided_slice %4 {offsets = [72, 0], sizes = [64, 32], strides = [1, 1]} : vector<200x32xf32> to vector<64x32xf32>
    %11 = vector.extract_strided_slice %4 {offsets = [136, 0], sizes = [64, 32], strides = [1, 1]} : vector<200x32xf32> to vector<64x32xf32>
    %cst = arith.constant 1.000000e+00 : f32
    %12 = vector.broadcast %cst : f32 to vector<32x1xf32>
    %13 = arith.subf %12, %1 : vector<32x1xf32>
    %14 = vector.broadcast %13 : vector<32x1xf32> to vector<32x16xf32>
    %15 = arith.mulf %0, %14 : vector<32x16xf32>
    %16 = vector.broadcast %1 : vector<32x1xf32> to vector<32x16xf32>
    %17 = vector.broadcast %5 : vector<1x16xf32> to vector<32x16xf32>
    %18 = arith.mulf %16, %17 : vector<32x16xf32>
    %19 = arith.addf %15, %18 : vector<32x16xf32>
    %20 = vector.extract_strided_slice %3 {offsets = [0, 0], sizes = [4, 16], strides = [1, 1]} : vector<24x32xf32> to vector<4x16xf32>
    %21 = vector.extract_strided_slice %3 {offsets = [8, 0], sizes = [4, 32], strides = [1, 1]} : vector<24x32xf32> to vector<4x32xf32>
    %22 = vector.extract_strided_slice %3 {offsets = [16, 0], sizes = [1, 32], strides = [1, 1]} : vector<24x32xf32> to vector<1x32xf32>
    %c0_9 = arith.constant 0 : index
    %c0_10 = arith.constant 0 : index
    %23 = vector.load %arg3[%c0_9, %c0_10] : memref<16x192xf32, #tpu.memory_space<vmem>>, vector<16x192xf32>
    %24 = arith.truncf %19 : vector<32x16xf32> to vector<32x16xbf16>
    %25 = arith.truncf %23 : vector<16x192xf32> to vector<16x192xbf16>
    %cst_11 = arith.constant dense<0.000000e+00> : vector<32x192xf32>
    %26 = tpu.matmul %24, %25, %cst_11 {dimension_numbers = #tpu.dot_dimension_numbers<[1], [0], [0], [1], [0, 0, 1, 1], [], []>} : vector<32x16xbf16>, vector<16x192xbf16>, vector<32x192xf32> -> vector<32x192xf32>
    %27 = vector.extract_strided_slice %26 {offsets = [0, 0], sizes = [32, 32], strides = [1, 1]} : vector<32x192xf32> to vector<32x32xf32>
    %28 = vector.extract_strided_slice %26 {offsets = [0, 32], sizes = [32, 128], strides = [1, 1]} : vector<32x192xf32> to vector<32x128xf32>
    %29 = arith.truncf %20 : vector<4x16xf32> to vector<4x16xbf16>
    %30 = arith.truncf %19 : vector<32x16xf32> to vector<32x16xbf16>
    %cst_12 = arith.constant dense<0.000000e+00> : vector<4x32xf32>
    %31 = tpu.matmul %29, %30, %cst_12 {dimension_numbers = #tpu.dot_dimension_numbers<[1], [1], [0], [0], [0, 0, 1, 0], [], []>} : vector<4x16xbf16>, vector<32x16xbf16>, vector<4x32xf32> -> vector<4x32xf32>
    %32 = vector.extract_strided_slice %28 {offsets = [0, 0], sizes = [32, 32], strides = [1, 1]} : vector<32x128xf32> to vector<32x32xf32>
    %33 = vector.extract_strided_slice %31 {offsets = [0, 0], sizes = [1, 32], strides = [1, 1]} : vector<4x32xf32> to vector<1x32xf32>
    %34 = vector.broadcast %33 : vector<1x32xf32> to vector<32x32xf32>
    %35 = arith.addf %32, %34 : vector<32x32xf32>
    %36 = vector.extract_strided_slice %28 {offsets = [0, 32], sizes = [32, 32], strides = [1, 1]} : vector<32x128xf32> to vector<32x32xf32>
    %37 = vector.extract_strided_slice %31 {offsets = [1, 0], sizes = [1, 32], strides = [1, 1]} : vector<4x32xf32> to vector<1x32xf32>
    %38 = vector.broadcast %37 : vector<1x32xf32> to vector<32x32xf32>
    %39 = arith.addf %36, %38 : vector<32x32xf32>
    %40 = vector.extract_strided_slice %28 {offsets = [0, 64], sizes = [32, 32], strides = [1, 1]} : vector<32x128xf32> to vector<32x32xf32>
    %41 = vector.extract_strided_slice %31 {offsets = [2, 0], sizes = [1, 32], strides = [1, 1]} : vector<4x32xf32> to vector<1x32xf32>
    %42 = vector.broadcast %41 : vector<1x32xf32> to vector<32x32xf32>
    %43 = arith.addf %40, %42 : vector<32x32xf32>
    %44 = vector.extract_strided_slice %28 {offsets = [0, 96], sizes = [32, 32], strides = [1, 1]} : vector<32x128xf32> to vector<32x32xf32>
    %45 = vector.extract_strided_slice %31 {offsets = [3, 0], sizes = [1, 32], strides = [1, 1]} : vector<4x32xf32> to vector<1x32xf32>
    %46 = vector.broadcast %45 : vector<1x32xf32> to vector<32x32xf32>
    %47 = arith.addf %44, %46 : vector<32x32xf32>
    %48 = tpu.concatenate %35, %39, %43, %47 in 1 : vector<32x32xf32>, vector<32x32xf32>, vector<32x32xf32>, vector<32x32xf32> -> vector<32x128xf32>
    %cst_13 = arith.constant 2.000000e-01 : f32
    %49 = vector.broadcast %cst_13 : f32 to vector<32x128xf32>
    %50 = arith.mulf %49, %48 : vector<32x128xf32>
    %51 = arith.maximumf %48, %50 : vector<32x128xf32>
    %52 = arith.addf %51, %2 : vector<32x128xf32>
    %cst_14 = arith.constant dense<0xFF800000> : vector<32xf32>
    %53 = vector.multi_reduction <maximumf>, %52, %cst_14 [1] : vector<32x128xf32> to vector<32xf32>
    %54 = vector.shape_cast %53 : vector<32xf32> to vector<32x1xf32>
    %55 = vector.broadcast %54 : vector<32x1xf32> to vector<32x128xf32>
    %56 = arith.subf %52, %55 : vector<32x128xf32>
    %57 = math.exp %56 : vector<32x128xf32>
    %cst_15 = arith.constant 0.000000e+00 : f32
    %58 = vector.broadcast %cst_15 : f32 to vector<128x64xf32>
    %c0_16 = arith.constant 0 : index
    %c0_17 = arith.constant 0 : index
    %59 = vector.load %arg10[%c0_16, %c0_17] : memref<128x64xf32, #tpu.memory_space<vmem>>, vector<128x64xf32>
    tpu.vector_store %arg10[%c0_16, %c0_17], %58 {strides = array<i32>} : memref<128x64xf32, #tpu.memory_space<vmem>>, vector<128x64xf32>,
    %60 = vector.extract_strided_slice %27 {offsets = [0, 0], sizes = [32, 8], strides = [1, 1]} : vector<32x32xf32> to vector<32x8xf32>
    %c0_18 = arith.constant 0 : index
    %c0_19 = arith.constant 0 : index
    %61 = vector.load %arg10[%c0_18, %c0_19] : memref<128x64xf32, #tpu.memory_space<vmem>>, vector<32x8xf32>
    tpu.vector_store %arg10[%c0_18, %c0_19], %60 {strides = array<i32>} : memref<128x64xf32, #tpu.memory_space<vmem>>, vector<32x8xf32>,
    %cst_20 = arith.constant 1.000000e+00 : f32
    %62 = vector.broadcast %cst_20 : f32 to vector<32x8xf32>
    %c0_21 = arith.constant 0 : index
    %c32 = arith.constant 32 : index
    %63 = vector.load %arg10[%c0_21, %c32] : memref<128x64xf32, #tpu.memory_space<vmem>>, vector<32x8xf32>
    tpu.vector_store %arg10[%c0_21, %c32], %62 {strides = array<i32>} : memref<128x64xf32, #tpu.memory_space<vmem>>, vector<32x8xf32>,
    %64 = vector.extract_strided_slice %27 {offsets = [0, 8], sizes = [32, 8], strides = [1, 1]} : vector<32x32xf32> to vector<32x8xf32>
    %c32_22 = arith.constant 32 : index
    %c8 = arith.constant 8 : index
    %65 = vector.load %arg10[%c32_22, %c8] : memref<128x64xf32, #tpu.memory_space<vmem>>, vector<32x8xf32>
    tpu.vector_store %arg10[%c32_22, %c8], %64 {strides = array<i32>} : memref<128x64xf32, #tpu.memory_space<vmem>>, vector<32x8xf32>,
    %cst_23 = arith.constant 1.000000e+00 : f32
    %66 = vector.broadcast %cst_23 : f32 to vector<32x8xf32>
    %c32_24 = arith.constant 32 : index
    %c40 = arith.constant 40 : index
    %67 = vector.load %arg10[%c32_24, %c40] : memref<128x64xf32, #tpu.memory_space<vmem>>, vector<32x8xf32>
    tpu.vector_store %arg10[%c32_24, %c40], %66 {strides = array<i32>} : memref<128x64xf32, #tpu.memory_space<vmem>>, vector<32x8xf32>,
    %68 = vector.extract_strided_slice %27 {offsets = [0, 16], sizes = [32, 8], strides = [1, 1]} : vector<32x32xf32> to vector<32x8xf32>
    %c64 = arith.constant 64 : index
    %c16 = arith.constant 16 : index
    %69 = vector.load %arg10[%c64, %c16] : memref<128x64xf32, #tpu.memory_space<vmem>>, vector<32x8xf32>
    tpu.vector_store %arg10[%c64, %c16], %68 {strides = array<i32>} : memref<128x64xf32, #tpu.memory_space<vmem>>, vector<32x8xf32>,
    %cst_25 = arith.constant 1.000000e+00 : f32
    %70 = vector.broadcast %cst_25 : f32 to vector<32x8xf32>
    %c64_26 = arith.constant 64 : index
    %c48 = arith.constant 48 : index
    %71 = vector.load %arg10[%c64_26, %c48] : memref<128x64xf32, #tpu.memory_space<vmem>>, vector<32x8xf32>
    tpu.vector_store %arg10[%c64_26, %c48], %70 {strides = array<i32>} : memref<128x64xf32, #tpu.memory_space<vmem>>, vector<32x8xf32>,
    %72 = vector.extract_strided_slice %27 {offsets = [0, 24], sizes = [32, 8], strides = [1, 1]} : vector<32x32xf32> to vector<32x8xf32>
    %c96 = arith.constant 96 : index
    %c24 = arith.constant 24 : index
    %73 = vector.load %arg10[%c96, %c24] : memref<128x64xf32, #tpu.memory_space<vmem>>, vector<32x8xf32>
    tpu.vector_store %arg10[%c96, %c24], %72 {strides = array<i32>} : memref<128x64xf32, #tpu.memory_space<vmem>>, vector<32x8xf32>,
    %cst_27 = arith.constant 1.000000e+00 : f32
    %74 = vector.broadcast %cst_27 : f32 to vector<32x8xf32>
    %c96_28 = arith.constant 96 : index
    %c56 = arith.constant 56 : index
    %75 = vector.load %arg10[%c96_28, %c56] : memref<128x64xf32, #tpu.memory_space<vmem>>, vector<32x8xf32>
    tpu.vector_store %arg10[%c96_28, %c56], %74 {strides = array<i32>} : memref<128x64xf32, #tpu.memory_space<vmem>>, vector<32x8xf32>,
    %c0_29 = arith.constant 0 : index
    %c0_30 = arith.constant 0 : index
    %76 = vector.load %arg10[%c0_29, %c0_30] : memref<128x64xf32, #tpu.memory_space<vmem>>, vector<128x64xf32>
    %77 = arith.truncf %57 : vector<32x128xf32> to vector<32x128xbf16>
    %78 = arith.truncf %76 : vector<128x64xf32> to vector<128x64xbf16>
    %cst_31 = arith.constant dense<0.000000e+00> : vector<32x64xf32>
    %79 = tpu.matmul %77, %78, %cst_31 {dimension_numbers = #tpu.dot_dimension_numbers<[1], [0], [0], [1], [0, 0, 1, 1], [], []>} : vector<32x128xbf16>, vector<128x64xbf16>, vector<32x64xf32> -> vector<32x64xf32>
    %80 = vector.extract_strided_slice %79 {offsets = [0, 32], sizes = [32, 32], strides = [1, 1]} : vector<32x64xf32> to vector<32x32xf32>
    %cst_32 = arith.constant 1.000000e-30 : f32
    %81 = vector.broadcast %cst_32 : f32 to vector<32x32xf32>
    %82 = arith.maximumf %80, %81 : vector<32x32xf32>
    %83 = vector.extract_strided_slice %79 {offsets = [0, 0], sizes = [32, 32], strides = [1, 1]} : vector<32x64xf32> to vector<32x32xf32>
    %84 = tpu.reciprocal %82 {approx = true} : vector<32x32xf32> -> vector<32x32xf32>
    %85 = arith.mulf %83, %84 : vector<32x32xf32>
    %86 = vector.extract_strided_slice %26 {offsets = [0, 160], sizes = [32, 32], strides = [1, 1]} : vector<32x192xf32> to vector<32x32xf32>
    %87 = arith.addf %85, %86 : vector<32x32xf32>
    %cst_33 = arith.constant 0.000000e+00 : f32
    %88 = vector.broadcast %cst_33 : f32 to vector<32x32xf32>
    %89 = arith.maximumf %87, %88 : vector<32x32xf32>
    %c0_34 = arith.constant 0 : index
    %c0_35 = arith.constant 0 : index
    %90 = vector.load %arg4[%c0_34, %c0_35] : memref<32x160xf32, #tpu.memory_space<vmem>>, vector<32x160xf32>
    %91 = arith.truncf %89 : vector<32x32xf32> to vector<32x32xbf16>
    %92 = arith.truncf %90 : vector<32x160xf32> to vector<32x160xbf16>
    %cst_36 = arith.constant dense<0.000000e+00> : vector<32x160xf32>
    %93 = tpu.matmul %91, %92, %cst_36 {dimension_numbers = #tpu.dot_dimension_numbers<[1], [0], [0], [1], [0, 0, 1, 1], [], []>} : vector<32x32xbf16>, vector<32x160xbf16>, vector<32x160xf32> -> vector<32x160xf32>
    %94 = vector.extract_strided_slice %93 {offsets = [0, 0], sizes = [32, 32], strides = [1, 1]} : vector<32x160xf32> to vector<32x32xf32>
    %95 = vector.extract_strided_slice %93 {offsets = [0, 32], sizes = [32, 128], strides = [1, 1]} : vector<32x160xf32> to vector<32x128xf32>
    %96 = arith.truncf %21 : vector<4x32xf32> to vector<4x32xbf16>
    %97 = arith.truncf %89 : vector<32x32xf32> to vector<32x32xbf16>
    %cst_37 = arith.constant dense<0.000000e+00> : vector<4x32xf32>
    %98 = tpu.matmul %96, %97, %cst_37 {dimension_numbers = #tpu.dot_dimension_numbers<[1], [1], [0], [0], [0, 0, 1, 0], [], []>} : vector<4x32xbf16>, vector<32x32xbf16>, vector<4x32xf32> -> vector<4x32xf32>
    %99 = vector.extract_strided_slice %95 {offsets = [0, 0], sizes = [32, 32], strides = [1, 1]} : vector<32x128xf32> to vector<32x32xf32>
    %100 = vector.extract_strided_slice %98 {offsets = [0, 0], sizes = [1, 32], strides = [1, 1]} : vector<4x32xf32> to vector<1x32xf32>
    %101 = vector.broadcast %100 : vector<1x32xf32> to vector<32x32xf32>
    %102 = arith.addf %99, %101 : vector<32x32xf32>
    %103 = vector.extract_strided_slice %95 {offsets = [0, 32], sizes = [32, 32], strides = [1, 1]} : vector<32x128xf32> to vector<32x32xf32>
    %104 = vector.extract_strided_slice %98 {offsets = [1, 0], sizes = [1, 32], strides = [1, 1]} : vector<4x32xf32> to vector<1x32xf32>
    %105 = vector.broadcast %104 : vector<1x32xf32> to vector<32x32xf32>
    %106 = arith.addf %103, %105 : vector<32x32xf32>
    %107 = vector.extract_strided_slice %95 {offsets = [0, 64], sizes = [32, 32], strides = [1, 1]} : vector<32x128xf32> to vector<32x32xf32>
    %108 = vector.extract_strided_slice %98 {offsets = [2, 0], sizes = [1, 32], strides = [1, 1]} : vector<4x32xf32> to vector<1x32xf32>
    %109 = vector.broadcast %108 : vector<1x32xf32> to vector<32x32xf32>
    %110 = arith.addf %107, %109 : vector<32x32xf32>
    %111 = vector.extract_strided_slice %95 {offsets = [0, 96], sizes = [32, 32], strides = [1, 1]} : vector<32x128xf32> to vector<32x32xf32>
    %112 = vector.extract_strided_slice %98 {offsets = [3, 0], sizes = [1, 32], strides = [1, 1]} : vector<4x32xf32> to vector<1x32xf32>
    %113 = vector.broadcast %112 : vector<1x32xf32> to vector<32x32xf32>
    %114 = arith.addf %111, %113 : vector<32x32xf32>
    %115 = tpu.concatenate %102, %106, %110, %114 in 1 : vector<32x32xf32>, vector<32x32xf32>, vector<32x32xf32>, vector<32x32xf32> -> vector<32x128xf32>
    %cst_38 = arith.constant 2.000000e-01 : f32
    %116 = vector.broadcast %cst_38 : f32 to vector<32x128xf32>
    %117 = arith.mulf %116, %115 : vector<32x128xf32>
    %118 = arith.maximumf %115, %117 : vector<32x128xf32>
    %119 = arith.addf %118, %2 : vector<32x128xf32>
    %cst_39 = arith.constant dense<0xFF800000> : vector<32xf32>
    %120 = vector.multi_reduction <maximumf>, %119, %cst_39 [1] : vector<32x128xf32> to vector<32xf32>
    %121 = vector.shape_cast %120 : vector<32xf32> to vector<32x1xf32>
    %122 = vector.broadcast %121 : vector<32x1xf32> to vector<32x128xf32>
    %123 = arith.subf %119, %122 : vector<32x128xf32>
    %124 = math.exp %123 : vector<32x128xf32>
    %cst_40 = arith.constant 0.000000e+00 : f32
    %125 = vector.broadcast %cst_40 : f32 to vector<128x64xf32>
    %c0_41 = arith.constant 0 : index
    %c0_42 = arith.constant 0 : index
    %126 = vector.load %arg10[%c0_41, %c0_42] : memref<128x64xf32, #tpu.memory_space<vmem>>, vector<128x64xf32>
    tpu.vector_store %arg10[%c0_41, %c0_42], %125 {strides = array<i32>} : memref<128x64xf32, #tpu.memory_space<vmem>>, vector<128x64xf32>,
    %127 = vector.extract_strided_slice %94 {offsets = [0, 0], sizes = [32, 8], strides = [1, 1]} : vector<32x32xf32> to vector<32x8xf32>
    %c0_43 = arith.constant 0 : index
    %c0_44 = arith.constant 0 : index
    %128 = vector.load %arg10[%c0_43, %c0_44] : memref<128x64xf32, #tpu.memory_space<vmem>>, vector<32x8xf32>
    tpu.vector_store %arg10[%c0_43, %c0_44], %127 {strides = array<i32>} : memref<128x64xf32, #tpu.memory_space<vmem>>, vector<32x8xf32>,
    %cst_45 = arith.constant 1.000000e+00 : f32
    %129 = vector.broadcast %cst_45 : f32 to vector<32x8xf32>
    %c0_46 = arith.constant 0 : index
    %c32_47 = arith.constant 32 : index
    %130 = vector.load %arg10[%c0_46, %c32_47] : memref<128x64xf32, #tpu.memory_space<vmem>>, vector<32x8xf32>
    tpu.vector_store %arg10[%c0_46, %c32_47], %129 {strides = array<i32>} : memref<128x64xf32, #tpu.memory_space<vmem>>, vector<32x8xf32>,
    %131 = vector.extract_strided_slice %94 {offsets = [0, 8], sizes = [32, 8], strides = [1, 1]} : vector<32x32xf32> to vector<32x8xf32>
    %c32_48 = arith.constant 32 : index
    %c8_49 = arith.constant 8 : index
    %132 = vector.load %arg10[%c32_48, %c8_49] : memref<128x64xf32, #tpu.memory_space<vmem>>, vector<32x8xf32>
    tpu.vector_store %arg10[%c32_48, %c8_49], %131 {strides = array<i32>} : memref<128x64xf32, #tpu.memory_space<vmem>>, vector<32x8xf32>,
    %cst_50 = arith.constant 1.000000e+00 : f32
    %133 = vector.broadcast %cst_50 : f32 to vector<32x8xf32>
    %c32_51 = arith.constant 32 : index
    %c40_52 = arith.constant 40 : index
    %134 = vector.load %arg10[%c32_51, %c40_52] : memref<128x64xf32, #tpu.memory_space<vmem>>, vector<32x8xf32>
    tpu.vector_store %arg10[%c32_51, %c40_52], %133 {strides = array<i32>} : memref<128x64xf32, #tpu.memory_space<vmem>>, vector<32x8xf32>,
    %135 = vector.extract_strided_slice %94 {offsets = [0, 16], sizes = [32, 8], strides = [1, 1]} : vector<32x32xf32> to vector<32x8xf32>
    %c64_53 = arith.constant 64 : index
    %c16_54 = arith.constant 16 : index
    %136 = vector.load %arg10[%c64_53, %c16_54] : memref<128x64xf32, #tpu.memory_space<vmem>>, vector<32x8xf32>
    tpu.vector_store %arg10[%c64_53, %c16_54], %135 {strides = array<i32>} : memref<128x64xf32, #tpu.memory_space<vmem>>, vector<32x8xf32>,
    %cst_55 = arith.constant 1.000000e+00 : f32
    %137 = vector.broadcast %cst_55 : f32 to vector<32x8xf32>
    %c64_56 = arith.constant 64 : index
    %c48_57 = arith.constant 48 : index
    %138 = vector.load %arg10[%c64_56, %c48_57] : memref<128x64xf32, #tpu.memory_space<vmem>>, vector<32x8xf32>
    tpu.vector_store %arg10[%c64_56, %c48_57], %137 {strides = array<i32>} : memref<128x64xf32, #tpu.memory_space<vmem>>, vector<32x8xf32>,
    %139 = vector.extract_strided_slice %94 {offsets = [0, 24], sizes = [32, 8], strides = [1, 1]} : vector<32x32xf32> to vector<32x8xf32>
    %c96_58 = arith.constant 96 : index
    %c24_59 = arith.constant 24 : index
    %140 = vector.load %arg10[%c96_58, %c24_59] : memref<128x64xf32, #tpu.memory_space<vmem>>, vector<32x8xf32>
    tpu.vector_store %arg10[%c96_58, %c24_59], %139 {strides = array<i32>} : memref<128x64xf32, #tpu.memory_space<vmem>>, vector<32x8xf32>,
    %cst_60 = arith.constant 1.000000e+00 : f32
    %141 = vector.broadcast %cst_60 : f32 to vector<32x8xf32>
    %c96_61 = arith.constant 96 : index
    %c56_62 = arith.constant 56 : index
    %142 = vector.load %arg10[%c96_61, %c56_62] : memref<128x64xf32, #tpu.memory_space<vmem>>, vector<32x8xf32>
    tpu.vector_store %arg10[%c96_61, %c56_62], %141 {strides = array<i32>} : memref<128x64xf32, #tpu.memory_space<vmem>>, vector<32x8xf32>,
    %c0_63 = arith.constant 0 : index
    %c0_64 = arith.constant 0 : index
    %143 = vector.load %arg10[%c0_63, %c0_64] : memref<128x64xf32, #tpu.memory_space<vmem>>, vector<128x64xf32>
    %144 = arith.truncf %124 : vector<32x128xf32> to vector<32x128xbf16>
    %145 = arith.truncf %143 : vector<128x64xf32> to vector<128x64xbf16>
    %cst_65 = arith.constant dense<0.000000e+00> : vector<32x64xf32>
    %146 = tpu.matmul %144, %145, %cst_65 {dimension_numbers = #tpu.dot_dimension_numbers<[1], [0], [0], [1], [0, 0, 1, 1], [], []>} : vector<32x128xbf16>, vector<128x64xbf16>, vector<32x64xf32> -> vector<32x64xf32>
    %147 = vector.extract_strided_slice %146 {offsets = [0, 32], sizes = [32, 32], strides = [1, 1]} : vector<32x64xf32> to vector<32x32xf32>
    %cst_66 = arith.constant 1.000000e-30 : f32
    %148 = vector.broadcast %cst_66 : f32 to vector<32x32xf32>
    %149 = arith.maximumf %147, %148 : vector<32x32xf32>
    %150 = vector.extract_strided_slice %146 {offsets = [0, 0], sizes = [32, 32], strides = [1, 1]} : vector<32x64xf32> to vector<32x32xf32>
    %151 = tpu.reciprocal %149 {approx = true} : vector<32x32xf32> -> vector<32x32xf32>
    %152 = arith.mulf %150, %151 : vector<32x32xf32>
    %153 = arith.addf %152, %89 : vector<32x32xf32>
    %cst_67 = arith.constant 0.000000e+00 : f32
    %154 = vector.broadcast %cst_67 : f32 to vector<32x32xf32>
    %155 = arith.maximumf %153, %154 : vector<32x32xf32>
    %156 = tpu.concatenate %89, %155 in 1 : vector<32x32xf32>, vector<32x32xf32> -> vector<32x64xf32>
    %157 = arith.truncf %156 : vector<32x64xf32> to vector<32x64xbf16>
    %158 = arith.truncf %9 : vector<64x32xf32> to vector<64x32xbf16>
    %cst_68 = arith.constant dense<0.000000e+00> : vector<32x32xf32>
    %159 = tpu.matmul %157, %158, %cst_68 {dimension_numbers = #tpu.dot_dimension_numbers<[1], [0], [0], [1], [0, 0, 1, 1], [], []>} : vector<32x64xbf16>, vector<64x32xbf16>, vector<32x32xf32> -> vector<32x32xf32>
    %c0_69 = arith.constant 0 : index
    %c0_70 = arith.constant 0 : index
    %160 = vector.load %arg5[%c0_69, %c0_70] : memref<32x48xf32, #tpu.memory_space<vmem>>, vector<32x48xf32>
    %161 = vector.extract_strided_slice %2 {offsets = [0, 0], sizes = [32, 32], strides = [1, 1]} : vector<32x128xf32> to vector<32x32xf32>
    %162 = arith.truncf %159 : vector<32x32xf32> to vector<32x32xbf16>
    %163 = arith.truncf %160 : vector<32x48xf32> to vector<32x48xbf16>
    %cst_71 = arith.constant dense<0.000000e+00> : vector<32x48xf32>
    %164 = tpu.matmul %162, %163, %cst_71 {dimension_numbers = #tpu.dot_dimension_numbers<[1], [0], [0], [1], [0, 0, 1, 1], [], []>} : vector<32x32xbf16>, vector<32x48xbf16>, vector<32x48xf32> -> vector<32x48xf32>
    %165 = vector.extract_strided_slice %164 {offsets = [0, 0], sizes = [32, 16], strides = [1, 1]} : vector<32x48xf32> to vector<32x16xf32>
    %166 = vector.extract_strided_slice %164 {offsets = [0, 16], sizes = [32, 32], strides = [1, 1]} : vector<32x48xf32> to vector<32x32xf32>
    %167 = arith.truncf %22 : vector<1x32xf32> to vector<1x32xbf16>
    %168 = arith.truncf %159 : vector<32x32xf32> to vector<32x32xbf16>
    %cst_72 = arith.constant dense<0.000000e+00> : vector<1x32xf32>
    %169 = tpu.matmul %167, %168, %cst_72 {dimension_numbers = #tpu.dot_dimension_numbers<[1], [1], [0], [0], [0, 0, 1, 0], [], []>} : vector<1x32xbf16>, vector<32x32xbf16>, vector<1x32xf32> -> vector<1x32xf32>
    %170 = vector.broadcast %169 : vector<1x32xf32> to vector<32x32xf32>
    %171 = arith.addf %166, %170 : vector<32x32xf32>
    %cst_73 = arith.constant 2.000000e-01 : f32
    %172 = vector.broadcast %cst_73 : f32 to vector<32x32xf32>
    %173 = arith.mulf %172, %171 : vector<32x32xf32>
    %174 = arith.maximumf %171, %173 : vector<32x32xf32>
    %175 = arith.addf %174, %161 : vector<32x32xf32>
    %cst_74 = arith.constant dense<0xFF800000> : vector<32xf32>
    %176 = vector.multi_reduction <maximumf>, %175, %cst_74 [1] : vector<32x32xf32> to vector<32xf32>
    %177 = vector.shape_cast %176 : vector<32xf32> to vector<32x1xf32>
    %178 = vector.broadcast %177 : vector<32x1xf32> to vector<32x32xf32>
    %179 = arith.subf %175, %178 : vector<32x32xf32>
    %180 = math.exp %179 : vector<32x32xf32>
    %cst_75 = arith.constant 0.000000e+00 : f32
    %181 = vector.broadcast %cst_75 : f32 to vector<128x64xf32>
    %c0_76 = arith.constant 0 : index
    %c0_77 = arith.constant 0 : index
    %182 = vector.load %arg10[%c0_76, %c0_77] : memref<128x64xf32, #tpu.memory_space<vmem>>, vector<128x64xf32>
    tpu.vector_store %arg10[%c0_76, %c0_77], %181 {strides = array<i32>} : memref<128x64xf32, #tpu.memory_space<vmem>>, vector<128x64xf32>,
    %c0_78 = arith.constant 0 : index
    %c0_79 = arith.constant 0 : index
    %183 = vector.load %arg10[%c0_78, %c0_79] : memref<128x64xf32, #tpu.memory_space<vmem>>, vector<32x16xf32>
    tpu.vector_store %arg10[%c0_78, %c0_79], %165 {strides = array<i32>} : memref<128x64xf32, #tpu.memory_space<vmem>>, vector<32x16xf32>,
    %cst_80 = arith.constant 1.000000e+00 : f32
    %184 = vector.broadcast %cst_80 : f32 to vector<32x16xf32>
    %c0_81 = arith.constant 0 : index
    %c16_82 = arith.constant 16 : index
    %185 = vector.load %arg10[%c0_81, %c16_82] : memref<128x64xf32, #tpu.memory_space<vmem>>, vector<32x16xf32>
    tpu.vector_store %arg10[%c0_81, %c16_82], %184 {strides = array<i32>} : memref<128x64xf32, #tpu.memory_space<vmem>>, vector<32x16xf32>,
    %c0_83 = arith.constant 0 : index
    %c0_84 = arith.constant 0 : index
    %186 = vector.load %arg10[%c0_83, %c0_84] : memref<128x64xf32, #tpu.memory_space<vmem>>, vector<32x32xf32>
    %187 = arith.truncf %180 : vector<32x32xf32> to vector<32x32xbf16>
    %188 = arith.truncf %186 : vector<32x32xf32> to vector<32x32xbf16>
    %cst_85 = arith.constant dense<0.000000e+00> : vector<32x32xf32>
    %189 = tpu.matmul %187, %188, %cst_85 {dimension_numbers = #tpu.dot_dimension_numbers<[1], [0], [0], [1], [0, 0, 1, 1], [], []>} : vector<32x32xbf16>, vector<32x32xbf16>, vector<32x32xf32> -> vector<32x32xf32>
    %190 = vector.extract_strided_slice %189 {offsets = [0, 16], sizes = [32, 16], strides = [1, 1]} : vector<32x32xf32> to vector<32x16xf32>
    %cst_86 = arith.constant 1.000000e-30 : f32
    %191 = vector.broadcast %cst_86 : f32 to vector<32x16xf32>
    %192 = arith.maximumf %190, %191 : vector<32x16xf32>
    %193 = vector.extract_strided_slice %189 {offsets = [0, 0], sizes = [32, 16], strides = [1, 1]} : vector<32x32xf32> to vector<32x16xf32>
    %194 = tpu.reciprocal %192 {approx = true} : vector<32x16xf32> -> vector<32x16xf32>
    %195 = arith.mulf %193, %194 : vector<32x16xf32>
    %196 = arith.mulf %195, %195 : vector<32x16xf32>
    %cst_87 = arith.constant dense<0.000000e+00> : vector<32xf32>
    %197 = vector.multi_reduction <add>, %196, %cst_87 [1] : vector<32x16xf32> to vector<32xf32>
    %198 = vector.shape_cast %197 : vector<32xf32> to vector<32x1xf32>
    %cst_88 = arith.constant 9.99999996E-13 : f32
    %199 = vector.broadcast %cst_88 : f32 to vector<32x1xf32>
    %200 = arith.maximumf %198, %199 : vector<32x1xf32>
    %201 = math.rsqrt %200 : vector<32x1xf32>
    %202 = arith.mulf %0, %0 : vector<32x16xf32>
    %cst_89 = arith.constant dense<0.000000e+00> : vector<32xf32>
    %203 = vector.multi_reduction <add>, %202, %cst_89 [1] : vector<32x16xf32> to vector<32xf32>
    %204 = vector.shape_cast %203 : vector<32xf32> to vector<32x1xf32>
    %cst_90 = arith.constant 9.99999996E-13 : f32
    %205 = vector.broadcast %cst_90 : f32 to vector<32x1xf32>
    %206 = arith.maximumf %204, %205 : vector<32x1xf32>
    %207 = math.rsqrt %206 : vector<32x1xf32>
    %208 = vector.broadcast %201 : vector<32x1xf32> to vector<32x16xf32>
    %209 = arith.mulf %195, %208 : vector<32x16xf32>
    %210 = vector.broadcast %207 : vector<32x1xf32> to vector<32x16xf32>
    %211 = arith.mulf %0, %210 : vector<32x16xf32>
    %212 = arith.mulf %209, %211 : vector<32x16xf32>
    %cst_91 = arith.constant dense<0.000000e+00> : vector<32xf32>
    %213 = vector.multi_reduction <add>, %212, %cst_91 [1] : vector<32x16xf32> to vector<32xf32>
    %214 = vector.shape_cast %213 : vector<32xf32> to vector<32x1xf32>
    %cst_92 = arith.constant 1.000000e+00 : f32
    %215 = vector.broadcast %cst_92 : f32 to vector<32x1xf32>
    %216 = arith.subf %215, %214 : vector<32x1xf32>
    %217 = arith.mulf %216, %216 : vector<32x1xf32>
    %218 = arith.mulf %217, %1 : vector<32x1xf32>
    %219 = vector.shape_cast %218 : vector<32x1xf32> to vector<1x32x1xf32>
    %cst_93 = arith.constant dense<0.000000e+00> : vector<1xf32>
    %220 = vector.multi_reduction <add>, %219, %cst_93 [1, 2] : vector<1x32x1xf32> to vector<1xf32>
    %221 = vector.shape_cast %220 : vector<1xf32> to vector<1x1x1xf32>
    %222 = vector.extract %221[0, 0, 0] : f32 from vector<1x1x1xf32>
    %cst_94 = arith.constant 6.250000e-02 : f32
    %223 = arith.mulf %222, %cst_94 : f32
    %c0_95 = arith.constant 0 : index
    %c0_96 = arith.constant 0 : index
    %224 = vector.load %arg8[%c0_95, %c0_96] : memref<128x32xf32, #tpu.memory_space<vmem>>, vector<128x32xf32>
    %225 = vector.extract_strided_slice %224 {offsets = [0, 0], sizes = [64, 32], strides = [1, 1]} : vector<128x32xf32> to vector<64x32xf32>
    %226 = arith.truncf %225 : vector<64x32xf32> to vector<64x32xbf16>
    %227 = arith.truncf %156 : vector<32x64xf32> to vector<32x64xbf16>
    %cst_97 = arith.constant dense<0.000000e+00> : vector<64x64xf32>
    %228 = tpu.matmul %226, %227, %cst_97 {dimension_numbers = #tpu.dot_dimension_numbers<[1], [0], [0], [1], [0, 0, 1, 1], [], []>} : vector<64x32xbf16>, vector<32x64xbf16>, vector<64x64xf32> -> vector<64x64xf32>
    %229 = vector.extract_strided_slice %224 {offsets = [64, 0], sizes = [64, 32], strides = [1, 1]} : vector<128x32xf32> to vector<64x32xf32>
    %230 = arith.truncf %229 : vector<64x32xf32> to vector<64x32xbf16>
    %231 = arith.truncf %156 : vector<32x64xf32> to vector<32x64xbf16>
    %cst_98 = arith.constant dense<0.000000e+00> : vector<64x64xf32>
    %232 = tpu.matmul %230, %231, %cst_98 {dimension_numbers = #tpu.dot_dimension_numbers<[1], [0], [0], [1], [0, 0, 1, 1], [], []>} : vector<64x32xbf16>, vector<32x64xbf16>, vector<64x64xf32> -> vector<64x64xf32>
    %233 = arith.truncf %228 : vector<64x64xf32> to vector<64x64xbf16>
    %234 = arith.truncf %10 : vector<64x32xf32> to vector<64x32xbf16>
    %cst_99 = arith.constant dense<0.000000e+00> : vector<64x32xf32>
    %235 = tpu.matmul %233, %234, %cst_99 {dimension_numbers = #tpu.dot_dimension_numbers<[1], [0], [0], [1], [0, 0, 1, 1], [], []>} : vector<64x64xbf16>, vector<64x32xbf16>, vector<64x32xf32> -> vector<64x32xf32>
    %236 = arith.truncf %232 : vector<64x64xf32> to vector<64x64xbf16>
    %237 = arith.truncf %11 : vector<64x32xf32> to vector<64x32xbf16>
    %cst_100 = arith.constant dense<0.000000e+00> : vector<64x32xf32>
    %238 = tpu.matmul %236, %237, %cst_100 {dimension_numbers = #tpu.dot_dimension_numbers<[1], [0], [0], [1], [0, 0, 1, 1], [], []>} : vector<64x64xbf16>, vector<64x32xbf16>, vector<64x32xf32> -> vector<64x32xf32>
    %239 = arith.addf %235, %238 : vector<64x32xf32>
    %240 = vector.broadcast %6 : vector<1x32xf32> to vector<64x32xf32>
    %241 = arith.addf %239, %240 : vector<64x32xf32>
    %cst_101 = arith.constant 2.000000e-01 : f32
    %242 = vector.broadcast %cst_101 : f32 to vector<64x32xf32>
    %243 = arith.mulf %242, %241 : vector<64x32xf32>
    %244 = arith.maximumf %241, %243 : vector<64x32xf32>
    %245 = vector.broadcast %7 : vector<1x32xf32> to vector<64x32xf32>
    %246 = arith.mulf %244, %245 : vector<64x32xf32>
    %cst_102 = arith.constant dense<0.000000e+00> : vector<64xf32>
    %247 = vector.multi_reduction <add>, %246, %cst_102 [1] : vector<64x32xf32> to vector<64xf32>
    %248 = vector.shape_cast %247 : vector<64xf32> to vector<64x1xf32>
    %249 = vector.broadcast %8 : vector<1x1xf32> to vector<64x1xf32>
    %250 = arith.addf %248, %249 : vector<64x1xf32>
    %251 = tpu.iota {dimensions = array<i32: 0>} : vector<64x1xi32>
    %c32_i32 = arith.constant 32 : i32
    %252 = vector.broadcast %c32_i32 : i32 to vector<64x1xi32>
    %253 = arith.cmpi slt, %251, %252 : vector<64x1xi32>
    %254 = arith.extui %253 : vector<64x1xi1> to vector<64x1xi32>
    %255 = arith.sitofp %254 : vector<64x1xi32> to vector<64x1xf32>
    %cst_103 = arith.constant 0.000000e+00 : f32
    %256 = vector.broadcast %cst_103 : f32 to vector<64x1xf32>
    %257 = arith.maximumf %250, %256 : vector<64x1xf32>
    %258 = math.absf %250 : vector<64x1xf32>
    %cst_104 = arith.constant 0.000000e+00 : f32
    %259 = vector.broadcast %cst_104 : f32 to vector<64x1xf32>
    %260 = arith.subf %259, %258 : vector<64x1xf32>
    %261 = math.exp %260 : vector<64x1xf32>
    %cst_105 = arith.constant 1.000000e+00 : f32
    %262 = vector.broadcast %cst_105 : f32 to vector<64x1xf32>
    %263 = arith.addf %262, %261 : vector<64x1xf32>
    %264 = math.log %263 : vector<64x1xf32>
    %265 = arith.addf %257, %264 : vector<64x1xf32>
    %266 = arith.mulf %255, %250 : vector<64x1xf32>
    %267 = arith.subf %265, %266 : vector<64x1xf32>
    %268 = vector.shape_cast %267 : vector<64x1xf32> to vector<1x64x1xf32>
    %cst_106 = arith.constant dense<0.000000e+00> : vector<1xf32>
    %269 = vector.multi_reduction <add>, %268, %cst_106 [1, 2] : vector<1x64x1xf32> to vector<1xf32>
    %270 = vector.shape_cast %269 : vector<1xf32> to vector<1x1x1xf32>
    %271 = vector.extract %270[0, 0, 0] : f32 from vector<1x1x1xf32>
    %cst_107 = arith.constant 1.562500e-02 : f32
    %272 = arith.mulf %271, %cst_107 : f32
    %273 = arith.addf %223, %272 : f32
    %c0_108 = arith.constant 0 : index
    %c0_109 = arith.constant 0 : index
    %274 = memref.load %arg9[%c0_108, %c0_109] : memref<1x1xf32, #tpu.memory_space<smem>>
    memref.store %273, %arg9[%c0_108, %c0_109] : memref<1x1xf32, #tpu.memory_space<smem>>
    return
  }
}

</mosaic_0001>

<bundles_post_ra>
// kernel: tile.9
= control target key start
LH: loop header
LB: loop body
LE: loop exit
PB: predicated region body
PF: predicated region fallthrough
CT: control target
= control target key end

     0   :  { %vm162_vm0 = vcmask 1047556   ;;  %s398_s10 = smov 96   ;;  %vm164_vm1 = vcmask 261120   ;;  %s400_s21 = smov 32   ;;  %vm201_vm2 = vcmask 1048320   ;;  %vm244_vm3 = vcmask 785920   ;;  %s579_s0 = inlined_call_operand.vmem [shape: f32[32,4,32], index: 0, kind: input, shape index: {}]   ;;  %s580_s1 = inlined_call_operand.vmem [shape: f32[32,128], index: 1, kind: output, shape index: {}]  }
   0x1   :  { %v376_v0 = vld [vmem:[%s579_s0 + $0x1c] sm:$0xf]  ;;  %v377_v1 = vld [vmem:[%s579_s0 + $0x18] sm:$0xf]  ;;  %v378_v2 = vld [vmem:[%s579_s0 + $0x14] sm:$0xf] }
   0x2   :  { %128 = vst [vmem:[#allocation0 + $0x38] sm:$0xf] %v376_v0  ;;  %133 = vst [vmem:[#allocation0 + $0x30] sm:$0xf] %v377_v1  ;;  %v379_v3 = vld [vmem:[%s579_s0 + $0x10] sm:$0xf] }
   0x3   :  { %138 = vst [vmem:[#allocation0 + $0x28] sm:$0xf] %v378_v2  ;;  %v380_v4 = vld [vmem:[%s579_s0 + $0xc] sm:$0xf]  ;;  %v381_v5 = vld [vmem:[%s579_s0 + $0x8] sm:$0xf] }
   0x4   :  { %143 = vst [vmem:[#allocation0 + $0x20] sm:$0xf] %v379_v3  ;;  %148 = vst [vmem:[#allocation0 + $0x18] sm:$0xf] %v380_v4  ;;  %v382_v6 = vld [vmem:[%s579_s0 + $0x4] sm:$0xf] }
   0x5   :  { %153 = vst [vmem:[#allocation0 + $0x10] sm:$0xf] %v381_v5  ;;  %v158_v7 = vld [vmem:[%s579_s0] sm:$0xf]  ;;  %157 = vst [vmem:[#allocation0 + $0x8] sm:$0xf] %v382_v6 }
   0x6   :  { %159 = vst [vmem:[#allocation0] sm:$0xf] %v158_v7  ;;  %v360_v8 = vld [vmem:[%s579_s0 + $0x5c] sm:$0xf]  ;;  %v361_v9 = vld [vmem:[%s579_s0 + $0x58] sm:$0xf] }
   0x7   :  { %v362_v10 = vld [vmem:[%s579_s0 + $0x54] sm:$0xf]  ;;  %48 = vst [vmem:[#allocation0 + $0xb8] sm:$0xf] %v360_v8  ;;  %53 = vst [vmem:[#allocation0 + $0xb0] sm:$0xf] %v361_v9 }
   0x8   :  { %58 = vst [vmem:[#allocation0 + $0xa8] sm:$0xf] %v362_v10  ;;  %v363_v11 = vld [vmem:[%s579_s0 + $0x50] sm:$0xf]  ;;  %v364_v12 = vld [vmem:[%s579_s0 + $0x4c] sm:$0xf] }
   0x9   :  { %v365_v13 = vld [vmem:[%s579_s0 + $0x48] sm:$0xf]  ;;  %63 = vst [vmem:[#allocation0 + $0xa0] sm:$0xf] %v363_v11  ;;  %68 = vst [vmem:[#allocation0 + $0x98] sm:$0xf] %v364_v12 }
   0xa   :  { %73 = vst [vmem:[#allocation0 + $0x90] sm:$0xf] %v365_v13  ;;  %v366_v14 = vld [vmem:[%s579_s0 + $0x44] sm:$0xf]  ;;  %v367_v15 = vld [vmem:[%s579_s0 + $0x40] sm:$0xf] }
   0xb   :  { %v368_v16 = vld [vmem:[%s579_s0 + $0x3c] sm:$0xf]  ;;  %78 = vst [vmem:[#allocation0 + $0x88] sm:$0xf] %v366_v14  ;;  %83 = vst [vmem:[#allocation0 + $0x80] sm:$0xf] %v367_v15 }
   0xc   :  { %88 = vst [vmem:[#allocation0 + $0x78] sm:$0xf] %v368_v16  ;;  %v369_v17 = vld [vmem:[%s579_s0 + $0x38] sm:$0xf]  ;;  %v370_v18 = vld [vmem:[%s579_s0 + $0x34] sm:$0xf] }
   0xd   :  { %v371_v19 = vld [vmem:[%s579_s0 + $0x30] sm:$0xf]  ;;  %93 = vst [vmem:[#allocation0 + $0x70] sm:$0xf] %v369_v17  ;;  %98 = vst [vmem:[#allocation0 + $0x68] sm:$0xf] %v370_v18 }
   0xe   :  { %103 = vst [vmem:[#allocation0 + $0x60] sm:$0xf] %v371_v19  ;;  %v372_v20 = vld [vmem:[%s579_s0 + $0x2c] sm:$0xf]  ;;  %v373_v21 = vld [vmem:[%s579_s0 + $0x28] sm:$0xf] }
   0xf   :  { %v374_v22 = vld [vmem:[%s579_s0 + $0x24] sm:$0xf]  ;;  %108 = vst [vmem:[#allocation0 + $0x58] sm:$0xf] %v372_v20  ;;  %113 = vst [vmem:[#allocation0 + $0x50] sm:$0xf] %v373_v21 }
  0x10   :  { %118 = vst [vmem:[#allocation0 + $0x48] sm:$0xf] %v374_v22  ;;  %v375_v23 = vld [vmem:[%s579_s0 + $0x20] sm:$0xf]  ;;  %v352_v24 = vld [vmem:[%s579_s0 + $0x7c] sm:$0xf] }
  0x11   :  { %v353_v25 = vld [vmem:[%s579_s0 + $0x78] sm:$0xf]  ;;  %123 = vst [vmem:[#allocation0 + $0x40] sm:$0xf] %v375_v23  ;;  %8 = vst [vmem:[#allocation0 + $0xf8] sm:$0xf] %v352_v24 }
  0x12   :  { %v196_v26 = vld [vmem:[#allocation0 + $0x3] ss:$8 sm:$0xf0]   ;;  %13 = vst [vmem:[#allocation0 + $0xf0] sm:$0xf] %v353_v25  ;;  %vm287_vm4 = vcmask 523520  }
  0x13   :  { %v354_v27 = vld [vmem:[%s579_s0 + $0x74] sm:$0xf]  ;;  %v194_v28 = vld [vmem:[#allocation0 + $0x3] ss:$8 sm:$0xf]  }
  0x14   :  { %18 = vst [vmem:[#allocation0 + $0xe8] sm:$0xf] %v354_v27  ;;  %v355_v29 = vld [vmem:[%s579_s0 + $0x70] sm:$0xf]  ;;  %v198_v30 = vsel %vm162_vm0, %v196_v26, %v194_v28  ;;  %v356_v31 = vld [vmem:[%s579_s0 + $0x6c] sm:$0xf] }
  0x15   :  { %23 = vst [vmem:[#allocation0 + $0xe0] sm:$0xf] %v355_v29  ;;  %v357_v32 = vld [vmem:[%s579_s0 + $0x68] sm:$0xf]  ;;  %v358_v33 = vld [vmem:[%s579_s0 + $0x64] sm:$0xf]  ;;  %199 = vrot.lane.b32.xlu0 %v198_v30, %s398_s10 }
  0x16   :  { %v217_v34 = vld [vmem:[#allocation0 + $0x83] ss:$8 sm:$0xf0]   ;;  %28 = vst [vmem:[#allocation0 + $0xd8] sm:$0xf] %v356_v31 }
  0x17   :  { %33 = vst [vmem:[#allocation0 + $0xd0] sm:$0xf] %v357_v32  ;;  %38 = vst [vmem:[#allocation0 + $0xc8] sm:$0xf] %v358_v33  ;;  %v359_v35 = vld [vmem:[%s579_s0 + $0x60] sm:$0xf] }
  0x18   :  { %v215_v36 = vld [vmem:[#allocation0 + $0x83] ss:$8 sm:$0xf]   ;;  %43 = vst [vmem:[#allocation0 + $0xc0] sm:$0xf] %v359_v35  ;;  %s399_s0 = smov 64  }
  0x19   :  { %v219_v37 = vsel %vm162_vm0, %v217_v34, %v215_v36  ;;  %v206_v38 = vld [vmem:[#allocation0 + $0x43] ss:$8 sm:$0xf0]   ;;  %v237_v39 = vld [vmem:[#allocation0 + $0x2] ss:$8 sm:$0xf]  }
  0x1a   :  { %220 = vrot.lane.b32.xlu1 %v219_v37, %s398_s10  ;;  %v204_v40 = vld [vmem:[#allocation0 + $0x43] ss:$8 sm:$0xf]   ;;  %v239_v41 = vld [vmem:[#allocation0 + $0x2] ss:$8 sm:$0xf0]  }
  0x1b   :  { %v208_v42 = vsel %vm162_vm0, %v206_v38, %v204_v40  ;;  %v249_v44 = vld [vmem:[#allocation0 + $0x42] ss:$8 sm:$0xf0]   ;;  %v241_v45 = vsel %vm162_vm0, %v239_v41, %v237_v39  ;;  %v280_v52 = vld [vmem:[#allocation0 + $0x1] ss:$8 sm:$0xf]  }
  0x1c   :  { %209 = vrot.lane.b32.xlu0 %v208_v42, %s398_s10  ;;  %v228_v43 = vld [vmem:[#allocation0 + $0xc3] ss:$8 sm:$0xf0]   ;;  %v247_v46 = vld [vmem:[#allocation0 + $0x42] ss:$8 sm:$0xf]  }
  0x1d   :  { %v258_v47 = vld [vmem:[#allocation0 + $0x82] ss:$8 sm:$0xf]   ;;  %v251_v53 = vsel %vm162_vm0, %v249_v44, %v247_v46  ;;  %v282_v55 = vld [vmem:[#allocation0 + $0x1] ss:$8 sm:$0xf0]  }
  0x1e   :  { %v260_v49 = vld [vmem:[#allocation0 + $0x82] ss:$8 sm:$0xf0]   ;;  %v160_v56 = vld [vmem:[#allocation0] ss:$8 sm:$0xf]   ;;  %v284_v4 = vsel %vm162_vm0, %v282_v55, %v280_v52 }
  0x1f   :  { %v226_v48 = vld [vmem:[#allocation0 + $0xc3] ss:$8 sm:$0xf]   ;;  %v271_v51 = vld [vmem:[#allocation0 + $0xc2] ss:$8 sm:$0xf0]   ;;  %v262_v54 = vsel %vm162_vm0, %v260_v49, %v258_v47 }
  0x20   :  { %v230_v50 = vsel %vm162_vm0, %v228_v43, %v226_v48  ;;  %242 = vrot.lane.b32.xlu0 %v241_v45, %s399_s0  ;;  %v269_v57 = vld [vmem:[#allocation0 + $0xc2] ss:$8 sm:$0xf]   ;;  %v161_v58 = vld [vmem:[#allocation0] ss:$8 sm:$0xf0]  }
  0x21   :  { %231 = vrot.lane.b32.xlu1 %v230_v50, %s398_s10  ;;  %v163_v59 = vsel %vm162_vm0, %v161_v58, %v160_v56  ;;  %v176_v60 = vld [vmem:[#allocation0 + $0x80] ss:$8 sm:$0xf]   ;;  %v290_v62 = vld [vmem:[#allocation0 + $0x41] ss:$8 sm:$0xf]   ;;  %v273_v3 = vsel %vm162_vm0, %v271_v51, %v269_v57 }
  0x22   :  { %v178_v61 = vld [vmem:[#allocation0 + $0x80] ss:$8 sm:$0xf0]   ;;  %v292_v63 = vld [vmem:[#allocation0 + $0x41] ss:$8 sm:$0xf0]  }
  0x23   :  { %165 = vst.msk [vmem:[%s580_s1] sm:$0xff] %vm164_vm1, %v163_v59   ;;  %v180_v0 = vsel %vm162_vm0, %v178_v61, %v176_v60  ;;  %v167_v1 = vld [vmem:[#allocation0 + $0x40] ss:$8 sm:$0xf]   ;;  %v294_v11 = vsel %vm162_vm0, %v292_v63, %v290_v62 }
  0x24   :  { %263 = vrot.lane.b32.xlu0 %v262_v54, %s399_s0  ;;  %v169_v2 = vld [vmem:[#allocation0 + $0x40] ss:$8 sm:$0xf0]   ;;  %384 = vst.msk [vmem:[%s580_s1 + $0x10] sm:$0xff] %vm164_vm1, %v180_v0  }
  0x25   :  { %252 = vrot.lane.b32.xlu1 %v251_v53, %s399_s0  ;;  %v171_v5 = vsel %vm162_vm0, %v169_v2, %v167_v1  ;;  %v185_v6 = vld [vmem:[#allocation0 + $0xc0] ss:$8 sm:$0xf]   ;;  %v301_v8 = vld [vmem:[#allocation0 + $0x81] ss:$8 sm:$0xf]  }
  0x26   :  { %v187_v7 = vld [vmem:[#allocation0 + $0xc0] ss:$8 sm:$0xf0]   ;;  %v303_v9 = vld [vmem:[#allocation0 + $0x81] ss:$8 sm:$0xf0]  }
  0x27   :  { %383 = vst.msk [vmem:[%s580_s1 + $0x8] sm:$0xff] %vm164_vm1, %v171_v5   ;;  %v189_v10 = vsel %vm162_vm0, %v187_v7, %v185_v6  ;;  %v305_v12 = vsel %vm162_vm0, %v303_v9, %v301_v8  ;;  %v312_v13 = vld [vmem:[#allocation0 + $0xc1] ss:$8 sm:$0xf]  }
  0x28   :  { %385 = vst.msk [vmem:[%s580_s1 + $0x18] sm:$0xff] %vm164_vm1, %v189_v10   ;;  %285 = vrot.lane.b32.xlu0 %v284_v4, %s400_s21  ;;  %v314_v14 = vld [vmem:[#allocation0 + $0xc1] ss:$8 sm:$0xf0]  }
  0x29   :  { %274 = vrot.lane.b32.xlu1 %v273_v3, %s399_s0  ;;  %v316_v15 = vsel %vm162_vm0, %v314_v14, %v312_v13 }
  0x2c   :  { %306 = vrot.lane.b32.xlu0 %v305_v12, %s400_s21 }
  0x2d   :  { %295 = vrot.lane.b32.xlu1 %v294_v11, %s400_s21 }
  0x31   :  { %317 = vrot.lane.b32.xlu1 %v316_v15, %s400_s21 }
  0x87   :  { %v200_v16 = vpop.permute.xlu0 %199  }
  0x88   :  { %202 = vst.msk [vmem:[%s580_s1] sm:$0xff] %vm201_vm2, %v200_v16  }
  0x8c   :  { %v221_v17 = vpop.permute.xlu1 %220  }
  0x8d   :  { %387 = vst.msk [vmem:[%s580_s1 + $0x10] sm:$0xff] %vm201_vm2, %v221_v17  }
  0x8e   :  { %v210_v18 = vpop.permute.xlu0 %209  }
  0x8f   :  { %386 = vst.msk [vmem:[%s580_s1 + $0x8] sm:$0xff] %vm201_vm2, %v210_v18  }
  0x92   :  { %v243_v20 = vpop.permute.xlu0 %242  }
  0x93   :  { %v232_v19 = vpop.permute.xlu1 %231   ;;  %245 = vst.msk [vmem:[%s580_s1] sm:$0xff] %vm244_vm3, %v243_v20  }
  0x94   :  { %388 = vst.msk [vmem:[%s580_s1 + $0x18] sm:$0xff] %vm201_vm2, %v232_v19  }
  0x96   :  { %v264_v22 = vpop.permute.xlu0 %263  }
  0x97   :  { %v253_v21 = vpop.permute.xlu1 %252   ;;  %390 = vst.msk [vmem:[%s580_s1 + $0x10] sm:$0xff] %vm244_vm3, %v264_v22  }
  0x98   :  { %389 = vst.msk [vmem:[%s580_s1 + $0x8] sm:$0xff] %vm244_vm3, %v253_v21  }
  0x9a   :  { %v286_v24 = vpop.permute.xlu0 %285  }
  0x9b   :  { %v275_v23 = vpop.permute.xlu1 %274   ;;  %288 = vst.msk [vmem:[%s580_s1] sm:$0xff] %vm287_vm4, %v286_v24  }
  0x9c   :  { %391 = vst.msk [vmem:[%s580_s1 + $0x18] sm:$0xff] %vm244_vm3, %v275_v23  }
  0x9e   :  { %v307_v26 = vpop.permute.xlu0 %306  }
  0x9f   :  { %v296_v25 = vpop.permute.xlu1 %295   ;;  %393 = vst.msk [vmem:[%s580_s1 + $0x10] sm:$0xff] %vm287_vm4, %v307_v26  }
  0xa0   :  { %392 = vst.msk [vmem:[%s580_s1 + $0x8] sm:$0xff] %vm287_vm4, %v296_v25  }
  0xa3   :  { %v318_v27 = vpop.permute.xlu1 %317  }
  0xa4   :  { %394 = vst.msk [vmem:[%s580_s1 + $0x18] sm:$0xff] %vm287_vm4, %v318_v27  }

// kernel: gmae_forward.3
= control target key start
LH: loop header
LB: loop body
LE: loop exit
PB: predicated region body
PF: predicated region fallthrough
CT: control target
= control target key end

     0   :  { %v2476_v2 = vmov 0   ;;  %s3420_s0 = inlined_call_operand.vmem [shape: f32[32,16], index: 0, kind: input, shape index: {}]   ;;  %s3421_s1 = inlined_call_operand.vmem [shape: f32[32,1], index: 1, kind: input, shape index: {}]   ;;  %s3422_s2 = inlined_call_operand.vmem [shape: f32[32,128], index: 2, kind: input, shape index: {}]   ;;  %s3423_s3 = inlined_call_operand.vmem [shape: f32[16,192], index: 3, kind: input, shape index: {}]   ;;  %s3424_s4 = inlined_call_operand.vmem [shape: f32[32,160], index: 4, kind: input, shape index: {}]   ;;  %s3425_s5 = inlined_call_operand.vmem [shape: f32[32,48], index: 5, kind: input, shape index: {}]   ;;  %s3426_s6 = inlined_call_operand.vmem [shape: f32[24,32], index: 6, kind: input, shape index: {}]   ;;  %s3427_s7 = inlined_call_operand.vmem [shape: f32[200,32], index: 7, kind: input, shape index: {}]   ;;  %s3428_s8 = inlined_call_operand.vmem [shape: f32[128,32], index: 8, kind: input, shape index: {}]   ;;  %s3429_s9 = inlined_call_operand.hbm [shape: f32[1,1], index: 9, kind: output, shape index: {}]  }
   0x1   :  { %v38_v0 = vld [vmem:[%s3421_s1] sm:$0xff]  ;;  %v39_v1 = vld [vmem:[%s3421_s1 + $0x8] sm:$0xff]  ;;  %2346 = vset.pattern.permute.xlu1 %v2476_v2  ;;  %2345 = vset.pattern.permute.xlu0 %v2476_v2 }
   0x2   :  { %v74_v3 = vsub.f32 1.0, %v38_v0  ;;  %104 = vperm.xlu1 %2346, %v38_v0   ;;  %181 = vmatprep.mubr.bf16.mxu0 %v2476_v2 }
   0x3   :  { %14 = vsyncpa [#allocation4], 0  ;;  %v75_v4 = vsub.f32 1.0, %v39_v1  ;;  %v41_v5 = vld [vmem:[%s3421_s1 + $0x18] sm:$0xff]  ;;  %v40_v6 = vld [vmem:[%s3421_s1 + $0x10] sm:$0xff]  ;;  %v2477_v15 = vmov 0.0   ;;  %v122_v16 = vlaneseq }
   0x4   :  { %80 = vperm.xlu0 %2345, %v74_v3   ;;  %v77_v7 = vsub.f32 1.0, %v41_v5  ;;  %v135_v8 = vld [vmem:[%s3423_s3 + $0x8] sm:$0xff]  ;;  %v137_v9 = vld [vmem:[%s3423_s3 + $0x18] sm:$0xff]  ;;  %v76_v10 = vsub.f32 1.0, %v40_v6  ;;  %v134_v12 = vld [vmem:[%s3423_s3] sm:$0xff]  ;;  %2175 = vmatprep.subr.bf16.mxu1 %v2477_v15  ;;  %vm2478_vm0 = vmmov 0  }
   0x5   :  { %v141_v11 = vpack.c.bf16 %v137_v9, %v135_v8  ;;  %v136_v13 = vld [vmem:[%s3423_s3 + $0x10] sm:$0xff]  ;;  %2179 = vmatprep.mubr.msk.bf16.mxu1 %vm2478_vm0, %v2477_v15  ;;  %v2566_v17 = vshrl.u32 %v122_v16, 7  ;;  %v49_v19 = vld [vmem:[%s3427_s7] sm:$0xff]  ;;  %v35_v24 = vld [vmem:[%s3420_s0 + $0x8] sm:$0xff]  ;;  %vm142_vm1 = vcmask 130048   ;;  %vm359_vm2 = vcmask 523264  }
   0x6   :  { %109 = vperm.xlu1 %2346, %v39_v1   ;;  %v140_v14 = vpack.c.bf16 %v136_v13, %v134_v12  ;;  %v34_v23 = vld [vmem:[%s3420_s0] sm:$0xff]  ;;  %v37_v36 = vld [vmem:[%s3420_s0 + $0x18] sm:$0xff]  ;;  %v36_v37 = vld [vmem:[%s3420_s0 + $0x10] sm:$0xff]  ;;  %401 = vst.msk [vmem:[#allocation2] sm:$0xff] %vm359_vm2, %v2477_v15  ;;  %vm417_vm3 = vcmask 64512   ;;  %vm427_vm4 = vcmask 130112  }
   0x7   :  { %149 = vmatprep.subr.bf16.mxu0 %v141_v11  ;;  %v2569_v18 = vsub.s32 0, %v2566_v17  ;;  %v46_v49 = vld [vmem:[%s3426_s6] sm:$0xff]  ;;  %402 = vst.msk [vmem:[#allocation2 + $0x8] sm:$0xff] %vm359_vm2, %v2477_v15  ;;  %403 = vst.msk [vmem:[#allocation2 + $0x10] sm:$0xff] %vm359_vm2, %v2477_v15  ;;  %vm437_vm5 = vcmask 195712   ;;  %vm447_vm6 = vcmask 261312  }
   0x8   :  { %85 = vperm.xlu0 %2345, %v75_v4   ;;  %150 = vmatpush1.bf16.msra.mxu0 %v140_v14  ;;  %v202_v50 = vpack.c.bf16 %v46_v49, %v46_v49  ;;  %404 = vst.msk [vmem:[#allocation2 + $0x18] sm:$0xff] %vm359_vm2, %v2477_v15  ;;  %405 = vst.msk [vmem:[#allocation2 + $0x20] sm:$0xff] %vm359_vm2, %v2477_v15  ;;  %v2661_v59 = vsub.s32 3, %v2566_v17  ;;  %v2664_v60 = vsub.s32 1, %v2566_v17  ;;  %v2670_v3 = vsub.s32 2, %v2566_v17  ;;  %s2479_s15 = smov 64  }
   0x9   :  { %v125_v20 = vrot.slane %v49_v19, %v2569_v18  ;;  %406 = vst.msk [vmem:[#allocation2 + $0x28] sm:$0xff] %vm359_vm2, %v2477_v15  ;;  %407 = vst.msk [vmem:[#allocation2 + $0x30] sm:$0xff] %vm359_vm2, %v2477_v15  ;;  %s2480_s16 = smov 32   ;;  %s2481_s17 = smov 96   ;;  %vm422_vm7 = vcmask 326912   ;;  %vm354_vm8 = vcmask 261120  }
   0xa   :  { %95 = vperm.xlu1 %2346, %v77_v7   ;;  %408 = vst.msk [vmem:[#allocation2 + $0x38] sm:$0xff] %vm359_vm2, %v2477_v15  ;;  %409 = vst.msk [vmem:[#allocation2 + $0x40] sm:$0xff] %vm359_vm2, %v2477_v15  ;;  %vm364_vm9 = vcmask 785408   ;;  %vm432_vm10 = vcmask 392512   ;;  %vm442_vm11 = vcmask 458112   ;;  %vm452_vm12 = vcmask 523712  }
   0xb   :  { %410 = vst.msk [vmem:[#allocation2 + $0x48] sm:$0xff] %vm359_vm2, %v2477_v15  ;;  %411 = vst.msk [vmem:[#allocation2 + $0x50] sm:$0xff] %vm359_vm2, %v2477_v15  ;;  %s2483_s3 = smov 16   ;;  %vm1285_vm13 = vcmask 261248   ;;  %vm1240_vm14 = vcmask 392320   ;;  %s2484_s13 = smov 112  }
   0xc   :  { %90 = vperm.xlu0 %2345, %v76_v10   ;;  %412 = vst.msk [vmem:[#allocation2 + $0x58] sm:$0xff] %vm359_vm2, %v2477_v15  ;;  %413 = vst.msk [vmem:[#allocation2 + $0x60] sm:$0xff] %vm359_vm2, %v2477_v15  ;;  %vm1471_vm15 = vcmask 7168   ;;  %s2464_s14 = scalar_lea.hbm %s3429_s9, 16 }
   0xd   :  { %414 = vst.msk [vmem:[#allocation2 + $0x68] sm:$0xff] %vm359_vm2, %v2477_v15  ;;  %415 = vst.msk [vmem:[#allocation2 + $0x70] sm:$0xff] %vm359_vm2, %v2477_v15  ;;  %p2465_p0 = scmp.ne.s32.totalorder %s3429_s9, %s2464_s14  ;;  %p2468_p1 = scmp.lt.u32.totalorder %s2464_s14, %s3429_s9 }
   0xe   :  { %119 = vperm.xlu1 %2346, %v41_v5   ;;  %416 = vst.msk [vmem:[#allocation2 + $0x78] sm:$0xff] %vm359_vm2, %v2477_v15 }
   0xf   :  { %p2470_p2 = pnand %p2468_p1, %p2465_p0 }
  0x10   :  { %114 = vperm.xlu0 %2345, %v40_v6  }
  0x81   :  { %v105_v21 = vpop.permute.xlu1 %104 }
  0x82   :  { %v126_v25 = vmul.f32 %v125_v20, %v105_v21 }
  0x83   :  { %v81_v22 = vpop.permute.xlu0 %80 }
  0x84   :  { %v98_v26 = vmul.f32 %v81_v22, %v34_v23 }
  0x85   :  { %v110_v27 = vpop.permute.xlu1 %109 }
  0x86   :  { %v127_v28 = vmul.f32 %v125_v20, %v110_v27  ;;  %v130_v31 = vadd.f32 %v126_v25, %v98_v26 }
  0x87   :  { %v86_v29 = vpop.permute.xlu0 %85 }
  0x88   :  { %v99_v30 = vmul.f32 %v86_v29, %v35_v24 }
  0x89   :  { %v96_v33 = vpop.permute.xlu1 %95 }
  0x8a   :  { %v131_v32 = vadd.f32 %v127_v28, %v99_v30  ;;  %v101_v40 = vmul.f32 %v96_v33, %v37_v36  ;;  %v2482_v28 = vmov 1.0  }
  0x8b   :  { %v91_v34 = vpop.permute.xlu0 %90 }
  0x8c   :  { %v138_v35 = vpack.c.bf16 %v131_v32, %v130_v31  ;;  %v100_v43 = vmul.f32 %v91_v34, %v36_v37 }
  0x8d   :  { %v120_v38 = vpop.permute.xlu1 %119 }
  0x8e   :  { %2075 = vmatmul.mubr.msk.bf16.vlgmr.msra.gmra.mrb[0].mxu0 %vm142_vm1, %v138_v35  ;;  %v144_v39 = vsel %vm142_vm1, %v138_v35, 0  ;;  %v129_v41 = vmul.f32 %v125_v20, %v120_v38 }
  0x8f   :  { %v115_v42 = vpop.permute.xlu0 %114  ;;  %2176 = vmatpush3.bf16.xpose.msra.mxu1 %v144_v39  ;;  %191 = vmatprep.mubr.bf16.mxu0 %v2476_v2 }
  0x90   :  { %v128_v44 = vmul.f32 %v125_v20, %v115_v42  ;;  %2177 = vmatprep.subr.bf16.mxu1 %v2477_v15  ;;  %v133_v45 = vadd.f32 %v129_v41, %v101_v40 }
  0x92   :  { %v132_v46 = vadd.f32 %v128_v44, %v100_v43 }
  0x94   :  { %v139_v47 = vpack.c.bf16 %v133_v45, %v132_v46 }
  0x96   :  { %2076 = vmatmul.mubr.msk.bf16.gmra.mrb[4].mxu0 %vm142_vm1, %v139_v47  ;;  %v147_v48 = vsel %vm142_vm1, %v139_v47, 0 }
  0x97   :  { %2178 = vmatpush3.bf16.xpose.msra.mxu1 %v147_v48 }
  0x9e   :  { %2180 = vmatmul.mubr.msk.bf16.vlgmr.msra.gmra.mrb[0].mxu1 %vm142_vm1, %v202_v50 }
  0x9f   :  { %636 = vmatprep.mubr.bf16.mxu1 %v2476_v2 }
 0x161   :  { %v2630_v51 = vpop.f32.mrb[0].mxu0 }
 0x162   :  { %v2632_v52 = vpop.f32.mrb[1].mxu0  ;;  %418 = vst.msk [vmem:[#allocation2] sm:$0xff] %vm417_vm3, %v2630_v51 }
 0x163   :  { %428 = vst.msk [vmem:[#allocation2 + $0x20] sm:$0xff] %vm427_vm4, %v2630_v51  ;;  %v187_v53 = vpop.f32.mrb[2].mxu0 }
 0x164   :  { %438 = vst.msk [vmem:[#allocation2 + $0x40] sm:$0xff] %vm437_vm5, %v2630_v51  ;;  %v2642_v54 = vpop.f32.mrb[3].mxu0  ;;  %439 = vst.msk [vmem:[#allocation2 + $0x48] sm:$0xff] %vm437_vm5, %v187_v53 }
 0x165   :  { %448 = vst.msk [vmem:[#allocation2 + $0x60] sm:$0xff] %vm447_vm6, %v2630_v51  ;;  %449 = vst.msk [vmem:[#allocation2 + $0x68] sm:$0xff] %vm447_vm6, %v187_v53 }
 0x166   :  { %419 = vst.msk [vmem:[#allocation2 + $0x8] sm:$0xff] %vm417_vm3, %v187_v53 }
 0x167   :  { %429 = vst.msk [vmem:[#allocation2 + $0x28] sm:$0xff] %vm427_vm4, %v187_v53 }
 0x168   :  { %423 = vst.msk [vmem:[#allocation2] sm:$0xff] %vm422_vm7, %v2482_v28  ;;  %424 = vst.msk [vmem:[#allocation2 + $0x8] sm:$0xff] %vm422_vm7, %v2482_v28 }
 0x169   :  { %v193_v55 = vpop.f32.mrb[4].mxu0  ;;  %433 = vst.msk [vmem:[#allocation2 + $0x20] sm:$0xff] %vm432_vm10, %v2482_v28  ;;  %434 = vst.msk [vmem:[#allocation2 + $0x28] sm:$0xff] %vm432_vm10, %v2482_v28 }
 0x16a   :  { %v2648_v56 = vpop.f32.mrb[5].mxu0  ;;  %420 = vst.msk [vmem:[#allocation2 + $0x10] sm:$0xff] %vm417_vm3, %v193_v55 }
 0x16b   :  { %430 = vst.msk [vmem:[#allocation2 + $0x30] sm:$0xff] %vm427_vm4, %v193_v55  ;;  %v197_v57 = vpop.f32.mrb[6].mxu0 }
 0x16c   :  { %440 = vst.msk [vmem:[#allocation2 + $0x50] sm:$0xff] %vm437_vm5, %v193_v55  ;;  %v2654_v58 = vpop.f32.mrb[7].mxu0  ;;  %441 = vst.msk [vmem:[#allocation2 + $0x58] sm:$0xff] %vm437_vm5, %v197_v57 }
 0x16d   :  { %450 = vst.msk [vmem:[#allocation2 + $0x70] sm:$0xff] %vm447_vm6, %v193_v55  ;;  %451 = vst.msk [vmem:[#allocation2 + $0x78] sm:$0xff] %vm447_vm6, %v197_v57 }
 0x16e   :  { %421 = vst.msk [vmem:[#allocation2 + $0x18] sm:$0xff] %vm417_vm3, %v197_v57 }
 0x16f   :  { %431 = vst.msk [vmem:[#allocation2 + $0x38] sm:$0xff] %vm427_vm4, %v197_v57  ;;  %v457_v29 = vld [vmem:[#allocation2] sm:$0xff]  ;;  %v458_v30 = vld [vmem:[#allocation2 + $0x8] sm:$0xff] }
 0x170   :  { %425 = vst.msk [vmem:[#allocation2 + $0x10] sm:$0xff] %vm422_vm7, %v2482_v28  ;;  %426 = vst.msk [vmem:[#allocation2 + $0x18] sm:$0xff] %vm422_vm7, %v2482_v28  ;;  %v475_v32 = vpack.c.bf16 %v458_v30, %v457_v29 }
 0x171   :  { %v240_v61 = vpop.f32.mrb[0].mxu1  ;;  %853 = vst.msk [vmem:[#allocation2] sm:$0xff] %vm359_vm2, %v2477_v15  ;;  %854 = vst.msk [vmem:[#allocation2 + $0x8] sm:$0xff] %vm359_vm2, %v2477_v15 }
 0x172   :  { %v285_v62 = vrot.slane %v240_v61, %v2661_v59  ;;  %v2181_v63 = vpop.f32.mrb[1].mxu1  ;;  %v261_v0 = vrot.slane %v240_v61, %v2664_v60  ;;  %v249_v1 = vrot.slane %v240_v61, %v2569_v18  ;;  %v273_v10 = vrot.slane %v240_v61, %v2670_v3  ;;  %2183 = vmatprep.subr.bf16.mxu0 %v475_v32 }
 0x173   :  { %v243_v4 = vpop.f32.mrb[2].mxu1  ;;  %2184 = vmatpush3.bf16.msra.mxu0 %v475_v32  ;;  %v2724_v63 = vld [vmem:[%s3422_s2] sm:$0xff]  ;;  %435 = vst.msk [vmem:[#allocation2 + $0x30] sm:$0xff] %vm432_vm10, %v2482_v28  ;;  %436 = vst.msk [vmem:[#allocation2 + $0x38] sm:$0xff] %vm432_vm10, %v2482_v28 }
 0x174   :  { %263 = vrot.lane.b32.xlu1 %v261_v0, %s2479_s15  ;;  %251 = vrot.lane.b32.xlu0 %v249_v1, %s2480_s16  ;;  %v2182_v5 = vpop.f32.mrb[3].mxu1  ;;  %v286_v6 = vadd.f32 %v285_v62, %v2632_v52  ;;  %v287_v7 = vadd.f32 %v285_v62, %v2642_v54  ;;  %v289_v8 = vadd.f32 %v285_v62, %v2654_v58  ;;  %v2729_v0 = vld [vmem:[%s3422_s2 + $0x8] sm:$0xff] }
 0x175   :  { %v288_v9 = vadd.f32 %v285_v62, %v2648_v56  ;;  %443 = vst.msk [vmem:[#allocation2 + $0x40] sm:$0xff] %vm442_vm11, %v2482_v28  ;;  %444 = vst.msk [vmem:[#allocation2 + $0x48] sm:$0xff] %vm442_vm11, %v2482_v28 }
 0x176   :  { %445 = vst.msk [vmem:[#allocation2 + $0x50] sm:$0xff] %vm442_vm11, %v2482_v28  ;;  %446 = vst.msk [vmem:[#allocation2 + $0x58] sm:$0xff] %vm442_vm11, %v2482_v28 }
 0x177   :  { %v459_v31 = vld [vmem:[#allocation2 + $0x10] sm:$0xff]  ;;  %v460_v33 = vld [vmem:[#allocation2 + $0x18] sm:$0xff]  ;;  %453 = vst.msk [vmem:[#allocation2 + $0x60] sm:$0xff] %vm452_vm12, %v2482_v28  ;;  %454 = vst.msk [vmem:[#allocation2 + $0x68] sm:$0xff] %vm452_vm12, %v2482_v28 }
 0x178   :  { %342 = vrot.lane.b32.xlu1 %v286_v6, %s2481_s17  ;;  %275 = vrot.lane.b32.xlu0 %v273_v10, %s2481_s17  ;;  %855 = vst.msk [vmem:[#allocation2 + $0x10] sm:$0xff] %vm359_vm2, %v2477_v15  ;;  %v476_v34 = vpack.c.bf16 %v460_v33, %v459_v31  ;;  %856 = vst.msk [vmem:[#allocation2 + $0x18] sm:$0xff] %vm359_vm2, %v2477_v15 }
 0x179   :  { %455 = vst.msk [vmem:[#allocation2 + $0x70] sm:$0xff] %vm452_vm12, %v2482_v28  ;;  %456 = vst.msk [vmem:[#allocation2 + $0x78] sm:$0xff] %vm452_vm12, %v2482_v28 }
 0x17a   :  { %2185 = vmatprep.subr.bf16.mxu0 %v476_v34  ;;  %v463_v29 = vld [vmem:[#allocation2 + $0x30] sm:$0xff]  ;;  %v464_v30 = vld [vmem:[#allocation2 + $0x38] sm:$0xff] }
 0x17b   :  { %2186 = vmatpush3.bf16.msra.mxu0 %v476_v34  ;;  %v478_v31 = vpack.c.bf16 %v464_v30, %v463_v29  ;;  %859 = vst.msk [vmem:[#allocation2 + $0x30] sm:$0xff] %vm359_vm2, %v2477_v15  ;;  %860 = vst.msk [vmem:[#allocation2 + $0x38] sm:$0xff] %vm359_vm2, %v2477_v15 }
 0x17c   :  { %344 = vrot.lane.b32.xlu0 %v287_v7, %s2481_s17  ;;  %v465_v32 = vld [vmem:[#allocation2 + $0x40] sm:$0xff]  ;;  %v466_v33 = vld [vmem:[#allocation2 + $0x48] sm:$0xff] }
 0x17d   :  { %v479_v34 = vpack.c.bf16 %v466_v33, %v465_v32  ;;  %861 = vst.msk [vmem:[#allocation2 + $0x40] sm:$0xff] %vm359_vm2, %v2477_v15  ;;  %862 = vst.msk [vmem:[#allocation2 + $0x48] sm:$0xff] %vm359_vm2, %v2477_v15 }
 0x1e6   :  { %v252_v11 = vpop.permute.xlu0 %251  ;;  %v264_v14 = vpop.permute.xlu1 %263 }
 0x1e7   :  { %v255_v12 = vadd.f32 %v252_v11, %v187_v53  ;;  %v254_v13 = vadd.f32 %v252_v11, %v2630_v51  ;;  %v267_v16 = vadd.f32 %v264_v14, %v187_v53  ;;  %v266_v17 = vadd.f32 %v264_v14, %v2630_v51 }
 0x1e8   :  { %v257_v19 = vadd.f32 %v252_v11, %v197_v57  ;;  %v256_v20 = vadd.f32 %v252_v11, %v193_v55  ;;  %v269_v21 = vadd.f32 %v264_v14, %v197_v57  ;;  %v268_v22 = vadd.f32 %v264_v14, %v193_v55 }
 0x1e9   :  { %296 = vrot.lane.b32.xlu0 %v255_v12, %s2481_s17  ;;  %294 = vrot.lane.b32.xlu1 %v254_v13, %s2481_s17 }
 0x1ea   :  { %v276_v23 = vpop.permute.xlu0 %275  ;;  %v343_v35 = vpop.permute.xlu1 %342 }
 0x1eb   :  { %v279_v24 = vadd.f32 %v276_v23, %v187_v53  ;;  %v278_v25 = vadd.f32 %v276_v23, %v2630_v51  ;;  %v281_v26 = vadd.f32 %v276_v23, %v197_v57  ;;  %v280_v27 = vadd.f32 %v276_v23, %v193_v55 }
 0x1ed   :  { %312 = vrot.lane.b32.xlu0 %v267_v16, %s2481_s17  ;;  %310 = vrot.lane.b32.xlu1 %v266_v17, %s2481_s17 }
 0x1ee   :  { %v345_v36 = vpop.permute.xlu0 %344 }
 0x1f1   :  { %300 = vrot.lane.b32.xlu0 %v257_v19, %s2481_s17  ;;  %298 = vrot.lane.b32.xlu1 %v256_v20, %s2481_s17  ;;  %v2748_v19 = vld [vmem:[%s3422_s2 + $0x10] sm:$0xff]  ;;  %v2753_v20 = vld [vmem:[%s3422_s2 + $0x18] sm:$0xff] }
 0x1f5   :  { %316 = vrot.lane.b32.xlu0 %v269_v21, %s2481_s17  ;;  %314 = vrot.lane.b32.xlu1 %v268_v22, %s2481_s17 }
 0x1f9   :  { %328 = vrot.lane.b32.xlu0 %v279_v24, %s2481_s17  ;;  %326 = vrot.lane.b32.xlu1 %v278_v25, %s2481_s17  ;;  %v461_v25 = vld [vmem:[#allocation2 + $0x20] sm:$0xff] }
 0x1fa   :  { %857 = vst.msk [vmem:[#allocation2 + $0x20] sm:$0xff] %vm359_vm2, %v2477_v15 }
 0x1fd   :  { %332 = vrot.lane.b32.xlu0 %v281_v26, %s2481_s17  ;;  %330 = vrot.lane.b32.xlu1 %v280_v27, %s2481_s17  ;;  %v462_v26 = vld [vmem:[#allocation2 + $0x28] sm:$0xff] }
 0x1fe   :  { %v477_v27 = vpack.c.bf16 %v462_v26, %v461_v25  ;;  %858 = vst.msk [vmem:[#allocation2 + $0x28] sm:$0xff] %vm359_vm2, %v2477_v15  ;;  %v588_v26 = vld [vmem:[%s3424_s4 + $0x20] sm:$0xff] }
 0x200   :  { %2187 = vmatprep.subr.bf16.mxu0 %v477_v27 }
 0x201   :  { %348 = vrot.lane.b32.xlu0 %v289_v8, %s2481_s17  ;;  %346 = vrot.lane.b32.xlu1 %v288_v9, %s2481_s17 }
 0x202   :  { %2188 = vmatpush3.bf16.msra.mxu0 %v477_v27  ;;  %v590_v27 = vld [vmem:[%s3424_s4 + $0x30] sm:$0xff] }
 0x203   :  { %2189 = vmatprep.subr.bf16.mxu0 %v478_v31  ;;  %v596_v30 = vpack.c.bf16 %v590_v27, %v588_v26 }
 0x206   :  { %2190 = vmatpush3.bf16.msra.mxu0 %v478_v31 }
 0x207   :  { %2191 = vmatprep.subr.bf16.mxu0 %v479_v34 }
 0x20a   :  { %2192 = vmatpush3.bf16.msra.mxu0 %v479_v34 }
 0x25b   :  { %v295_v37 = vpop.permute.xlu1 %294  ;;  %v297_v38 = vpop.permute.xlu0 %296 }
 0x25f   :  { %v311_v39 = vpop.permute.xlu1 %310  ;;  %v313_v40 = vpop.permute.xlu0 %312 }
 0x260   :  { %v355_v45 = vsel %vm354_vm8, %v295_v37, %v311_v39  ;;  %v356_v46 = vsel %vm354_vm8, %v297_v38, %v313_v40  ;;  %v469_v38 = vld [vmem:[#allocation2 + $0x60] sm:$0xff]  ;;  %v470_v39 = vld [vmem:[#allocation2 + $0x68] sm:$0xff] }
 0x261   :  { %v481_v40 = vpack.c.bf16 %v470_v39, %v469_v38  ;;  %865 = vst.msk [vmem:[#allocation2 + $0x60] sm:$0xff] %vm359_vm2, %v2477_v15  ;;  %866 = vst.msk [vmem:[#allocation2 + $0x68] sm:$0xff] %vm359_vm2, %v2477_v15 }
 0x263   :  { %v299_v41 = vpop.permute.xlu1 %298  ;;  %v301_v42 = vpop.permute.xlu0 %300 }
 0x267   :  { %v315_v43 = vpop.permute.xlu1 %314  ;;  %v317_v44 = vpop.permute.xlu0 %316 }
 0x268   :  { %v357_v5 = vsel %vm354_vm8, %v299_v41, %v315_v43  ;;  %v358_v6 = vsel %vm354_vm8, %v301_v42, %v317_v44  ;;  %v471_v41 = vld [vmem:[#allocation2 + $0x70] sm:$0xff]  ;;  %v472_v42 = vld [vmem:[#allocation2 + $0x78] sm:$0xff] }
 0x269   :  { %v482_v43 = vpack.c.bf16 %v472_v42, %v471_v41  ;;  %867 = vst.msk [vmem:[#allocation2 + $0x70] sm:$0xff] %vm359_vm2, %v2477_v15  ;;  %868 = vst.msk [vmem:[#allocation2 + $0x78] sm:$0xff] %vm359_vm2, %v2477_v15 }
 0x26b   :  { %v327_v47 = vpop.permute.xlu1 %326  ;;  %v329_v48 = vpop.permute.xlu0 %328 }
 0x26c   :  { %v360_v49 = vsel %vm359_vm2, %v355_v45, %v327_v47  ;;  %v361_v50 = vsel %vm359_vm2, %v356_v46, %v329_v48 }
 0x26d   :  { %v365_v51 = vsel %vm364_vm9, %v360_v49, %v343_v35  ;;  %v366_v53 = vsel %vm364_vm9, %v361_v50, %v345_v36  ;;  %v467_v35 = vld [vmem:[#allocation2 + $0x50] sm:$0xff]  ;;  %v468_v36 = vld [vmem:[#allocation2 + $0x58] sm:$0xff] }
 0x26e   :  { %v369_v55 = vmul.f32 0.2, %v365_v51  ;;  %v370_v57 = vmul.f32 0.2, %v366_v53  ;;  %v480_v37 = vpack.c.bf16 %v468_v36, %v467_v35  ;;  %863 = vst.msk [vmem:[#allocation2 + $0x50] sm:$0xff] %vm359_vm2, %v2477_v15  ;;  %864 = vst.msk [vmem:[#allocation2 + $0x58] sm:$0xff] %vm359_vm2, %v2477_v15 }
 0x26f   :  { %v331_v61 = vpop.permute.xlu1 %330  ;;  %v333_v62 = vpop.permute.xlu0 %332 }
 0x270   :  { %v373_v1 = vmax.f32 %v365_v51, %v369_v55  ;;  %v374_v4 = vmax.f32 %v366_v53, %v370_v57  ;;  %v362_v9 = vsel %vm359_vm2, %v357_v5, %v331_v61  ;;  %v363_v10 = vsel %vm359_vm2, %v358_v6, %v333_v62  ;;  %2193 = vmatprep.subr.bf16.mxu0 %v480_v37 }
 0x271   :  { %2194 = vmatpush3.bf16.msra.mxu0 %v480_v37 }
 0x272   :  { %v2734_v7 = vadd.f32 %v373_v1, %v2724_v63  ;;  %v2737_v8 = vadd.f32 %v374_v4, %v2729_v0  ;;  %2195 = vmatprep.subr.bf16.mxu0 %v481_v40 }
 0x273   :  { %v347_v11 = vpop.permute.xlu1 %346  ;;  %v349_v12 = vpop.permute.xlu0 %348 }
 0x274   :  { %v367_v13 = vsel %vm364_vm9, %v362_v9, %v347_v11  ;;  %v368_v14 = vsel %vm364_vm9, %v363_v10, %v349_v12  ;;  %381 = vmax.xlane.f32.xlu1 %v2734_v7  ;;  %383 = vmax.xlane.f32.xlu0 %v2737_v8  ;;  %v587_v9 = vld [vmem:[%s3424_s4 + $0x18] sm:$0xff]  ;;  %v584_v11 = vld [vmem:[%s3424_s4] sm:$0xff]  ;;  %v586_v12 = vld [vmem:[%s3424_s4 + $0x10] sm:$0xff] }
 0x275   :  { %v371_v16 = vmul.f32 0.2, %v367_v13  ;;  %v372_v17 = vmul.f32 0.2, %v368_v14  ;;  %2196 = vmatpush3.bf16.msra.mxu0 %v481_v40 }
 0x276   :  { %2197 = vmatprep.subr.bf16.mxu0 %v482_v43 }
 0x277   :  { %v375_v21 = vmax.f32 %v367_v13, %v371_v16  ;;  %v376_v22 = vmax.f32 %v368_v14, %v372_v17  ;;  %v594_v14 = vpack.c.bf16 %v586_v12, %v584_v11 }
 0x279   :  { %v2756_v23 = vadd.f32 %v375_v21, %v2748_v19  ;;  %v2759_v24 = vadd.f32 %v376_v22, %v2753_v20  ;;  %2198 = vmatpush3.bf16.msra.mxu0 %v482_v43  ;;  %v589_v22 = vld [vmem:[%s3424_s4 + $0x28] sm:$0xff] }
 0x27b   :  { %385 = vmax.xlane.f32.xlu0 %v2756_v23  ;;  %387 = vmax.xlane.f32.xlu1 %v2759_v24 }
 0x301   :  { %v382_v44 = vpop.xlane.xlu1 %381  ;;  %v384_v45 = vpop.xlane.xlu0 %383 }
 0x302   :  { %v389_v46 = vsub.f32 %v2734_v7, %v382_v44  ;;  %v390_v47 = vsub.f32 %v2737_v8, %v384_v45  ;;  %v585_v8 = vld [vmem:[%s3424_s4 + $0x8] sm:$0xff] }
 0x303   :  { %v595_v10 = vpack.c.bf16 %v587_v9, %v585_v8 }
 0x304   :  { %v393_v48 = vmul.f32 1.442695, %v389_v46  ;;  %v395_v49 = vmul.f32 1.442695, %v390_v47 }
 0x305   :  { %604 = vmatprep.subr.bf16.mxu1 %v595_v10 }
 0x306   :  { %2357 = vpow2.f32 %v393_v48  ;;  %605 = vmatpush1.bf16.msra.mxu1 %v594_v14 }
 0x307   :  { %2359 = vpow2.f32 %v395_v49 }
 0x308   :  { %v388_v50 = vpop.xlane.xlu1 %387  ;;  %v386_v51 = vpop.xlane.xlu0 %385 }
 0x309   :  { %v392_v53 = vsub.f32 %v2759_v24, %v388_v50  ;;  %v391_v55 = vsub.f32 %v2756_v23, %v386_v51  ;;  %v591_v23 = vld [vmem:[%s3424_s4 + $0x38] sm:$0xff] }
 0x30a   :  { %v597_v25 = vpack.c.bf16 %v591_v23, %v589_v22 }
 0x30b   :  { %v399_v57 = vmul.f32 1.442695, %v392_v53  ;;  %v397_v61 = vmul.f32 1.442695, %v391_v55 }
 0x30c   :  { %606 = vmatprep.subr.bf16.mxu1 %v597_v25 }
 0x30d   :  { %2361 = vpow2.f32 %v399_v57  ;;  %607 = vmatpush1.bf16.msra.mxu1 %v596_v30 }
 0x30e   :  { %2363 = vpow2.f32 %v397_v61  ;;  %2203 = vmatprep.subr.bf16.mxu1 %v2477_v15 }
 0x310   :  { %v2358_v62 = vpop.eup %2357 }
 0x311   :  { %v2360_v1 = vpop.eup %2359 }
 0x312   :  { %v473_v4 = vpack.c.bf16 %v2360_v1, %v2358_v62 }
 0x314   :  { %2199 = vmatprep.mubr.bf16.mxu0 %v473_v4 }
 0x317   :  { %v2362_v5 = vpop.eup %2361 }
 0x318   :  { %v2364_v6 = vpop.eup %2363 }
 0x319   :  { %v474_v7 = vpack.c.bf16 %v2362_v5, %v2364_v6 }
 0x31b   :  { %2200 = vmatmul.mubr.bf16.vlgmr.msra.gmra.mrb[8].mxu0 %v474_v7 }
 0x3ee   :  { %v2201_v13 = vpop.f32.mrb[8].mxu0 }
 0x3ef   :  { %v517_v16 = vpop.f32.mrb[9].mxu0  ;;  %v534_v32 = vmax.f32 %v2201_v13, 1e-30 }
 0x3f0   :  { %v532_v17 = vmax.f32 %v517_v16, 1e-30  ;;  %v2202_v21 = vpop.f32.mrb[10].mxu0 }
 0x3f1   :  { %v520_v24 = vpop.f32.mrb[11].mxu0  ;;  %v535_v31 = vmax.f32 %v2202_v21, 1e-30 }
 0x3f2   :  { %2365 = vrcp.f32 %v532_v17  ;;  %v533_v29 = vmax.f32 %v520_v24, 1e-30 }
 0x3f4   :  { %2367 = vrcp.f32 %v533_v29 }
 0x3f5   :  { %2369 = vrcp.f32 %v535_v31 }
 0x3f6   :  { %2371 = vrcp.f32 %v534_v32 }
 0x3fc   :  { %v2366_v33 = vpop.eup %2365 }
 0x3fd   :  { %544 = vrot.lane.b32.xlu0 %v2366_v33, %s2481_s17 }
 0x3fe   :  { %v2368_v34 = vpop.eup %2367 }
 0x3ff   :  { %546 = vrot.lane.b32.xlu1 %v2368_v34, %s2481_s17  ;;  %v2370_v35 = vpop.eup %2369 }
 0x400   :  { %v2372_v36 = vpop.eup %2371 }
 0x401   :  { %566 = vrot.lane.b32.xlu0 %v2642_v54, %s2481_s17 }
 0x403   :  { %564 = vrot.lane.b32.xlu1 %v2632_v52, %s2481_s17 }
 0x405   :  { %550 = vrot.lane.b32.xlu0 %v2370_v35, %s2481_s17 }
 0x407   :  { %548 = vrot.lane.b32.xlu1 %v2372_v36, %s2481_s17 }
 0x409   :  { %570 = vrot.lane.b32.xlu0 %v2654_v58, %s2481_s17 }
 0x40b   :  { %568 = vrot.lane.b32.xlu1 %v2648_v56, %s2481_s17 }
 0x46f   :  { %v545_v37 = vpop.permute.xlu0 %544 }
 0x470   :  { %v556_v54 = vmul.f32 %v545_v37, %v517_v16 }
 0x471   :  { %v547_v38 = vpop.permute.xlu1 %546 }
 0x472   :  { %v557_v39 = vmul.f32 %v547_v38, %v520_v24 }
 0x473   :  { %v567_v40 = vpop.permute.xlu0 %566 }
 0x474   :  { %v577_v41 = vadd.f32 %v567_v40, %v557_v39 }
 0x475   :  { %v565_v42 = vpop.permute.xlu1 %564 }
 0x476   :  { %v576_v52 = vadd.f32 %v565_v42, %v556_v54  ;;  %v2852_v44 = vmax.f32 %v577_v41, 0.0 }
 0x477   :  { %v551_v43 = vpop.permute.xlu0 %550 }
 0x478   :  { %v2854_v45 = vmax.f32 %v576_v52, 0.0  ;;  %v559_v47 = vmul.f32 %v2202_v21, %v551_v43 }
 0x479   :  { %v549_v46 = vpop.permute.xlu1 %548 }
 0x47a   :  { %v592_v58 = vpack.c.bf16 %v2852_v44, %v2854_v45  ;;  %v558_v56 = vmul.f32 %v2201_v13, %v549_v46 }
 0x47b   :  { %v571_v48 = vpop.permute.xlu0 %570 }
 0x47c   :  { %v579_v49 = vadd.f32 %v571_v48, %v559_v47  ;;  %2078 = vmatmul.mubr.msk.bf16.vlgmr.msra.gmra.mrb[4].mxu1 %vm354_vm8, %v592_v58  ;;  %v599_v50 = vsel %vm354_vm8, %v592_v58, 0 }
 0x47d   :  { %2204 = vmatpush3.bf16.xpose.msra.mxu1 %v599_v50  ;;  %v569_v51 = vpop.permute.xlu1 %568  ;;  %646 = vmatprep.mubr.bf16.mxu1 %v2476_v2  ;;  %v47_v2 = vld [vmem:[%s3426_s6 + $0x8] sm:$0xff] }
 0x47e   :  { %v578_v53 = vadd.f32 %v569_v51, %v558_v56  ;;  %2205 = vmatprep.subr.bf16.mxu1 %v2477_v15  ;;  %v2862_v55 = vmax.f32 %v579_v49, 0.0  ;;  %v657_v1 = vpack.c.bf16 %v47_v2, %v47_v2 }
 0x480   :  { %v2864_v57 = vmax.f32 %v578_v53, 0.0 }
 0x482   :  { %v593_v61 = vpack.c.bf16 %v2862_v55, %v2864_v57 }
 0x484   :  { %2079 = vmatmul.mubr.msk.bf16.gmra.mrb[8].mxu1 %vm354_vm8, %v593_v61  ;;  %v602_v62 = vsel %vm354_vm8, %v593_v61, 0 }
 0x485   :  { %2206 = vmatpush3.bf16.xpose.msra.mxu1 %v602_v62  ;;  %2207 = vmatprep.mubr.msk.bf16.mxu1 %vm2478_vm0, %v2477_v15 }
 0x48c   :  { %2208 = vmatmul.mubr.msk.bf16.vlgmr.msra.gmra.mrb[12].mxu1 %vm354_vm8, %v657_v1 }
 0x54f   :  { %v2876_v4 = vpop.f32.mrb[4].mxu1 }
 0x550   :  { %869 = vst.msk [vmem:[#allocation2] sm:$0xff] %vm417_vm3, %v2876_v4  ;;  %v640_v5 = vpop.f32.mrb[5].mxu1 }
 0x551   :  { %877 = vst.msk [vmem:[#allocation2 + $0x20] sm:$0xff] %vm427_vm4, %v2876_v4  ;;  %v2894_v6 = vpop.f32.mrb[6].mxu1 }
 0x552   :  { %885 = vst.msk [vmem:[#allocation2 + $0x40] sm:$0xff] %vm437_vm5, %v2876_v4  ;;  %886 = vst.msk [vmem:[#allocation2 + $0x48] sm:$0xff] %vm437_vm5, %v2894_v6  ;;  %v644_v7 = vpop.f32.mrb[7].mxu1 }
 0x553   :  { %893 = vst.msk [vmem:[#allocation2 + $0x60] sm:$0xff] %vm447_vm6, %v2876_v4  ;;  %894 = vst.msk [vmem:[#allocation2 + $0x68] sm:$0xff] %vm447_vm6, %v2894_v6 }
 0x554   :  { %873 = vst.msk [vmem:[#allocation2] sm:$0xff] %vm422_vm7, %v2482_v28 }
 0x555   :  { %881 = vst.msk [vmem:[#allocation2 + $0x20] sm:$0xff] %vm432_vm10, %v2482_v28 }
 0x556   :  { %889 = vst.msk [vmem:[#allocation2 + $0x40] sm:$0xff] %vm442_vm11, %v2482_v28  ;;  %890 = vst.msk [vmem:[#allocation2 + $0x48] sm:$0xff] %vm442_vm11, %v2482_v28 }
 0x557   :  { %897 = vst.msk [vmem:[#allocation2 + $0x60] sm:$0xff] %vm452_vm12, %v2482_v28  ;;  %898 = vst.msk [vmem:[#allocation2 + $0x68] sm:$0xff] %vm452_vm12, %v2482_v28  ;;  %v648_v8 = vpop.f32.mrb[8].mxu1 }
 0x558   :  { %870 = vst.msk [vmem:[#allocation2 + $0x8] sm:$0xff] %vm417_vm3, %v2894_v6  ;;  %871 = vst.msk [vmem:[#allocation2 + $0x10] sm:$0xff] %vm417_vm3, %v648_v8  ;;  %v650_v9 = vpop.f32.mrb[9].mxu1 }
 0x559   :  { %878 = vst.msk [vmem:[#allocation2 + $0x28] sm:$0xff] %vm427_vm4, %v2894_v6  ;;  %879 = vst.msk [vmem:[#allocation2 + $0x30] sm:$0xff] %vm427_vm4, %v648_v8  ;;  %v652_v10 = vpop.f32.mrb[10].mxu1 }
 0x55a   :  { %874 = vst.msk [vmem:[#allocation2 + $0x8] sm:$0xff] %vm422_vm7, %v2482_v28  ;;  %875 = vst.msk [vmem:[#allocation2 + $0x10] sm:$0xff] %vm422_vm7, %v2482_v28  ;;  %v654_v11 = vpop.f32.mrb[11].mxu1 }
 0x55b   :  { %882 = vst.msk [vmem:[#allocation2 + $0x28] sm:$0xff] %vm432_vm10, %v2482_v28  ;;  %883 = vst.msk [vmem:[#allocation2 + $0x30] sm:$0xff] %vm432_vm10, %v2482_v28  ;;  %v901_v52 = vld [vmem:[#allocation2] sm:$0xff] }
 0x55c   :  { %887 = vst.msk [vmem:[#allocation2 + $0x50] sm:$0xff] %vm437_vm5, %v648_v8  ;;  %888 = vst.msk [vmem:[#allocation2 + $0x58] sm:$0xff] %vm437_vm5, %v652_v10 }
 0x55d   :  { %895 = vst.msk [vmem:[#allocation2 + $0x70] sm:$0xff] %vm447_vm6, %v648_v8  ;;  %896 = vst.msk [vmem:[#allocation2 + $0x78] sm:$0xff] %vm447_vm6, %v652_v10 }
 0x55e   :  { %891 = vst.msk [vmem:[#allocation2 + $0x50] sm:$0xff] %vm442_vm11, %v2482_v28  ;;  %892 = vst.msk [vmem:[#allocation2 + $0x58] sm:$0xff] %vm442_vm11, %v2482_v28 }
 0x55f   :  { %899 = vst.msk [vmem:[#allocation2 + $0x70] sm:$0xff] %vm452_vm12, %v2482_v28  ;;  %900 = vst.msk [vmem:[#allocation2 + $0x78] sm:$0xff] %vm452_vm12, %v2482_v28  ;;  %v695_v12 = vpop.f32.mrb[12].mxu1 }
 0x560   :  { %872 = vst.msk [vmem:[#allocation2 + $0x18] sm:$0xff] %vm417_vm3, %v652_v10  ;;  %v740_v13 = vrot.slane %v695_v12, %v2661_v59  ;;  %v2209_v14 = vpop.f32.mrb[13].mxu1  ;;  %v716_v16 = vrot.slane %v695_v12, %v2664_v60  ;;  %v704_v17 = vrot.slane %v695_v12, %v2569_v18  ;;  %v728_v27 = vrot.slane %v695_v12, %v2670_v3 }
 0x561   :  { %880 = vst.msk [vmem:[#allocation2 + $0x38] sm:$0xff] %vm427_vm4, %v652_v10  ;;  %v698_v21 = vpop.f32.mrb[14].mxu1  ;;  %v902_v43 = vld [vmem:[#allocation2 + $0x8] sm:$0xff] }
 0x562   :  { %876 = vst.msk [vmem:[#allocation2 + $0x18] sm:$0xff] %vm422_vm7, %v2482_v28  ;;  %718 = vrot.lane.b32.xlu0 %v716_v16, %s2479_s15  ;;  %706 = vrot.lane.b32.xlu1 %v704_v17, %s2480_s16  ;;  %v2210_v22 = vpop.f32.mrb[15].mxu1  ;;  %v741_v23 = vadd.f32 %v740_v13, %v640_v5  ;;  %v742_v24 = vadd.f32 %v740_v13, %v644_v7 }
 0x563   :  { %884 = vst.msk [vmem:[#allocation2 + $0x38] sm:$0xff] %vm432_vm10, %v2482_v28  ;;  %v744_v25 = vadd.f32 %v740_v13, %v654_v11  ;;  %v743_v26 = vadd.f32 %v740_v13, %v650_v9  ;;  %v919_v46 = vpack.c.bf16 %v902_v43, %v901_v52  ;;  %v909_v52 = vld [vmem:[#allocation2 + $0x40] sm:$0xff]  ;;  %v910_v43 = vld [vmem:[#allocation2 + $0x48] sm:$0xff] }
 0x564   :  { %1265 = vst.msk [vmem:[#allocation2] sm:$0xff] %vm359_vm2, %v2477_v15  ;;  %1266 = vst.msk [vmem:[#allocation2 + $0x8] sm:$0xff] %vm359_vm2, %v2477_v15 }
 0x565   :  { %2211 = vmatprep.subr.bf16.mxu0 %v919_v46  ;;  %1273 = vst.msk [vmem:[#allocation2 + $0x40] sm:$0xff] %vm359_vm2, %v2477_v15  ;;  %1274 = vst.msk [vmem:[#allocation2 + $0x48] sm:$0xff] %vm359_vm2, %v2477_v15 }
 0x566   :  { %797 = vrot.lane.b32.xlu0 %v741_v23, %s2481_s17  ;;  %730 = vrot.lane.b32.xlu1 %v728_v27, %s2481_s17 }
 0x567   :  { %2212 = vmatpush3.bf16.msra.mxu0 %v919_v46  ;;  %v923_v46 = vpack.c.bf16 %v910_v43, %v909_v52 }
 0x56a   :  { %799 = vrot.lane.b32.xlu1 %v742_v24, %s2481_s17 }
 0x5d4   :  { %v707_v29 = vpop.permute.xlu1 %706  ;;  %v719_v32 = vpop.permute.xlu0 %718 }
 0x5d5   :  { %v710_v30 = vadd.f32 %v707_v29, %v2894_v6  ;;  %v709_v31 = vadd.f32 %v707_v29, %v2876_v4  ;;  %v722_v33 = vadd.f32 %v719_v32, %v2894_v6  ;;  %v721_v34 = vadd.f32 %v719_v32, %v2876_v4 }
 0x5d6   :  { %v712_v35 = vadd.f32 %v707_v29, %v652_v10  ;;  %v711_v36 = vadd.f32 %v707_v29, %v648_v8  ;;  %v724_v37 = vadd.f32 %v719_v32, %v652_v10  ;;  %v723_v38 = vadd.f32 %v719_v32, %v648_v8 }
 0x5d7   :  { %751 = vrot.lane.b32.xlu1 %v710_v30, %s2481_s17  ;;  %749 = vrot.lane.b32.xlu0 %v709_v31, %s2481_s17 }
 0x5d8   :  { %v731_v39 = vpop.permute.xlu1 %730  ;;  %v798_v58 = vpop.permute.xlu0 %797 }
 0x5d9   :  { %v734_v40 = vadd.f32 %v731_v39, %v2894_v6  ;;  %v733_v54 = vadd.f32 %v731_v39, %v2876_v4  ;;  %v736_v41 = vadd.f32 %v731_v39, %v652_v10  ;;  %v735_v42 = vadd.f32 %v731_v39, %v648_v8  ;;  %v905_v39 = vld [vmem:[#allocation2 + $0x20] sm:$0xff] }
 0x5da   :  { %1269 = vst.msk [vmem:[#allocation2 + $0x20] sm:$0xff] %vm359_vm2, %v2477_v15 }
 0x5db   :  { %767 = vrot.lane.b32.xlu1 %v722_v33, %s2481_s17  ;;  %765 = vrot.lane.b32.xlu0 %v721_v34, %s2481_s17 }
 0x5dc   :  { %v800_v47 = vpop.permute.xlu1 %799 }
 0x5df   :  { %755 = vrot.lane.b32.xlu1 %v712_v35, %s2481_s17  ;;  %753 = vrot.lane.b32.xlu0 %v711_v36, %s2481_s17  ;;  %v903_v36 = vld [vmem:[#allocation2 + $0x10] sm:$0xff] }
 0x5e0   :  { %1267 = vst.msk [vmem:[#allocation2 + $0x10] sm:$0xff] %vm359_vm2, %v2477_v15 }
 0x5e3   :  { %771 = vrot.lane.b32.xlu1 %v724_v37, %s2481_s17  ;;  %769 = vrot.lane.b32.xlu0 %v723_v38, %s2481_s17  ;;  %v904_v37 = vld [vmem:[#allocation2 + $0x18] sm:$0xff] }
 0x5e4   :  { %v920_v38 = vpack.c.bf16 %v904_v37, %v903_v36  ;;  %1268 = vst.msk [vmem:[#allocation2 + $0x18] sm:$0xff] %vm359_vm2, %v2477_v15  ;;  %v52_v36 = vld [vmem:[%s3427_s7 + $0x18] sm:$0xff] }
 0x5e6   :  { %2213 = vmatprep.subr.bf16.mxu0 %v920_v38 }
 0x5e7   :  { %783 = vrot.lane.b32.xlu1 %v734_v40, %s2481_s17  ;;  %781 = vrot.lane.b32.xlu0 %v733_v54, %s2481_s17  ;;  %v906_v40 = vld [vmem:[#allocation2 + $0x28] sm:$0xff] }
 0x5e8   :  { %2214 = vmatpush3.bf16.msra.mxu0 %v920_v38  ;;  %v921_v54 = vpack.c.bf16 %v906_v40, %v905_v39  ;;  %1270 = vst.msk [vmem:[#allocation2 + $0x28] sm:$0xff] %vm359_vm2, %v2477_v15  ;;  %v53_v38 = vld [vmem:[%s3427_s7 + $0x20] sm:$0xff] }
 0x5e9   :  { %v1035_v39 = vpack.c.bf16 %v53_v38, %v52_v36 }
 0x5ea   :  { %2215 = vmatprep.subr.bf16.mxu0 %v921_v54 }
 0x5eb   :  { %787 = vrot.lane.b32.xlu1 %v736_v41, %s2481_s17  ;;  %785 = vrot.lane.b32.xlu0 %v735_v42, %s2481_s17  ;;  %v908_v41 = vld [vmem:[#allocation2 + $0x38] sm:$0xff] }
 0x5ec   :  { %2216 = vmatpush3.bf16.msra.mxu0 %v921_v54  ;;  %1272 = vst.msk [vmem:[#allocation2 + $0x38] sm:$0xff] %vm359_vm2, %v2477_v15  ;;  %v54_v54 = vld [vmem:[%s3427_s7 + $0x28] sm:$0xff] }
 0x5ef   :  { %803 = vrot.lane.b32.xlu1 %v744_v25, %s2481_s17  ;;  %801 = vrot.lane.b32.xlu0 %v743_v26, %s2481_s17 }
 0x649   :  { %v750_v48 = vpop.permute.xlu0 %749  ;;  %v752_v56 = vpop.permute.xlu1 %751 }
 0x64d   :  { %v766_v49 = vpop.permute.xlu0 %765  ;;  %v768_v50 = vpop.permute.xlu1 %767 }
 0x64e   :  { %v809_v2 = vsel %vm354_vm8, %v750_v48, %v766_v49  ;;  %v810_v1 = vsel %vm354_vm8, %v752_v56, %v768_v50  ;;  %v913_v56 = vld [vmem:[#allocation2 + $0x60] sm:$0xff]  ;;  %v914_v49 = vld [vmem:[#allocation2 + $0x68] sm:$0xff]  ;;  %v915_v50 = vld [vmem:[#allocation2 + $0x70] sm:$0xff] }
 0x64f   :  { %1277 = vst.msk [vmem:[#allocation2 + $0x60] sm:$0xff] %vm359_vm2, %v2477_v15  ;;  %1278 = vst.msk [vmem:[#allocation2 + $0x68] sm:$0xff] %vm359_vm2, %v2477_v15 }
 0x650   :  { %1279 = vst.msk [vmem:[#allocation2 + $0x70] sm:$0xff] %vm359_vm2, %v2477_v15 }
 0x651   :  { %v754_v51 = vpop.permute.xlu0 %753  ;;  %v756_v53 = vpop.permute.xlu1 %755 }
 0x655   :  { %v770_v61 = vpop.permute.xlu0 %769  ;;  %v772_v62 = vpop.permute.xlu1 %771 }
 0x656   :  { %v811_v17 = vsel %vm354_vm8, %v754_v51, %v770_v61  ;;  %v812_v21 = vsel %vm354_vm8, %v756_v53, %v772_v62  ;;  %v925_v51 = vpack.c.bf16 %v914_v49, %v913_v56  ;;  %v916_v53 = vld [vmem:[#allocation2 + $0x78] sm:$0xff] }
 0x657   :  { %v926_v61 = vpack.c.bf16 %v916_v53, %v915_v50  ;;  %1280 = vst.msk [vmem:[#allocation2 + $0x78] sm:$0xff] %vm359_vm2, %v2477_v15 }
 0x659   :  { %v782_v4 = vpop.permute.xlu0 %781  ;;  %v784_v5 = vpop.permute.xlu1 %783 }
 0x65a   :  { %v813_v6 = vsel %vm359_vm2, %v809_v2, %v782_v4  ;;  %v814_v7 = vsel %vm359_vm2, %v810_v1, %v784_v5 }
 0x65b   :  { %v817_v8 = vsel %vm364_vm9, %v813_v6, %v798_v58  ;;  %v818_v9 = vsel %vm364_vm9, %v814_v7, %v800_v47  ;;  %v911_v58 = vld [vmem:[#allocation2 + $0x50] sm:$0xff]  ;;  %v912_v47 = vld [vmem:[#allocation2 + $0x58] sm:$0xff] }
 0x65c   :  { %v821_v10 = vmul.f32 0.2, %v817_v8  ;;  %v822_v11 = vmul.f32 0.2, %v818_v9  ;;  %v924_v48 = vpack.c.bf16 %v912_v47, %v911_v58  ;;  %1275 = vst.msk [vmem:[#allocation2 + $0x50] sm:$0xff] %vm359_vm2, %v2477_v15  ;;  %1276 = vst.msk [vmem:[#allocation2 + $0x58] sm:$0xff] %vm359_vm2, %v2477_v15 }
 0x65d   :  { %v786_v12 = vpop.permute.xlu0 %785  ;;  %v788_v13 = vpop.permute.xlu1 %787  ;;  %v56_v47 = vld [vmem:[%s3427_s7 + $0x38] sm:$0xff] }
 0x65e   :  { %v825_v14 = vmax.f32 %v817_v8, %v821_v10  ;;  %v826_v16 = vmax.f32 %v818_v9, %v822_v11  ;;  %v815_v24 = vsel %vm359_vm2, %v811_v17, %v786_v12  ;;  %v816_v25 = vsel %vm359_vm2, %v812_v21, %v788_v13 }
 0x660   :  { %v2978_v22 = vadd.f32 %v825_v14, %v2724_v63  ;;  %v2981_v23 = vadd.f32 %v826_v16, %v2729_v0 }
 0x661   :  { %v802_v26 = vpop.permute.xlu0 %801  ;;  %v804_v27 = vpop.permute.xlu1 %803 }
 0x662   :  { %v819_v29 = vsel %vm364_vm9, %v815_v24, %v802_v26  ;;  %v820_v30 = vsel %vm364_vm9, %v816_v25, %v804_v27  ;;  %833 = vmax.xlane.f32.xlu0 %v2978_v22  ;;  %835 = vmax.xlane.f32.xlu1 %v2981_v23 }
 0x663   :  { %v823_v31 = vmul.f32 0.2, %v819_v29  ;;  %v824_v32 = vmul.f32 0.2, %v820_v30 }
 0x665   :  { %v827_v33 = vmax.f32 %v819_v29, %v823_v31  ;;  %v828_v34 = vmax.f32 %v820_v30, %v824_v32 }
 0x667   :  { %v2990_v0 = vadd.f32 %v827_v33, %v2748_v19  ;;  %v2994_v35 = vadd.f32 %v828_v34, %v2753_v20  ;;  %v907_v20 = vld [vmem:[#allocation2 + $0x30] sm:$0xff] }
 0x668   :  { %v922_v42 = vpack.c.bf16 %v908_v41, %v907_v20  ;;  %1271 = vst.msk [vmem:[#allocation2 + $0x30] sm:$0xff] %vm359_vm2, %v2477_v15  ;;  %v55_v20 = vld [vmem:[%s3427_s7 + $0x30] sm:$0xff] }
 0x669   :  { %837 = vmax.xlane.f32.xlu0 %v2990_v0 }
 0x66a   :  { %2217 = vmatprep.subr.bf16.mxu0 %v922_v42 }
 0x66b   :  { %2218 = vmatpush3.bf16.msra.mxu0 %v922_v42  ;;  %v1036_v42 = vpack.c.bf16 %v55_v20, %v54_v54 }
 0x66c   :  { %2219 = vmatprep.subr.bf16.mxu0 %v923_v46 }
 0x66d   :  { %839 = vmax.xlane.f32.xlu0 %v2994_v35 }
 0x66f   :  { %2220 = vmatpush3.bf16.msra.mxu0 %v923_v46 }
 0x670   :  { %2221 = vmatprep.subr.bf16.mxu0 %v924_v48 }
 0x673   :  { %2222 = vmatpush3.bf16.msra.mxu0 %v924_v48  ;;  %v57_v48 = vld [vmem:[%s3427_s7 + $0x40] sm:$0xff] }
 0x674   :  { %2223 = vmatprep.subr.bf16.mxu0 %v925_v51  ;;  %v1037_v49 = vpack.c.bf16 %v57_v48, %v56_v47  ;;  %v2454_v47 = vld [vmem:[%s3422_s2 + $0x18] sm:$0xff] }
 0x677   :  { %2224 = vmatpush3.bf16.msra.mxu0 %v925_v51 }
 0x678   :  { %2225 = vmatprep.subr.bf16.mxu0 %v926_v61 }
 0x67b   :  { %2226 = vmatpush3.bf16.msra.mxu0 %v926_v61 }
 0x6ef   :  { %v834_v62 = vpop.xlane.xlu0 %833  ;;  %v836_v2 = vpop.xlane.xlu1 %835 }
 0x6f0   :  { %v841_v1 = vsub.f32 %v2978_v22, %v834_v62  ;;  %v842_v4 = vsub.f32 %v2981_v23, %v836_v2 }
 0x6f2   :  { %v845_v5 = vmul.f32 1.442695, %v841_v1  ;;  %v847_v6 = vmul.f32 1.442695, %v842_v4 }
 0x6f4   :  { %2373 = vpow2.f32 %v845_v5  ;;  %v1093_v5 = vld [vmem:[%s3425_s5] sm:$0xff] }
 0x6f5   :  { %2375 = vpow2.f32 %v847_v6  ;;  %v1094_v6 = vld [vmem:[%s3425_s5 + $0x8] sm:$0xff] }
 0x6f6   :  { %v838_v7 = vpop.xlane.xlu0 %837 }
 0x6f7   :  { %v843_v8 = vsub.f32 %v2990_v0, %v838_v7  ;;  %v50_v0 = vld [vmem:[%s3427_s7 + $0x8] sm:$0xff]  ;;  %v1099_v7 = vpack.c.bf16 %v1094_v6, %v1093_v5 }
 0x6f9   :  { %v849_v9 = vmul.f32 1.442695, %v843_v8 }
 0x6fa   :  { %v840_v10 = vpop.xlane.xlu0 %839 }
 0x6fb   :  { %v844_v11 = vsub.f32 %v2994_v35, %v840_v10  ;;  %2377 = vpow2.f32 %v849_v9  ;;  %v51_v35 = vld [vmem:[%s3427_s7 + $0x10] sm:$0xff] }
 0x6fc   :  { %v1034_v37 = vpack.c.bf16 %v51_v35, %v50_v0  ;;  %v48_v35 = vld [vmem:[%s3426_s6 + $0x10] sm:$0xff] }
 0x6fd   :  { %v851_v12 = vmul.f32 1.442695, %v844_v11  ;;  %v1156_v36 = vpack.c.bf16 %v48_v35, %v48_v35  ;;  %v1498_v35 = vld [vmem:[%s3428_s8 + $0x48] sm:$0xff] }
 0x6fe   :  { %v2374_v13 = vpop.eup %2373  ;;  %2231 = vmatprep.subr.bf16.mxu1 %v1034_v37 }
 0x6ff   :  { %v2376_v14 = vpop.eup %2375  ;;  %2379 = vpow2.f32 %v851_v12  ;;  %2232 = vmatpush3.bf16.msra.mxu1 %v1034_v37 }
 0x700   :  { %v917_v16 = vpack.c.bf16 %v2376_v14, %v2374_v13  ;;  %2233 = vmatprep.subr.bf16.mxu1 %v1035_v39 }
 0x702   :  { %2227 = vmatprep.mubr.bf16.mxu0 %v917_v16 }
 0x703   :  { %2234 = vmatpush3.bf16.msra.mxu1 %v1035_v39 }
 0x704   :  { %2235 = vmatprep.subr.bf16.mxu1 %v1036_v42 }
 0x705   :  { %v2378_v17 = vpop.eup %2377 }
 0x707   :  { %2236 = vmatpush3.bf16.msra.mxu1 %v1036_v42 }
 0x708   :  { %2237 = vmatprep.subr.bf16.mxu1 %v1037_v49 }
 0x709   :  { %v2380_v21 = vpop.eup %2379 }
 0x70a   :  { %v918_v22 = vpack.c.bf16 %v2380_v21, %v2378_v17 }
 0x70b   :  { %2238 = vmatpush3.bf16.msra.mxu1 %v1037_v49 }
 0x70c   :  { %2228 = vmatmul.mubr.bf16.vlgmr.msra.gmra.mrb[12].mxu0 %v918_v22  ;;  %2243 = vmatprep.subr.bf16.mxu1 %v1099_v7 }
 0x7df   :  { %v2229_v23 = vpop.f32.mrb[12].mxu0 }
 0x7e0   :  { %v961_v24 = vpop.f32.mrb[13].mxu0  ;;  %v978_v29 = vmax.f32 %v2229_v23, 1e-30 }
 0x7e1   :  { %v976_v25 = vmax.f32 %v961_v24, 1e-30  ;;  %v2230_v26 = vpop.f32.mrb[14].mxu0 }
 0x7e2   :  { %v964_v27 = vpop.f32.mrb[15].mxu0  ;;  %v979_v31 = vmax.f32 %v2230_v26, 1e-30 }
 0x7e3   :  { %2381 = vrcp.f32 %v976_v25  ;;  %v977_v30 = vmax.f32 %v964_v27, 1e-30  ;;  %v1095_v25 = vld [vmem:[%s3425_s5 + $0x10] sm:$0xff] }
 0x7e5   :  { %2383 = vrcp.f32 %v977_v30 }
 0x7e6   :  { %2385 = vrcp.f32 %v978_v29 }
 0x7e7   :  { %2387 = vrcp.f32 %v979_v31 }
 0x7ed   :  { %v2382_v32 = vpop.eup %2381 }
 0x7ee   :  { %988 = vrot.lane.b32.xlu1 %v2382_v32, %s2481_s17 }
 0x7ef   :  { %v2384_v33 = vpop.eup %2383 }
 0x7f0   :  { %990 = vrot.lane.b32.xlu0 %v2384_v33, %s2481_s17  ;;  %v2386_v34 = vpop.eup %2385 }
 0x7f1   :  { %v2388_v40 = vpop.eup %2387 }
 0x7f2   :  { %992 = vrot.lane.b32.xlu1 %v2386_v34, %s2481_s17 }
 0x7f6   :  { %994 = vrot.lane.b32.xlu1 %v2388_v40, %s2481_s17 }
 0x860   :  { %v989_v41 = vpop.permute.xlu1 %988 }
 0x861   :  { %v1000_v52 = vmul.f32 %v989_v41, %v961_v24 }
 0x862   :  { %v991_v43 = vpop.permute.xlu0 %990 }
 0x863   :  { %v1004_v46 = vadd.f32 %v1000_v52, %v2854_v45  ;;  %v1001_v58 = vmul.f32 %v991_v43, %v964_v27 }
 0x864   :  { %v993_v56 = vpop.permute.xlu1 %992 }
 0x865   :  { %v1005_v50 = vadd.f32 %v1001_v58, %v2852_v44  ;;  %v1002_v51 = vmul.f32 %v2229_v23, %v993_v56  ;;  %v1008_v53 = vmax.f32 %v1004_v46, 0.0 }
 0x867   :  { %v1009_v61 = vmax.f32 %v1005_v50, 0.0  ;;  %v1006_v2 = vadd.f32 %v1002_v51, %v2864_v57 }
 0x868   :  { %v995_v62 = vpop.permute.xlu1 %994 }
 0x869   :  { %v1003_v1 = vmul.f32 %v2230_v26, %v995_v62  ;;  %v2347_v4 = vpack.i.bf16 %v1009_v61, %v1008_v53  ;;  %v1010_v9 = vmax.f32 %v1006_v2, 0.0  ;;  %v1096_v26 = vld [vmem:[%s3425_s5 + $0x18] sm:$0xff] }
 0x86a   :  { %v1100_v29 = vpack.c.bf16 %v1096_v26, %v1095_v25 }
 0x86b   :  { %v1007_v8 = vadd.f32 %v1003_v1, %v2862_v55  ;;  %2348 = vrot.lane.b32.xlu0 %v2347_v4, %s2480_s16 }
 0x86d   :  { %v1011_v10 = vmax.f32 %v1007_v8, 0.0 }
 0x86f   :  { %v2352_v11 = vpack.i.bf16 %v1011_v10, %v1010_v9 }
 0x871   :  { %2353 = vrot.lane.b32.xlu1 %v2352_v11, %s2480_s16 }
 0x875   :  { %1224 = vrot.lane.b32.xlu1 %v2724_v63, %s2483_s3 }
 0x879   :  { %1228 = vrot.lane.b32.xlu1 %v2748_v19, %s2483_s3 }
 0x8dd   :  { %v2349_v12 = vpop.permute.xlu0 %2348 }
 0x8de   :  { %v2351_v13 = vunpack.i.h.bf16 %v2349_v12  ;;  %v2350_v14 = vunpack.i.l.bf16 %v2349_v12 }
 0x8e0   :  { %v1029_v16 = vsel %vm354_vm8, %v2852_v44, %v2351_v13  ;;  %v1028_v17 = vsel %vm354_vm8, %v2854_v45, %v2350_v14 }
 0x8e1   :  { %v3073_v21 = vpack.c.bf16 %v1029_v16, %v1028_v17 }
 0x8e3   :  { %v2354_v22 = vpop.permute.xlu1 %2353  ;;  %2239 = vmatprep.mubr.msk.bf16.mxu1 %vm359_vm2, %v3073_v21 }
 0x8e4   :  { %v2356_v23 = vunpack.i.h.bf16 %v2354_v22  ;;  %v2355_v24 = vunpack.i.l.bf16 %v2354_v22 }
 0x8e6   :  { %v1031_v44 = vsel %vm354_vm8, %v2862_v55, %v2356_v23  ;;  %v1030_v45 = vsel %vm354_vm8, %v2864_v57, %v2355_v24 }
 0x8e7   :  { %v3087_v27 = vpack.c.bf16 %v1031_v44, %v1030_v45  ;;  %v1225_v48 = vpop.permute.xlu1 %1224 }
 0x8e9   :  { %2240 = vmatmul.mubr.msk.bf16.vlgmr.msra.gmra.mrb[16].mxu1 %vm359_vm2, %v3087_v27 }
 0x8ea   :  { %2244 = vmatpush3.bf16.msra.mxu1 %v1099_v7 }
 0x8eb   :  { %2245 = vmatprep.subr.bf16.mxu1 %v1100_v29  ;;  %v1229_v7 = vpop.permute.xlu1 %1228 }
 0x8ee   :  { %2246 = vmatpush3.bf16.msra.mxu1 %v1100_v29 }
 0x8ef   :  { %2251 = vmatprep.subr.bf16.mxu1 %v2477_v15 }
 0x9bc   :  { %v2241_v30 = vpop.f32.mrb[16].mxu1 }
 0x9bd   :  { %v1078_v31 = vpop.f32.mrb[17].mxu1 }
 0x9be   :  { %v2242_v32 = vpop.f32.mrb[18].mxu1 }
 0x9bf   :  { %v1098_v33 = vpack.c.bf16 %v2242_v32, %v2241_v30  ;;  %v1081_v34 = vpop.f32.mrb[19].mxu1 }
 0x9c0   :  { %v1097_v55 = vpack.c.bf16 %v1081_v34, %v1078_v31 }
 0x9c1   :  { %v1105_v57 = vsel %vm354_vm8, %v1098_v33, 0 }
 0x9c2   :  { %v1102_v0 = vsel %vm354_vm8, %v1097_v55, 0  ;;  %2247 = vmatprep.mubr.msk.bf16.mxu1 %vm354_vm8, %v1097_v55 }
 0x9c3   :  { %2248 = vmatmul.mubr.msk.bf16.vlgmr.msra.gmra.mrb[20].mxu1 %vm354_vm8, %v1098_v33 }
 0x9c4   :  { %2252 = vmatpush3.bf16.xpose.msra.mxu1 %v1102_v0  ;;  %2255 = vmatprep.mubr.msk.bf16.mxu1 %vm2478_vm0, %v2477_v15  ;;  %v1497_v0 = vld [vmem:[%s3428_s8 + $0x40] sm:$0xff] }
 0x9c5   :  { %2253 = vmatprep.subr.bf16.mxu1 %v2477_v15 }
 0x9cc   :  { %2254 = vmatpush3.bf16.xpose.msra.mxu1 %v1105_v57 }
 0x9cd   :  { %2279 = vmatprep.subr.bf16.mxu1 %v3073_v21 }
 0x9d3   :  { %2256 = vmatmul.mubr.msk.bf16.vlgmr.msra.gmra.mrb[24].mxu1 %vm354_vm8, %v1156_v36 }
 0x9d4   :  { %2280 = vmatpush3.bf16.msra.mxu1 %v3073_v21 }
 0x9d5   :  { %2281 = vmatprep.subr.bf16.mxu1 %v3087_v27 }
 0x9d8   :  { %2282 = vmatpush3.bf16.msra.mxu1 %v3087_v27 }
 0xa96   :  { %v2249_v15 = vpop.f32.mrb[20].mxu1 }
 0xa97   :  { %1283 = vst.msk [vmem:[#allocation2 + $0x10] sm:$0xff] %vm142_vm1, %v2249_v15  ;;  %v1141_v37 = vpop.f32.mrb[21].mxu1 }
 0xa98   :  { %1288 = vst.msk [vmem:[#allocation2 + $0x10] sm:$0xff] %vm1285_vm13, %v2482_v28  ;;  %v2250_v38 = vpop.f32.mrb[22].mxu1 }
 0xa99   :  { %1281 = vst.msk [vmem:[#allocation2] sm:$0xff] %vm142_vm1, %v1141_v37  ;;  %1284 = vst.msk [vmem:[#allocation2 + $0x18] sm:$0xff] %vm142_vm1, %v2250_v38  ;;  %v1144_v39 = vpop.f32.mrb[23].mxu1 }
 0xa9a   :  { %1286 = vst.msk [vmem:[#allocation2] sm:$0xff] %vm1285_vm13, %v2482_v28  ;;  %1289 = vst.msk [vmem:[#allocation2 + $0x18] sm:$0xff] %vm1285_vm13, %v2482_v28 }
 0xa9b   :  { %1282 = vst.msk [vmem:[#allocation2 + $0x8] sm:$0xff] %vm142_vm1, %v1144_v39 }
 0xa9c   :  { %1287 = vst.msk [vmem:[#allocation2 + $0x8] sm:$0xff] %vm1285_vm13, %v2482_v28  ;;  %v2453_v28 = vld [vmem:[%s3422_s2 + $0x8] sm:$0xff] }
 0xa9f   :  { %v1292_v19 = vld [vmem:[#allocation2 + $0x10] sm:$0xff] }
 0xaa1   :  { %v1290_v63 = vld [vmem:[#allocation2] sm:$0xff]  ;;  %v1293_v40 = vld [vmem:[#allocation2 + $0x18] sm:$0xff] }
 0xaa2   :  { %v1297_v41 = vpack.c.bf16 %v1293_v40, %v1292_v19  ;;  %v1501_v19 = vld [vmem:[%s3428_s8 + $0x60] sm:$0xff]  ;;  %v1502_v40 = vld [vmem:[%s3428_s8 + $0x68] sm:$0xff] }
 0xaa3   :  { %v1291_v54 = vld [vmem:[#allocation2 + $0x8] sm:$0xff] }
 0xaa4   :  { %v1296_v20 = vpack.c.bf16 %v1291_v54, %v1290_v63 }
 0xaa6   :  { %2259 = vmatprep.subr.bf16.mxu0 %v1296_v20  ;;  %v1194_v42 = vpop.f32.mrb[24].mxu1 }
 0xaa7   :  { %2260 = vmatpush3.bf16.msra.mxu0 %v1296_v20  ;;  %v1203_v52 = vrot.slane %v1194_v42, %v2569_v18  ;;  %v2257_v43 = vpop.f32.mrb[25].mxu1  ;;  %v1588_v20 = vpack.c.bf16 %v1502_v40, %v1501_v19  ;;  %v1503_v42 = vld [vmem:[%s3428_s8 + $0x70] sm:$0xff] }
 0xaa8   :  { %2261 = vmatprep.subr.bf16.mxu0 %v1297_v41  ;;  %v1197_v46 = vpop.f32.mrb[26].mxu1 }
 0xaa9   :  { %1205 = vrot.lane.b32.xlu0 %v1203_v52, %s2483_s3  ;;  %v2258_v58 = vpop.f32.mrb[27].mxu1  ;;  %v1504_v52 = vld [vmem:[%s3428_s8 + $0x78] sm:$0xff]  ;;  %v66_v46 = vld [vmem:[%s3427_s7 + $0x88] sm:$0xff] }
 0xaaa   :  { %v1589_v43 = vpack.c.bf16 %v1504_v52, %v1503_v42  ;;  %v67_v58 = vld [vmem:[%s3427_s7 + $0x90] sm:$0xff] }
 0xaab   :  { %2262 = vmatpush3.bf16.msra.mxu0 %v1297_v41 }
 0xaac   :  { %2267 = vmatprep.subr.bf16.mxu0 %v3073_v21 }
 0xaad   :  { %1226 = vrot.lane.b32.xlu0 %v2453_v28, %s2483_s3  ;;  %v1679_v28 = vpack.c.bf16 %v67_v58, %v66_v46 }
 0xaaf   :  { %2291 = vmatprep.subr.bf16.mxu1 %v1679_v28 }
 0xab1   :  { %1230 = vrot.lane.b32.xlu0 %v2454_v47, %s2483_s3  ;;  %v1489_v47 = vld [vmem:[%s3428_s8] sm:$0xff] }
 0xb1b   :  { %v1206_v18 = vpop.permute.xlu0 %1205 }
 0xb1c   :  { %v1208_v56 = vadd.f32 %v1206_v18, %v1141_v37  ;;  %v1209_v49 = vadd.f32 %v1206_v18, %v1144_v39  ;;  %v1210_v50 = vadd.f32 %v2249_v15, %v1206_v18  ;;  %v1211_v51 = vadd.f32 %v2250_v38, %v1206_v18  ;;  %v1499_v37 = vld [vmem:[%s3428_s8 + $0x50] sm:$0xff]  ;;  %v1500_v38 = vld [vmem:[%s3428_s8 + $0x58] sm:$0xff]  ;;  %v1490_v18 = vld [vmem:[%s3428_s8 + $0x8] sm:$0xff] }
 0xb1d   :  { %v1586_v15 = vpack.c.bf16 %v1498_v35, %v1497_v0  ;;  %v1587_v39 = vpack.c.bf16 %v1500_v38, %v1499_v37 }
 0xb1e   :  { %v1212_v53 = vmul.f32 0.2, %v1208_v56  ;;  %v1213_v61 = vmul.f32 0.2, %v1209_v49  ;;  %v1214_v62 = vmul.f32 0.2, %v1210_v50 }
 0xb1f   :  { %v1227_v2 = vpop.permute.xlu0 %1226  ;;  %v1215_v1 = vmul.f32 0.2, %v1211_v51  ;;  %2283 = vmatprep.mubr.msk.bf16.mxu1 %vm354_vm8, %v1586_v15 }
 0xb20   :  { %v1216_v4 = vmax.f32 %v1208_v56, %v1212_v53  ;;  %v1217_v5 = vmax.f32 %v1209_v49, %v1213_v61  ;;  %v1218_v6 = vmax.f32 %v1210_v50, %v1214_v62  ;;  %2284 = vmatmul.mubr.msk.bf16.vlgmr.msra.gmra.mrb[28].mxu1 %vm354_vm8, %v1587_v39  ;;  %v1505_v56 = vpack.c.bf16 %v1490_v18, %v1489_v47  ;;  %v58_v50 = vld [vmem:[%s3427_s7 + $0x48] sm:$0xff]  ;;  %v1491_v53 = vld [vmem:[%s3428_s8 + $0x10] sm:$0xff]  ;;  %v1492_v61 = vld [vmem:[%s3428_s8 + $0x18] sm:$0xff] }
 0xb21   :  { %v1219_v10 = vmax.f32 %v1211_v51, %v1215_v1  ;;  %2287 = vmatprep.mubr.msk.bf16.mxu1 %vm354_vm8, %v1588_v20  ;;  %2292 = vmatpush3.bf16.msra.mxu1 %v1679_v28  ;;  %v59_v51 = vld [vmem:[%s3427_s7 + $0x50] sm:$0xff]  ;;  %v1493_v62 = vld [vmem:[%s3428_s8 + $0x20] sm:$0xff]  ;;  %v1506_v1 = vpack.c.bf16 %v1492_v61, %v1491_v53 }
 0xb22   :  { %v1236_v8 = vadd.f32 %v1225_v48, %v1216_v4  ;;  %v1237_v9 = vadd.f32 %v1227_v2, %v1217_v5  ;;  %v1238_v12 = vadd.f32 %v1229_v7, %v1218_v6  ;;  %v1671_v2 = vpack.c.bf16 %v59_v51, %v58_v50  ;;  %v1495_v5 = vld [vmem:[%s3428_s8 + $0x30] sm:$0xff]  ;;  %v1496_v6 = vld [vmem:[%s3428_s8 + $0x38] sm:$0xff] }
 0xb23   :  { %v1231_v11 = vpop.permute.xlu0 %1230  ;;  %v1508_v7 = vpack.c.bf16 %v1496_v6, %v1495_v5 }
 0xb24   :  { %v1239_v13 = vadd.f32 %v1231_v11, %v1219_v10  ;;  %v1241_v14 = vsel %vm1240_vm14, %v1236_v8, -inf  ;;  %v1244_v16 = vsel %vm1240_vm14, %v1237_v9, -inf  ;;  %v1247_v17 = vsel %vm1240_vm14, %v1238_v12, -inf  ;;  %v61_v11 = vld [vmem:[%s3427_s7 + $0x60] sm:$0xff] }
 0xb25   :  { %1242 = vmax.xlane.f32.xlu1 %v1241_v14  ;;  %1245 = vmax.xlane.f32.xlu0 %v1244_v16  ;;  %v71_v14 = vld [vmem:[%s3427_s7 + $0xb0] sm:$0xff]  ;;  %v62_v16 = vld [vmem:[%s3427_s7 + $0x68] sm:$0xff] }
 0xb26   :  { %v1250_v22 = vsel %vm1240_vm14, %v1239_v13, -inf }
 0xb28   :  { %2288 = vmatmul.mubr.msk.bf16.gmra.mrb[32].mxu1 %vm354_vm8, %v1589_v43 }
 0xb29   :  { %1248 = vmax.xlane.f32.xlu0 %v1247_v17  ;;  %1251 = vmax.xlane.f32.xlu1 %v1250_v22  ;;  %v63_v22 = vld [vmem:[%s3427_s7 + $0x70] sm:$0xff] }
 0xbb2   :  { %v1243_v23 = vpop.xlane.xlu1 %1242  ;;  %v1246_v24 = vpop.xlane.xlu0 %1245 }
 0xbb3   :  { %v1253_v25 = vsub.f32 %v1236_v8, %v1243_v23  ;;  %v1254_v26 = vsub.f32 %v1237_v9, %v1246_v24  ;;  %v69_v8 = vld [vmem:[%s3427_s7 + $0xa0] sm:$0xff]  ;;  %v60_v9 = vld [vmem:[%s3427_s7 + $0x58] sm:$0xff]  ;;  %v1673_v23 = vpack.c.bf16 %v63_v22, %v62_v16 }
 0xbb4   :  { %v72_v24 = vld [vmem:[%s3427_s7 + $0xb8] sm:$0xff] }
 0xbb5   :  { %v1257_v44 = vmul.f32 1.442695, %v1253_v25  ;;  %v1259_v45 = vmul.f32 1.442695, %v1254_v26  ;;  %v73_v25 = vld [vmem:[%s3427_s7 + $0xc0] sm:$0xff]  ;;  %v64_v26 = vld [vmem:[%s3427_s7 + $0x78] sm:$0xff] }
 0xbb6   :  { %v1252_v29 = vpop.xlane.xlu1 %1251  ;;  %v1249_v30 = vpop.xlane.xlu0 %1248 }
 0xbb7   :  { %2389 = vpow2.f32 %v1257_v44  ;;  %v1256_v31 = vsub.f32 %v1239_v13, %v1252_v29  ;;  %v1255_v32 = vsub.f32 %v1238_v12, %v1249_v30  ;;  %v1672_v12 = vpack.c.bf16 %v61_v11, %v60_v9  ;;  %v70_v13 = vld [vmem:[%s3427_s7 + $0xa8] sm:$0xff]  ;;  %v65_v29 = vld [vmem:[%s3427_s7 + $0x80] sm:$0xff] }
 0xbb8   :  { %2391 = vpow2.f32 %v1259_v45  ;;  %v1681_v17 = vpack.c.bf16 %v71_v14, %v70_v13  ;;  %v1682_v45 = vpack.c.bf16 %v73_v25, %v72_v24 }
 0xbb9   :  { %v1263_v33 = vmul.f32 1.442695, %v1256_v31  ;;  %v1261_v34 = vmul.f32 1.442695, %v1255_v32  ;;  %v1674_v31 = vpack.c.bf16 %v65_v29, %v64_v26  ;;  %v3290_v26 = vld [vmem:[%s3420_s0 + $0x18] sm:$0xff] }
 0xbbb   :  { %2393 = vpow2.f32 %v1263_v33 }
 0xbbc   :  { %2395 = vpow2.f32 %v1261_v34 }
 0xbc1   :  { %v2390_v55 = vpop.eup %2389 }
 0xbc2   :  { %v2392_v57 = vpop.eup %2391 }
 0xbc3   :  { %v1294_v36 = vpack.c.bf16 %v2392_v57, %v2390_v55 }
 0xbc5   :  { %v2394_v63 = vpop.eup %2393  ;;  %1300 = vrot.lane.b32.xlu0 %v1294_v36, %s2484_s13 }
 0xbc6   :  { %v2396_v54 = vpop.eup %2395 }
 0xbc7   :  { %v1295_v41 = vpack.c.bf16 %v2394_v63, %v2396_v54 }
 0xbc9   :  { %1302 = vrot.lane.b32.xlu1 %v1295_v41, %s2484_s13 }
 0xbf3   :  { %v2285_v44 = vpop.f32.mrb[28].mxu1 }
 0xbf4   :  { %v1636_v30 = vpop.f32.mrb[29].mxu1 }
 0xbf5   :  { %v2286_v32 = vpop.f32.mrb[30].mxu1 }
 0xbf6   :  { %v1676_v33 = vpack.c.bf16 %v2286_v32, %v2285_v44  ;;  %v1639_v34 = vpop.f32.mrb[31].mxu1  ;;  %v1414_v44 = vmul.f32 %v3290_v26, %v3290_v26 }
 0xbf7   :  { %v1675_v55 = vpack.c.bf16 %v1639_v34, %v1636_v30 }
 0xbf8   :  { %v1424_v34 = vsel %vm142_vm1, %v1414_v44, 0.0 }
 0xbf9   :  { %2299 = vmatprep.mubr.msk.bf16.mxu1 %vm359_vm2, %v1675_v55 }
 0xbfb   :  { %v2289_v0 = vpop.f32.mrb[32].mxu1 }
 0xbfc   :  { %v1652_v57 = vpop.f32.mrb[33].mxu1 }
 0xbfd   :  { %v2290_v35 = vpop.f32.mrb[34].mxu1 }
 0xbfe   :  { %v1678_v36 = vpack.c.bf16 %v2290_v35, %v2289_v0  ;;  %v1655_v15 = vpop.f32.mrb[35].mxu1 }
 0xbff   :  { %v1677_v37 = vpack.c.bf16 %v1655_v15, %v1652_v57 }
 0xc37   :  { %v1301_v48 = vpop.permute.xlu0 %1300 }
 0xc38   :  { %2263 = vmatprep.mubr.msk.bf16.mxu0 %vm354_vm8, %v1301_v48 }
 0xc3b   :  { %v1303_v49 = vpop.permute.xlu1 %1302 }
 0xc3c   :  { %2264 = vmatmul.mubr.msk.bf16.vlgmr.msra.gmra.mrb[16].mxu0 %vm354_vm8, %v1303_v49 }
 0xc3d   :  { %2268 = vmatpush3.bf16.msra.mxu0 %v3073_v21  ;;  %2271 = vmatprep.mubr.msk.bf16.mxu0 %vm354_vm8, %v1505_v56  ;;  %v1494_v21 = vld [vmem:[%s3428_s8 + $0x28] sm:$0xff] }
 0xc3e   :  { %2269 = vmatprep.subr.bf16.mxu0 %v3087_v27  ;;  %v1507_v4 = vpack.c.bf16 %v1494_v21, %v1493_v62  ;;  %v3262_v21 = vld [vmem:[%s3420_s0] sm:$0xff] }
 0xc41   :  { %2270 = vmatpush3.bf16.msra.mxu0 %v3087_v27  ;;  %v68_v27 = vld [vmem:[%s3427_s7 + $0x98] sm:$0xff] }
 0xc42   :  { %2307 = vmatprep.subr.bf16.mxu0 %v1671_v2  ;;  %v1680_v10 = vpack.c.bf16 %v69_v8, %v68_v27 }
 0xc44   :  { %2272 = vmatmul.mubr.msk.bf16.vlgmr.msra.gmra.mrb[20].mxu0 %vm354_vm8, %v1506_v1  ;;  %2293 = vmatprep.subr.bf16.mxu1 %v1680_v10  ;;  %v3269_v1 = vld [vmem:[%s3420_s0 + $0x8] sm:$0xff] }
 0xc45   :  { %2275 = vmatprep.mubr.msk.bf16.mxu0 %vm354_vm8, %v1507_v4  ;;  %2308 = vmatpush3.bf16.msra.mxu0 %v1671_v2  ;;  %v1411_v2 = vmul.f32 %v3262_v21, %v3262_v21  ;;  %v1412_v4 = vmul.f32 %v3269_v1, %v3269_v1 }
 0xc46   :  { %2309 = vmatprep.subr.bf16.mxu0 %v1672_v12  ;;  %2294 = vmatpush3.bf16.msra.mxu1 %v1680_v10 }
 0xc47   :  { %2295 = vmatprep.subr.bf16.mxu1 %v1681_v17  ;;  %v1415_v5 = vsel %vm142_vm1, %v1411_v2, 0.0  ;;  %v1418_v6 = vsel %vm142_vm1, %v1412_v4, 0.0 }
 0xc49   :  { %2310 = vmatpush3.bf16.msra.mxu0 %v1672_v12 }
 0xc4a   :  { %2311 = vmatprep.subr.bf16.mxu0 %v1673_v23  ;;  %2296 = vmatpush3.bf16.msra.mxu1 %v1681_v17 }
 0xc4b   :  { %2297 = vmatprep.subr.bf16.mxu1 %v1682_v45 }
 0xc4c   :  { %2276 = vmatmul.mubr.msk.bf16.gmra.mrb[24].mxu0 %vm354_vm8, %v1508_v7  ;;  %v3278_v7 = vld [vmem:[%s3420_s0 + $0x10] sm:$0xff] }
 0xc4d   :  { %2312 = vmatpush3.bf16.msra.mxu0 %v1673_v23  ;;  %v1413_v27 = vmul.f32 %v3278_v7, %v3278_v7 }
 0xc4e   :  { %2313 = vmatprep.subr.bf16.mxu0 %v1674_v31  ;;  %2298 = vmatpush3.bf16.msra.mxu1 %v1682_v45 }
 0xc4f   :  { %v1421_v8 = vsel %vm142_vm1, %v1413_v27, 0.0 }
 0xc51   :  { %2314 = vmatpush3.bf16.msra.mxu0 %v1674_v31  ;;  %2300 = vmatmul.mubr.msk.bf16.vlgmr.msra.gmra.mrb[36].mxu1 %vm359_vm2, %v1676_v33 }
 0xc52   :  { %2303 = vmatprep.mubr.msk.bf16.mxu1 %vm359_vm2, %v1677_v37  ;;  %v3316_v37 = vld [vmem:[%s3427_s7] sm:$0xff] }
 0xc59   :  { %2304 = vmatmul.mubr.msk.bf16.gmra.mrb[40].mxu1 %vm359_vm2, %v1678_v36 }
 0xd0f   :  { %v3245_v38 = vpop.f32.mrb[16].mxu0 }
 0xd10   :  { %v1344_v39 = vpop.f32.mrb[17].mxu0  ;;  %v1361_v54 = vmax.f32 %v3245_v38, 1e-30 }
 0xd11   :  { %v1359_v63 = vmax.f32 %v1344_v39, 1e-30  ;;  %v3247_v19 = vpop.f32.mrb[18].mxu0 }
 0xd12   :  { %v1347_v40 = vpop.f32.mrb[19].mxu0  ;;  %v1362_v41 = vmax.f32 %v3247_v19, 1e-30 }
 0xd13   :  { %2397 = vrcp.f32 %v1359_v63  ;;  %v1360_v20 = vmax.f32 %v1347_v40, 1e-30 }
 0xd15   :  { %2399 = vrcp.f32 %v1360_v20 }
 0xd16   :  { %2401 = vrcp.f32 %v1361_v54 }
 0xd17   :  { %v2273_v42 = vpop.f32.mrb[20].mxu0  ;;  %2403 = vrcp.f32 %v1362_v41 }
 0xd18   :  { %v1555_v52 = vpop.f32.mrb[21].mxu0 }
 0xd19   :  { %v2274_v43 = vpop.f32.mrb[22].mxu0 }
 0xd1a   :  { %v1668_v46 = vpack.c.bf16 %v2274_v43, %v2273_v42  ;;  %v1558_v58 = vpop.f32.mrb[23].mxu0 }
 0xd1b   :  { %v1667_v28 = vpack.c.bf16 %v1558_v58, %v1555_v52 }
 0xd1d   :  { %v2398_v47 = vpop.eup %2397  ;;  %2315 = vmatprep.mubr.msk.bf16.mxu0 %vm359_vm2, %v1667_v28  ;;  %v1868_v28 = vrot.slane %v3316_v37, %v2670_v3 }
 0xd1e   :  { %1371 = vrot.lane.b32.xlu1 %v2398_v47, %s2484_s13  ;;  %2316 = vmatmul.mubr.msk.bf16.vlgmr.msra.gmra.mrb[28].mxu0 %vm359_vm2, %v1668_v46 }
 0xd1f   :  { %v2400_v18 = vpop.eup %2399  ;;  %v2277_v48 = vpop.f32.mrb[24].mxu0 }
 0xd20   :  { %v1571_v56 = vpop.f32.mrb[25].mxu0  ;;  %1373 = vrot.lane.b32.xlu0 %v2400_v18, %s2484_s13  ;;  %v2402_v49 = vpop.eup %2401 }
 0xd21   :  { %v2278_v50 = vpop.f32.mrb[26].mxu0  ;;  %v2404_v61 = vpop.eup %2403 }
 0xd22   :  { %v1670_v51 = vpack.c.bf16 %v2278_v50, %v2277_v48  ;;  %1375 = vrot.lane.b32.xlu1 %v2402_v49, %s2484_s13  ;;  %v1574_v53 = vpop.f32.mrb[27].mxu0 }
 0xd23   :  { %v1669_v62 = vpack.c.bf16 %v1574_v53, %v1571_v56 }
 0xd24   :  { %1377 = vrot.lane.b32.xlu0 %v2404_v61, %s2484_s13  ;;  %v2301_v9 = vpop.f32.mrb[36].mxu1 }
 0xd25   :  { %2319 = vmatprep.mubr.msk.bf16.mxu0 %vm359_vm2, %v1669_v62  ;;  %v1729_v10 = vpop.f32.mrb[37].mxu1 }
 0xd26   :  { %2320 = vmatmul.mubr.msk.bf16.gmra.mrb[32].mxu0 %vm359_vm2, %v1670_v51  ;;  %v2302_v11 = vpop.f32.mrb[38].mxu1 }
 0xd27   :  { %v1732_v12 = vpop.f32.mrb[39].mxu1 }
 0xd2c   :  { %v2305_v13 = vpop.f32.mrb[40].mxu1 }
 0xd2d   :  { %v1745_v14 = vpop.f32.mrb[41].mxu1 }
 0xd2e   :  { %v2306_v16 = vpop.f32.mrb[42].mxu1 }
 0xd2f   :  { %v1748_v17 = vpop.f32.mrb[43].mxu1 }
 0xd43   :  { %1416 = vadd.xlane.f32.xlu0 %v1415_v5 }
 0xd46   :  { %1419 = vadd.xlane.f32.xlu1 %v1418_v6 }
 0xd4a   :  { %1422 = vadd.xlane.f32.xlu1 %v1421_v8 }
 0xd90   :  { %v1372_v22 = vpop.permute.xlu1 %1371 }
 0xd91   :  { %v3283_v23 = vmul.f32 %v1372_v22, %v1344_v39 }
 0xd92   :  { %v1374_v24 = vpop.permute.xlu0 %1373 }
 0xd93   :  { %v1387_v25 = vmul.f32 %v3283_v23, %v3283_v23  ;;  %v3294_v29 = vmul.f32 %v1374_v24, %v1347_v40 }
 0xd94   :  { %v1376_v45 = vpop.permute.xlu1 %1375 }
 0xd95   :  { %v3297_v30 = vmul.f32 %v3245_v38, %v1376_v45  ;;  %v1391_v31 = vsel %vm142_vm1, %v1387_v25, 0.0  ;;  %v1388_v57 = vmul.f32 %v3294_v29, %v3294_v29  ;;  %v1840_v38 = vrot.slane %v3316_v37, %v2664_v60 }
 0xd96   :  { %1392 = vadd.xlane.f32.xlu1 %v1391_v31  ;;  %v1378_v32 = vpop.permute.xlu0 %1377 }
 0xd97   :  { %v1389_v33 = vmul.f32 %v3297_v30, %v3297_v30  ;;  %v3304_v55 = vmul.f32 %v3247_v19, %v1378_v32  ;;  %v1394_v35 = vsel %vm142_vm1, %v1388_v57, 0.0 }
 0xd99   :  { %v1397_v0 = vsel %vm142_vm1, %v1389_v33, 0.0  ;;  %v1390_v36 = vmul.f32 %v3304_v55, %v3304_v55 }
 0xd9a   :  { %1398 = vadd.xlane.f32.xlu0 %v1397_v0  ;;  %1425 = vadd.xlane.f32.xlu1 %v1424_v34 }
 0xd9b   :  { %v1400_v15 = vsel %vm142_vm1, %v1390_v36, 0.0 }
 0xd9e   :  { %1395 = vadd.xlane.f32.xlu0 %v1394_v35 }
 0xda2   :  { %1401 = vadd.xlane.f32.xlu0 %v1400_v15 }
 0xdf1   :  { %v2317_v39 = vpop.f32.mrb[28].mxu0 }
 0xdf2   :  { %v1815_v63 = vadd.f32 %v2317_v39, %v2301_v9  ;;  %v1806_v19 = vpop.f32.mrb[29].mxu0 }
 0xdf3   :  { %v1807_v40 = vadd.f32 %v1806_v19, %v1729_v10  ;;  %v2318_v54 = vpop.f32.mrb[30].mxu0 }
 0xdf4   :  { %v1843_v20 = vadd.f32 %v1840_v38, %v1815_v63  ;;  %v1818_v41 = vadd.f32 %v2318_v54, %v2302_v11  ;;  %v1809_v42 = vpop.f32.mrb[31].mxu0  ;;  %v1417_v54 = vpop.xlane.xlu0 %1416 }
 0xdf5   :  { %v1841_v52 = vadd.f32 %v1840_v38, %v1807_v40  ;;  %v1810_v43 = vadd.f32 %v1809_v42, %v1732_v12  ;;  %v1420_v40 = vpop.xlane.xlu1 %1419 }
 0xdf6   :  { %v1851_v46 = vmul.f32 0.2, %v1843_v20  ;;  %v1844_v58 = vadd.f32 %v1840_v38, %v1818_v41  ;;  %v1427_v41 = vmax.f32 %v1417_v54, 1e-12 }
 0xdf7   :  { %v1849_v47 = vmul.f32 0.2, %v1841_v52  ;;  %v1842_v18 = vadd.f32 %v1840_v38, %v1810_v43 }
 0xdf8   :  { %v1852_v48 = vmul.f32 0.2, %v1844_v58  ;;  %v1859_v56 = vmax.f32 %v1843_v20, %v1851_v46  ;;  %2405 = vrsqrt.f32 %v1427_v41 }
 0xdf9   :  { %v1850_v60 = vmul.f32 0.2, %v1842_v18  ;;  %v2321_v49 = vpop.f32.mrb[32].mxu0  ;;  %v1857_v50 = vmax.f32 %v1841_v52, %v1849_v47  ;;  %v1423_v20 = vpop.xlane.xlu1 %1422 }
 0xdfa   :  { %v1831_v51 = vadd.f32 %v2321_v49, %v2305_v13  ;;  %v1822_v53 = vpop.f32.mrb[33].mxu0  ;;  %v1860_v61 = vmax.f32 %v1844_v58, %v1852_v48  ;;  %v1871_v6 = vmul.f32 %v1868_v28, %v1859_v56  ;;  %v1429_v52 = vmax.f32 %v1423_v20, 1e-12 }
 0xdfb   :  { %v1823_v62 = vadd.f32 %v1822_v53, %v1745_v14  ;;  %v2322_v2 = vpop.f32.mrb[34].mxu0  ;;  %v1869_v4 = vmul.f32 %v1868_v28, %v1857_v50  ;;  %v1858_v5 = vmax.f32 %v1842_v18, %v1850_v60 }
 0xdfc   :  { %v1847_v27 = vadd.f32 %v1840_v38, %v1831_v51  ;;  %v1834_v8 = vadd.f32 %v2322_v2, %v2306_v16  ;;  %v1825_v9 = vpop.f32.mrb[35].mxu0  ;;  %v1872_v10 = vmul.f32 %v1868_v28, %v1860_v61  ;;  %v1883_v45 = vsel %vm354_vm8, %v1871_v6, 0.0 }
 0xdfd   :  { %v1845_v3 = vadd.f32 %v1840_v38, %v1823_v62  ;;  %v1826_v11 = vadd.f32 %v1825_v9, %v1748_v17  ;;  %v1877_v12 = vsel %vm354_vm8, %v1869_v4, 0.0  ;;  %v1870_v22 = vmul.f32 %v1868_v28, %v1858_v5 }
 0xdfe   :  { %v1855_v24 = vmul.f32 0.2, %v1847_v27  ;;  %v1848_v25 = vadd.f32 %v1840_v38, %v1834_v8  ;;  %1878 = vadd.xlane.f32.xlu0 %v1877_v12  ;;  %v1886_v33 = vsel %vm354_vm8, %v1872_v10, 0.0 }
 0xdff   :  { %v1853_v13 = vmul.f32 0.2, %v1845_v3  ;;  %v1846_v44 = vadd.f32 %v1840_v38, %v1826_v11  ;;  %v1880_v14 = vsel %vm354_vm8, %v1870_v22, 0.0 }
 0xe00   :  { %v1863_v31 = vmax.f32 %v1847_v27, %v1855_v24  ;;  %v1856_v32 = vmul.f32 0.2, %v1848_v25  ;;  %1881 = vadd.xlane.f32.xlu1 %v1880_v14 }
 0xe01   :  { %v1854_v16 = vmul.f32 0.2, %v1846_v44  ;;  %v1861_v34 = vmax.f32 %v1845_v3, %v1853_v13 }
 0xe02   :  { %1884 = vadd.xlane.f32.xlu0 %v1883_v45  ;;  %v1864_v17 = vmax.f32 %v1848_v25, %v1856_v32  ;;  %v1875_v35 = vmul.f32 %v1868_v28, %v1863_v31  ;;  %v2406_v56 = vpop.eup %2405 }
 0xe03   :  { %v1873_v0 = vmul.f32 %v1868_v28, %v1861_v34  ;;  %v1862_v57 = vmax.f32 %v1846_v44, %v1854_v16  ;;  %v1439_v50 = vmul.f32 %v3262_v21, %v2406_v56  ;;  %v1904_v44 = vrot.slane %v3316_v37, %v2661_v59 }
 0xe04   :  { %1887 = vadd.xlane.f32.xlu1 %v1886_v33  ;;  %v1876_v38 = vmul.f32 %v1868_v28, %v1864_v17  ;;  %v1895_v63 = vsel %vm354_vm8, %v1875_v35, 0.0 }
 0xe05   :  { %v1889_v36 = vsel %vm354_vm8, %v1873_v0, 0.0  ;;  %v1874_v15 = vmul.f32 %v1868_v28, %v1862_v57  ;;  %v1428_v28 = vmax.f32 %v1420_v40, 1e-12 }
 0xe06   :  { %1890 = vadd.xlane.f32.xlu0 %v1889_v36  ;;  %v1898_v19 = vsel %vm354_vm8, %v1876_v38, 0.0 }
 0xe07   :  { %v1892_v39 = vsel %vm354_vm8, %v1874_v15, 0.0 }
 0xe08   :  { %1893 = vadd.xlane.f32.xlu1 %v1892_v39 }
 0xe0a   :  { %1896 = vadd.xlane.f32.xlu0 %v1895_v63 }
 0xe0c   :  { %1899 = vadd.xlane.f32.xlu1 %v1898_v19 }
 0xe23   :  { %v1393_v42 = vpop.xlane.xlu1 %1392 }
 0xe24   :  { %v1403_v43 = vmax.f32 %v1393_v42, 1e-12 }
 0xe26   :  { %2407 = vrsqrt.f32 %v1403_v43 }
 0xe27   :  { %v1399_v46 = vpop.xlane.xlu0 %1398  ;;  %v1426_v58 = vpop.xlane.xlu1 %1425  ;;  %2409 = vrsqrt.f32 %v1429_v52 }
 0xe28   :  { %v1405_v47 = vmax.f32 %v1399_v46, 1e-12  ;;  %v1430_v18 = vmax.f32 %v1426_v58, 1e-12 }
 0xe2a   :  { %2411 = vrsqrt.f32 %v1405_v47 }
 0xe2b   :  { %v1396_v48 = vpop.xlane.xlu0 %1395  ;;  %2413 = vrsqrt.f32 %v1428_v28 }
 0xe2c   :  { %v1404_v60 = vmax.f32 %v1396_v48, 1e-12  ;;  %2415 = vrsqrt.f32 %v1430_v18 }
 0xe2e   :  { %2417 = vrsqrt.f32 %v1404_v60 }
 0xe2f   :  { %v1402_v49 = vpop.xlane.xlu0 %1401 }
 0xe30   :  { %v2408_v51 = vpop.eup %2407  ;;  %v1406_v53 = vmax.f32 %v1402_v49, 1e-12 }
 0xe31   :  { %v1435_v61 = vmul.f32 %v2408_v51, %v3283_v23  ;;  %v2410_v62 = vpop.eup %2409 }
 0xe32   :  { %2419 = vrsqrt.f32 %v1406_v53  ;;  %v1441_v27 = vmul.f32 %v3278_v7, %v2410_v62 }
 0xe33   :  { %v1443_v2 = vmul.f32 %v1439_v50, %v1435_v61 }
 0xe34   :  { %v2412_v4 = vpop.eup %2411 }
 0xe35   :  { %v1447_v5 = vsel %vm142_vm1, %v1443_v2, 0.0  ;;  %v1437_v6 = vmul.f32 %v2412_v4, %v3297_v30  ;;  %v2414_v8 = vpop.eup %2413 }
 0xe36   :  { %1448 = vadd.xlane.f32.xlu0 %v1447_v5  ;;  %v2416_v9 = vpop.eup %2415  ;;  %v1440_v23 = vmul.f32 %v3269_v1, %v2414_v8 }
 0xe37   :  { %v1445_v10 = vmul.f32 %v1441_v27, %v1437_v6  ;;  %v1442_v22 = vmul.f32 %v3290_v26, %v2416_v9 }
 0xe38   :  { %v2418_v3 = vpop.eup %2417 }
 0xe39   :  { %v1453_v21 = vsel %vm142_vm1, %v1445_v10, 0.0  ;;  %v1436_v11 = vmul.f32 %v2418_v3, %v3294_v29 }
 0xe3a   :  { %1454 = vadd.xlane.f32.xlu0 %v1453_v21 }
 0xe3b   :  { %v1444_v12 = vmul.f32 %v1440_v23, %v1436_v11 }
 0xe3c   :  { %v2420_v24 = vpop.eup %2419 }
 0xe3d   :  { %v1450_v30 = vsel %vm142_vm1, %v1444_v12, 0.0  ;;  %v1438_v7 = vmul.f32 %v2420_v24, %v3304_v55 }
 0xe3e   :  { %1451 = vadd.xlane.f32.xlu1 %v1450_v30 }
 0xe3f   :  { %v1446_v25 = vmul.f32 %v1442_v22, %v1438_v7 }
 0xe41   :  { %v1456_v13 = vsel %vm142_vm1, %v1446_v25, 0.0 }
 0xe42   :  { %1457 = vadd.xlane.f32.xlu1 %v1456_v13 }
 0xe8b   :  { %v1879_v29 = vpop.xlane.xlu0 %1878 }
 0xe8c   :  { %v3344_v14 = vadd.f32 %v1904_v44, %v1879_v29 }
 0xe8d   :  { %v1882_v1 = vpop.xlane.xlu1 %1881 }
 0xe8e   :  { %v1954_v45 = vand.u32 2147483647, %v3344_v14  ;;  %v3347_v26 = vadd.f32 %v1904_v44, %v1882_v1  ;;  %v1946_v23 = vmax.f32 %v3344_v14, 0.0 }
 0xe8f   :  { %v1885_v31 = vpop.xlane.xlu0 %1884 }
 0xe90   :  { %v1962_v32 = vsub.f32 0.0, %v1954_v45  ;;  %v1955_v55 = vand.u32 2147483647, %v3347_v26  ;;  %v3350_v16 = vadd.f32 %v1904_v44, %v1885_v31  ;;  %v1947_v7 = vmax.f32 %v3347_v26, 0.0 }
 0xe91   :  { %v1888_v33 = vpop.xlane.xlu1 %1887 }
 0xe92   :  { %v1970_v34 = vmul.f32 1.442695, %v1962_v32  ;;  %v1963_v17 = vsub.f32 0.0, %v1955_v55  ;;  %v1956_v0 = vand.u32 2147483647, %v3350_v16  ;;  %v3353_v59 = vadd.f32 %v1904_v44, %v1888_v33 }
 0xe93   :  { %v1891_v37 = vpop.xlane.xlu0 %1890  ;;  %v1948_v45 = vmax.f32 %v3350_v16, 0.0 }
 0xe94   :  { %2421 = vpow2.f32 %v1970_v34  ;;  %v1972_v57 = vmul.f32 1.442695, %v1963_v17  ;;  %v1964_v35 = vsub.f32 0.0, %v1956_v0  ;;  %v3355_v36 = vadd.f32 %v1904_v44, %v1891_v37 }
 0xe95   :  { %v1957_v15 = vand.u32 2147483647, %v3353_v59  ;;  %v1894_v38 = vpop.xlane.xlu1 %1893  ;;  %v1949_v17 = vmax.f32 %v3353_v59, 0.0 }
 0xe96   :  { %2423 = vpow2.f32 %v1972_v57  ;;  %v1974_v39 = vmul.f32 1.442695, %v1964_v35  ;;  %v1958_v63 = vand.u32 2147483647, %v3355_v36  ;;  %v3359_v40 = vadd.f32 %v1904_v44, %v1894_v38 }
 0xe97   :  { %v1965_v19 = vsub.f32 0.0, %v1957_v15  ;;  %v1897_v54 = vpop.xlane.xlu0 %1896  ;;  %v1950_v37 = vmax.f32 %v3355_v36, 0.0 }
 0xe98   :  { %2425 = vpow2.f32 %v1974_v39  ;;  %v1966_v20 = vsub.f32 0.0, %v1958_v63  ;;  %v3361_v41 = vadd.f32 %v1904_v44, %v1897_v54  ;;  %v1959_v52 = vand.u32 2147483647, %v3359_v40 }
 0xe99   :  { %v1976_v42 = vmul.f32 1.442695, %v1965_v19  ;;  %v1900_v43 = vpop.xlane.xlu1 %1899  ;;  %v2022_v54 = vmul.f32 0.0, %v3355_v36 }
 0xe9a   :  { %v1978_v46 = vmul.f32 1.442695, %v1966_v20  ;;  %v1960_v58 = vand.u32 2147483647, %v3361_v41  ;;  %v1967_v28 = vsub.f32 0.0, %v1959_v52  ;;  %v3365_v47 = vadd.f32 %v1904_v44, %v1900_v43 }
 0xe9b   :  { %2427 = vpow2.f32 %v1976_v42  ;;  %v1951_v43 = vmax.f32 %v3359_v40, 0.0 }
 0xe9c   :  { %2429 = vpow2.f32 %v1978_v46  ;;  %v1968_v18 = vsub.f32 0.0, %v1960_v58  ;;  %v1980_v48 = vmul.f32 1.442695, %v1967_v28  ;;  %v1961_v56 = vand.u32 2147483647, %v3365_v47 }
 0xe9d   :  { %v1952_v28 = vmax.f32 %v3361_v41, 0.0 }
 0xe9e   :  { %v2422_v60 = vpop.eup %2421  ;;  %v1982_v49 = vmul.f32 1.442695, %v1968_v18  ;;  %2431 = vpow2.f32 %v1980_v48  ;;  %v1969_v51 = vsub.f32 0.0, %v1961_v56  ;;  %v2023_v56 = vmul.f32 0.0, %v3359_v40 }
 0xe9f   :  { %v1986_v50 = vadd.f32 1.0, %v2422_v60 }
 0xea0   :  { %v2424_v53 = vpop.eup %2423  ;;  %2433 = vpow2.f32 %v1982_v49  ;;  %v1984_v62 = vmul.f32 1.442695, %v1969_v51 }
 0xea1   :  { %2435 = vlog2.f32 %v1986_v50  ;;  %v1987_v61 = vadd.f32 1.0, %v2424_v53  ;;  %v2024_v50 = vmul.f32 0.0, %v3361_v41 }
 0xea2   :  { %v2426_v2 = vpop.eup %2425 }
 0xea3   :  { %2437 = vlog2.f32 %v1987_v61  ;;  %v1988_v4 = vadd.f32 1.0, %v2426_v2  ;;  %v1953_v61 = vmax.f32 %v3365_v47, 0.0 }
 0xea4   :  { %2439 = vpow2.f32 %v1984_v62 }
 0xea5   :  { %v2428_v5 = vpop.eup %2427  ;;  %2441 = vlog2.f32 %v1988_v4 }
 0xea6   :  { %v2430_v6 = vpop.eup %2429  ;;  %v1989_v27 = vadd.f32 1.0, %v2428_v5 }
 0xea7   :  { %v1990_v8 = vadd.f32 1.0, %v2430_v6  ;;  %v2025_v6 = vmul.f32 0.0, %v3365_v47  ;;  %v2460_v47 = vld [vmem:[%s3421_s1] sm:$0xff] }
 0xea8   :  { %2443 = vlog2.f32 %v1989_v27  ;;  %v2432_v9 = vpop.eup %2431 }
 0xea9   :  { %2445 = vlog2.f32 %v1990_v8  ;;  %v1991_v3 = vadd.f32 1.0, %v2432_v9 }
 0xeaa   :  { %v2434_v10 = vpop.eup %2433 }
 0xeab   :  { %v2436_v21 = vpop.eup %2435  ;;  %v1992_v11 = vadd.f32 1.0, %v2434_v10  ;;  %2447 = vlog2.f32 %v1991_v3 }
 0xeac   :  { %v1995_v12 = vmul.f32 0.6931472, %v2436_v21 }
 0xead   :  { %v2438_v22 = vpop.eup %2437  ;;  %2449 = vlog2.f32 %v1992_v11 }
 0xeae   :  { %v2440_v24 = vpop.eup %2439  ;;  %v2010_v30 = vadd.f32 %v1995_v12, %v1946_v23  ;;  %v1997_v25 = vmul.f32 0.6931472, %v2438_v22 }
 0xeaf   :  { %v2442_v13 = vpop.eup %2441  ;;  %v1993_v44 = vadd.f32 1.0, %v2440_v24 }
 0xeb0   :  { %v2026_v29 = vsub.f32 %v2010_v30, %v3344_v14  ;;  %v2011_v1 = vadd.f32 %v1997_v25, %v1947_v7  ;;  %v1999_v31 = vmul.f32 0.6931472, %v2442_v13 }
 0xeb1   :  { %2451 = vlog2.f32 %v1993_v44  ;;  %v2461_v44 = vld [vmem:[%s3421_s1 + $0x10] sm:$0xff] }
 0xeb2   :  { %v2444_v32 = vpop.eup %2443  ;;  %v2027_v55 = vsub.f32 %v2011_v1, %v3347_v26  ;;  %v2012_v33 = vadd.f32 %v1999_v31, %v1948_v45  ;;  %v2034_v57 = vsel %vm1471_vm15, %v2026_v29, 0.0  ;;  %v2462_v1 = vld [vmem:[%s3421_s1 + $0x8] sm:$0xff] }
 0xeb3   :  { %v2446_v34 = vpop.eup %2445  ;;  %v2001_v0 = vmul.f32 0.6931472, %v2444_v32 }
 0xeb4   :  { %v2035_v14 = vsel %vm1471_vm15, %v2027_v55, 0.0  ;;  %v2028_v35 = vsub.f32 %v2012_v33, %v3350_v16  ;;  %v2003_v15 = vmul.f32 0.6931472, %v2446_v34 }
 0xeb5   :  { %v2036_v38 = vadd.f32 %v2035_v14, %v2034_v57  ;;  %v2013_v39 = vadd.f32 %v2001_v0, %v1949_v17  ;;  %v2448_v63 = vpop.eup %2447  ;;  %v2463_v0 = vld [vmem:[%s3421_s1 + $0x18] sm:$0xff] }
 0xeb6   :  { %v2037_v19 = vsel %vm1471_vm15, %v2028_v35, 0.0  ;;  %v2014_v26 = vadd.f32 %v2003_v15, %v1950_v37  ;;  %v2005_v46 = vmul.f32 0.6931472, %v2448_v63 }
 0xeb7   :  { %v2450_v20 = vpop.eup %2449  ;;  %v2038_v42 = vadd.f32 %v2037_v19, %v2036_v38  ;;  %v2029_v52 = vsub.f32 %v2013_v39, %v3353_v59 }
 0xeb8   :  { %v2030_v58 = vsub.f32 %v2014_v26, %v2022_v54  ;;  %v2007_v16 = vmul.f32 0.6931472, %v2450_v20  ;;  %v2015_v48 = vadd.f32 %v2005_v46, %v1951_v43 }
 0xeb9   :  { %v2039_v18 = vsel %vm1471_vm15, %v2029_v52, 0.0 }
 0xeba   :  { %v2040_v60 = vadd.f32 %v2039_v18, %v2038_v42  ;;  %v2041_v49 = vsel %vm1471_vm15, %v2030_v58, 0.0  ;;  %v2016_v36 = vadd.f32 %v2007_v16, %v1952_v28  ;;  %v2031_v59 = vsub.f32 %v2015_v48, %v2023_v56 }
 0xebb   :  { %v2452_v51 = vpop.eup %2451 }
 0xebc   :  { %v2032_v53 = vsub.f32 %v2016_v36, %v2024_v50  ;;  %v2009_v62 = vmul.f32 0.6931472, %v2452_v51  ;;  %v2042_v2 = vadd.f32 %v2041_v49, %v2040_v60  ;;  %v2043_v4 = vsel %vm1471_vm15, %v2031_v59, 0.0 }
 0xebe   :  { %v2017_v5 = vadd.f32 %v2009_v62, %v1953_v61  ;;  %v2044_v27 = vadd.f32 %v2043_v4, %v2042_v2  ;;  %v2045_v40 = vsel %vm1471_vm15, %v2032_v53, 0.0 }
 0xec0   :  { %v2033_v8 = vsub.f32 %v2017_v5, %v2025_v6  ;;  %v2046_v9 = vadd.f32 %v2045_v40, %v2044_v27 }
 0xec2   :  { %v2047_v10 = vsel %vm1471_vm15, %v2033_v8, 0.0 }
 0xec3   :  { %v1449_v41 = vpop.xlane.xlu0 %1448  ;;  %v2048_v3 = vadd.f32 %v2047_v10, %v2046_v9 }
 0xec4   :  { %v1459_v21 = vsub.f32 1.0, %v1449_v41 }
 0xec5   :  { %2049 = vadd.xlane.f32.xlu1 %v2048_v3 }
 0xec6   :  { %v1463_v12 = vmul.f32 %v1459_v21, %v1459_v21 }
 0xec7   :  { %v1455_v11 = vpop.xlane.xlu0 %1454 }
 0xec8   :  { %v1461_v23 = vsub.f32 1.0, %v1455_v11  ;;  %v1467_v7 = vmul.f32 %v2460_v47, %v1463_v12 }
 0xeca   :  { %v1465_v24 = vmul.f32 %v1461_v23, %v1461_v23  ;;  %v1472_v32 = vsel %vm1471_vm15, %v1467_v7, 0.0 }
 0xecb   :  { %v1452_v22 = vpop.xlane.xlu1 %1451 }
 0xecc   :  { %v1460_v30 = vsub.f32 1.0, %v1452_v22  ;;  %v1469_v29 = vmul.f32 %v2461_v44, %v1465_v24 }
 0xece   :  { %v1464_v25 = vmul.f32 %v1460_v30, %v1460_v30  ;;  %v1475_v17 = vsel %vm1471_vm15, %v1469_v29, 0.0 }
 0xecf   :  { %v1458_v13 = vpop.xlane.xlu1 %1457 }
 0xed0   :  { %v1468_v45 = vmul.f32 %v2462_v1, %v1464_v25  ;;  %v1462_v31 = vsub.f32 1.0, %v1458_v13 }
 0xed2   :  { %v1473_v55 = vsel %vm1471_vm15, %v1468_v45, 0.0  ;;  %v1466_v33 = vmul.f32 %v1462_v31, %v1462_v31 }
 0xed3   :  { %v1474_v34 = vadd.f32 %v1473_v55, %v1472_v32 }
 0xed4   :  { %v1470_v37 = vmul.f32 %v2463_v0, %v1466_v33 }
 0xed5   :  { %v1476_v57 = vadd.f32 %v1475_v17, %v1474_v34 }
 0xed6   :  { %v1477_v14 = vsel %vm1471_vm15, %v1470_v37, 0.0 }
 0xed7   :  { %v1478_v35 = vadd.f32 %v1477_v14, %v1476_v57 }
 0xed9   :  { %1479 = vadd.xlane.f32.xlu0 %v1478_v35 }
 0xf52   :  { %v2050_v15 = vpop.xlane.xlu1 %2049 }
 0xf53   :  { %v2051_v38 = vrot.slane %v2050_v15, 4 }
 0xf55   :  { %v2052_v39 = vadd.f32 %v2051_v38, %v2050_v15 }
 0xf57   :  { %v2053_v63 = vrot.slane %v2052_v39, 2 }
 0xf59   :  { %v2054_v20 = vadd.f32 %v2053_v63, %v2052_v39 }
 0xf5b   :  { %v2055_v43 = vrot.slane %v2054_v20, 1 }
 0xf5d   :  { %v2056_v28 = vadd.f32 %v2055_v43, %v2054_v20 }
 0xf66   :  { %v1480_v19 = vpop.xlane.xlu0 %1479 }
 0xf67   :  { %v1481_v26 = vrot.slane %v1480_v19, 4 }
 0xf69   :  { %v1482_v54 = vadd.f32 %v1481_v26, %v1480_v19 }
 0xf6b   :  { %v1483_v42 = vrot.slane %v1482_v54, 2 }
 0xf6d   :  { %v1484_v52 = vadd.f32 %v1483_v42, %v1482_v54 }
 0xf6f   :  { %v1485_v46 = vrot.slane %v1484_v52, 1 }
 0xf71   :  { %v1486_v58 = vadd.f32 %v1485_v46, %v1484_v52 }
 0xf73   :  { %2331 = vpush %v1486_v58 }
 0xf74   :  { %2333 = vpush %v2056_v28 }
 0xfa4   :  { %s2332_s1 = spop %2331 }
 0xfa5   :  { %s1488_s29 = smul.f32 0.0625, %s2332_s1  ;;  %s2334_s30 = spop %2333 }
 0xfa6   :  { %s2058_s10 = smul.f32 0.015625, %s2334_s30 }
 0xfa8   :  { %s2059_s11 = sadd.f32 %s2058_s10, %s1488_s29 }
 0xfaa   :  { %2061 = sst [smem:[#allocation3]] %s2059_s11 }
 0xfab   :  { %2473 = shalt.err (!%p2470_p2)
}
 0xfac   :  { %s2485_s22 = smov [#allocation3]  }
 0xfad   :  { %2069 = dma.smem_to_hbm %s2485_s22, 16, %s3429_s9, [#allocation4]  }
 0xfae   :  { %2474 = dma.done.wait [#allocation4], 16  }
 0xfaf   :  { %2475 = vsyncadd [#allocation4], 4294967280 }
 0xfb0   :  { %2073 = sfence }
 0xfb1   :  { %2074 = vsyncpa [#allocation4], 1 }

</bundles_post_ra>
